<compile_context>
chip_gen: v7x
topology: tpu7x:2x2x1
jax: 0.10.0
libtpu: 0.0.40
codegen_flags: <defaults>
</compile_context>

<pallas_src>
import math

import jax
import jax.numpy as jnp
from jax.experimental import pallas as pl
from jax.experimental.pallas import tpu as pltpu


def _ffn_kernel(x_ref, w1_ref, b1_ref, w2_ref, b2_ref, o_ref, acc_ref):
    h = pl.program_id(1)

    @pl.when(h == 0)
    def _():
        acc_ref[...] = jnp.zeros_like(acc_ref)

    # ---- first GEMM: (tm, D) @ (D, th) -> (tm, th), f32 accumulate on MXU ----
    a = jnp.dot(x_ref[...], w1_ref[...], preferred_element_type=jnp.float32)
    a = a + b1_ref[...]  # (1, th) bias broadcast over rows

    # ---- tanh-approximation GELU, computed in f32 (VPU + EUP) ----
    c = jnp.float32(math.sqrt(2.0 / math.pi))
    inner = c * (a * (1.0 + jnp.float32(0.044715) * a * a))
    g = jnp.float32(0.5) * a * (1.0 + jnp.tanh(inner))

    # ---- second GEMM partial: (tm, th) @ (th, D) -> accumulate (tm, D) ----
    acc_ref[...] += jnp.dot(
        g.astype(w2_ref.dtype), w2_ref[...], preferred_element_type=jnp.float32
    )

    @pl.when(h == pl.num_programs(1) - 1)
    def _():
        o_ref[...] = (acc_ref[...] + b2_ref[...]).astype(o_ref.dtype)


def feed_forward(x, w1, b1, w2, b2, *, row_tile=256, hidden_tile=512):
    """y = GELU(x @ W1 + b1) @ W2 + b2 with tanh-approx GELU, fused in one call."""
    orig_shape = x.shape
    d = orig_shape[-1]
    hidden = w1.shape[1]
    assert w1.shape == (d, hidden) and w2.shape == (hidden, d)
    assert hidden % hidden_tile == 0 and d % 128 == 0

    x2d = x.reshape(-1, d)
    rows = x2d.shape[0]

    # Pad rows to a multiple of 8 (f32 sublane), then pick the row tile.
    rows_pad8 = ((rows + 7) // 8) * 8
    tm = row_tile if rows_pad8 >= row_tile else rows_pad8
    rows_padded = ((rows_pad8 + tm - 1) // tm) * tm
    if rows_padded != rows:
        x2d = jnp.pad(x2d, ((0, rows_padded - rows), (0, 0)))

    b1_2d = b1.reshape(1, hidden)
    b2_2d = b2.reshape(1, d)

    grid = (rows_padded // tm, hidden // hidden_tile)

    cost = pl.CostEstimate(
        flops=4 * rows_padded * d * hidden,
        transcendentals=rows_padded * hidden,
        bytes_accessed=(
            x2d.size + w1.size + b1.size + w2.size + b2.size + rows_padded * d
        )
        * 4,
    )

    out = pl.pallas_call(
        _ffn_kernel,
        out_shape=jax.ShapeDtypeStruct((rows_padded, d), x.dtype),
        grid=grid,
        in_specs=[
            pl.BlockSpec((tm, d), lambda i, h: (i, 0)),            # x rows
            pl.BlockSpec((d, hidden_tile), lambda i, h: (0, h)),    # W1 column slab
            pl.BlockSpec((1, hidden_tile), lambda i, h: (0, h)),    # b1 slab
            pl.BlockSpec((hidden_tile, d), lambda i, h: (h, 0)),    # W2 row slab
            pl.BlockSpec((1, d), lambda i, h: (0, 0)),              # b2
        ],
        out_specs=pl.BlockSpec((tm, d), lambda i, h: (i, 0)),
        scratch_shapes=[pltpu.VMEM((tm, d), jnp.float32)],
        compiler_params=pltpu.CompilerParams(
            dimension_semantics=("parallel", "arbitrary"),
        ),
        cost_estimate=cost,
    )(x2d, w1, b1_2d, w2, b2_2d)

    return out[:rows].reshape(orig_shape)


if __name__ == "__main__":
    key = jax.random.PRNGKey(0)
    k_x, k_w1, k_b1, k_w2, k_b2 = jax.random.split(key, 5)

    # Matches the reference: cfg['emb_dim'] = 768, x = torch.rand(2, 3, 768)
    B, T, D = 2, 3, 768
    H = 4 * D

    x = jax.random.uniform(k_x, (B, T, D), dtype=jnp.float32)
    w1 = jax.random.normal(k_w1, (D, H), dtype=jnp.float32) * 0.02
    b1 = jax.random.normal(k_b1, (H,), dtype=jnp.float32) * 0.02
    w2 = jax.random.normal(k_w2, (H, D), dtype=jnp.float32) * 0.02
    b2 = jax.random.normal(k_b2, (D,), dtype=jnp.float32) * 0.02

    y = feed_forward(x, w1, b1, w2, b2)
    jax.block_until_ready(y)

    # Pure-JAX reference of the same FeedForward (tanh-GELU).
    c = jnp.float32(math.sqrt(2.0 / math.pi))
    a_ref = x @ w1 + b1
    g_ref = 0.5 * a_ref * (1.0 + jnp.tanh(c * (a_ref + 0.044715 * a_ref**3)))
    y_ref = g_ref @ w2 + b2

    assert y.shape == x.shape and y.dtype == x.dtype
    err = jnp.max(jnp.abs(y - y_ref))
    assert err < 1e-4, f"max abs err = {err}"

    print("KERNEL_OK")
</pallas_src>

<mosaic_0001>
module attributes {stable_mosaic.version = 11 : i64} {
  func.func @_ffn_kernel(%arg0: i32, %arg1: i32, %arg2: memref<8x768xf32, #tpu.memory_space<vmem>>, %arg3: memref<768x512xf32, #tpu.memory_space<vmem>>, %arg4: memref<1x512xf32, #tpu.memory_space<vmem>>, %arg5: memref<512x768xf32, #tpu.memory_space<vmem>>, %arg6: memref<1x768xf32, #tpu.memory_space<vmem>>, %arg7: memref<8x768xf32, #tpu.memory_space<vmem>>, %arg8: memref<8x768xf32, #tpu.memory_space<vmem>>) attributes {dimension_semantics = [#tpu.dimension_semantics<parallel>, #tpu.dimension_semantics<arbitrary>], iteration_bounds = array<i64: 1, 6>, scalar_prefetch = 0 : i64, scratch_operands = 1 : i64, tpu.core_type = #tpu.core_type<tc>, window_params = [{transform_indices = @transform_0, window_bounds = array<i64: 8, 768>}, {transform_indices = @transform_1, window_bounds = array<i64: 768, 512>}, {transform_indices = @transform_2, window_bounds = array<i64: 1, 512>}, {transform_indices = @transform_3, window_bounds = array<i64: 512, 768>}, {pipeline_mode = #tpu.pipeline_mode<synchronous>, transform_indices = @transform_4, window_bounds = array<i64: 1, 768>}, {transform_indices = @transform_5, window_bounds = array<i64: 8, 768>}]} {
    %c0_i32 = arith.constant 0 : i32
    %0 = arith.cmpi eq, %arg1, %c0_i32 : i32
    %1 = arith.extui %0 : i1 to i32
    %c0_i32_0 = arith.constant 0 : i32
    %2 = arith.cmpi ne, %1, %c0_i32_0 : i32
    scf.if %2 {
      %cst_19 = arith.constant 0.000000e+00 : f32
      %31 = vector.broadcast %cst_19 : f32 to vector<8x768xf32>
      %c0_20 = arith.constant 0 : index
      %c0_21 = arith.constant 0 : index
      %32 = vector.load %arg8[%c0_20, %c0_21] : memref<8x768xf32, #tpu.memory_space<vmem>>, vector<8x768xf32>
      tpu.vector_store %arg8[%c0_20, %c0_21], %31 {strides = array<i32>} : memref<8x768xf32, #tpu.memory_space<vmem>>, vector<8x768xf32>,
    } else {
    }
    %c0 = arith.constant 0 : index
    %c0_1 = arith.constant 0 : index
    %3 = vector.load %arg2[%c0, %c0_1] : memref<8x768xf32, #tpu.memory_space<vmem>>, vector<8x768xf32>
    %c0_2 = arith.constant 0 : index
    %c0_3 = arith.constant 0 : index
    %4 = vector.load %arg3[%c0_2, %c0_3] : memref<768x512xf32, #tpu.memory_space<vmem>>, vector<768x512xf32>
    %cst = arith.constant dense<0.000000e+00> : vector<8x512xf32>
    %5 = tpu.matmul %3, %4, %cst {dimension_numbers = #tpu.dot_dimension_numbers<[1], [0], [0], [1], [0, 0, 1, 1], [], []>} : vector<8x768xf32>, vector<768x512xf32>, vector<8x512xf32> -> vector<8x512xf32>
    %c0_4 = arith.constant 0 : index
    %c0_5 = arith.constant 0 : index
    %6 = vector.load %arg4[%c0_4, %c0_5] : memref<1x512xf32, #tpu.memory_space<vmem>>, vector<1x512xf32>
    %7 = vector.broadcast %6 : vector<1x512xf32> to vector<8x512xf32>
    %8 = arith.addf %5, %7 : vector<8x512xf32>
    %cst_6 = arith.constant 4.471500e-02 : f32
    %9 = vector.broadcast %cst_6 : f32 to vector<8x512xf32>
    %10 = arith.mulf %9, %8 : vector<8x512xf32>
    %11 = arith.mulf %10, %8 : vector<8x512xf32>
    %cst_7 = arith.constant 1.000000e+00 : f32
    %12 = vector.broadcast %cst_7 : f32 to vector<8x512xf32>
    %13 = arith.addf %12, %11 : vector<8x512xf32>
    %14 = arith.mulf %8, %13 : vector<8x512xf32>
    %cst_8 = arith.constant 0.797884583 : f32
    %15 = vector.broadcast %cst_8 : f32 to vector<8x512xf32>
    %16 = arith.mulf %15, %14 : vector<8x512xf32>
    %cst_9 = arith.constant 5.000000e-01 : f32
    %17 = vector.broadcast %cst_9 : f32 to vector<8x512xf32>
    %18 = arith.mulf %17, %8 : vector<8x512xf32>
    %19 = math.tanh %16 : vector<8x512xf32>
    %cst_10 = arith.constant 1.000000e+00 : f32
    %20 = vector.broadcast %cst_10 : f32 to vector<8x512xf32>
    %21 = arith.addf %20, %19 : vector<8x512xf32>
    %22 = arith.mulf %18, %21 : vector<8x512xf32>
    %c0_11 = arith.constant 0 : index
    %c0_12 = arith.constant 0 : index
    %23 = vector.load %arg8[%c0_11, %c0_12] : memref<8x768xf32, #tpu.memory_space<vmem>>, vector<8x768xf32>
    %c0_13 = arith.constant 0 : index
    %c0_14 = arith.constant 0 : index
    %24 = vector.load %arg5[%c0_13, %c0_14] : memref<512x768xf32, #tpu.memory_space<vmem>>, vector<512x768xf32>
    %cst_15 = arith.constant dense<0.000000e+00> : vector<8x768xf32>
    %25 = tpu.matmul %22, %24, %cst_15 {dimension_numbers = #tpu.dot_dimension_numbers<[1], [0], [0], [1], [0, 0, 1, 1], [], []>} : vector<8x512xf32>, vector<512x768xf32>, vector<8x768xf32> -> vector<8x768xf32>
    %26 = arith.addf %23, %25 : vector<8x768xf32>
    %c0_16 = arith.constant 0 : index
    %c0_17 = arith.constant 0 : index
    %27 = vector.load %arg8[%c0_16, %c0_17] : memref<8x768xf32, #tpu.memory_space<vmem>>, vector<8x768xf32>
    tpu.vector_store %arg8[%c0_16, %c0_17], %26 {strides = array<i32>} : memref<8x768xf32, #tpu.memory_space<vmem>>, vector<8x768xf32>,
    %c5_i32 = arith.constant 5 : i32
    %28 = arith.cmpi eq, %arg1, %c5_i32 : i32
    %29 = arith.extui %28 : i1 to i32
    %c0_i32_18 = arith.constant 0 : i32
    %30 = arith.cmpi ne, %29, %c0_i32_18 : i32
    scf.if %30 {
      %c0_19 = arith.constant 0 : index
      %c0_20 = arith.constant 0 : index
      %31 = vector.load %arg8[%c0_19, %c0_20] : memref<8x768xf32, #tpu.memory_space<vmem>>, vector<8x768xf32>
      %c0_21 = arith.constant 0 : index
      %c0_22 = arith.constant 0 : index
      %32 = vector.load %arg6[%c0_21, %c0_22] : memref<1x768xf32, #tpu.memory_space<vmem>>, vector<1x768xf32>
      %33 = vector.broadcast %32 : vector<1x768xf32> to vector<8x768xf32>
      %34 = arith.addf %31, %33 : vector<8x768xf32>
      %c0_23 = arith.constant 0 : index
      %c0_24 = arith.constant 0 : index
      %35 = vector.load %arg7[%c0_23, %c0_24] : memref<8x768xf32, #tpu.memory_space<vmem>>, vector<8x768xf32>
      tpu.vector_store %arg7[%c0_23, %c0_24], %34 {strides = array<i32>} : memref<8x768xf32, #tpu.memory_space<vmem>>, vector<8x768xf32>,
    } else {
    }
    return
  }
  func.func @transform_0(%arg0: i32, %arg1: i32) -> (i32, i32) {
    %c0_i32 = arith.constant 0 : i32
    %c0_i32_0 = arith.constant 0 : i32
    return %arg0, %c0_i32 : i32, i32
  }
  func.func @transform_1(%arg0: i32, %arg1: i32) -> (i32, i32) {
    %c0_i32 = arith.constant 0 : i32
    %c0_i32_0 = arith.constant 0 : i32
    return %c0_i32, %arg1 : i32, i32
  }
  func.func @transform_2(%arg0: i32, %arg1: i32) -> (i32, i32) {
    %c0_i32 = arith.constant 0 : i32
    %c0_i32_0 = arith.constant 0 : i32
    return %c0_i32, %arg1 : i32, i32
  }
  func.func @transform_3(%arg0: i32, %arg1: i32) -> (i32, i32) {
    %c0_i32 = arith.constant 0 : i32
    %c0_i32_0 = arith.constant 0 : i32
    return %arg1, %c0_i32 : i32, i32
  }
  func.func @transform_4(%arg0: i32, %arg1: i32) -> (i32, i32) {
    %c0_i32 = arith.constant 0 : i32
    %c0_i32_0 = arith.constant 0 : i32
    %c0_i32_1 = arith.constant 0 : i32
    return %c0_i32, %c0_i32_0 : i32, i32
  }
  func.func @transform_5(%arg0: i32, %arg1: i32) -> (i32, i32) {
    %c0_i32 = arith.constant 0 : i32
    %c0_i32_0 = arith.constant 0 : i32
    return %arg0, %c0_i32 : i32, i32
  }
}

</mosaic_0001>

<bundles_post_ra>
// kernel: tpu_custom_call.1
= control target key start
LH: loop header
LB: loop body
LE: loop exit
PB: predicated region body
PF: predicated region fallthrough
CT: control target
= control target key end

     0   :  { %s4609_s0 = inlined_call_operand.hbm [shape: f32[8,768], index: 0, kind: input, shape index: {}]   ;;  %s4610_s1 = inlined_call_operand.hbm [shape: f32[768,3072], index: 1, kind: input, shape index: {}]   ;;  %s4611_s2 = inlined_call_operand.hbm [shape: f32[1,3072], index: 2, kind: input, shape index: {}]   ;;  %s4612_s3 = inlined_call_operand.hbm [shape: f32[3072,768], index: 3, kind: input, shape index: {}]   ;;  %s4613_s4 = inlined_call_operand.hbm [shape: f32[1,768], index: 4, kind: input, shape index: {}]   ;;  %s4614_s5 = inlined_call_operand.hbm [shape: f32[8,768], index: 5, kind: output, shape index: {}]  }
   0x1   :  { %4629 = sst [smem:[#allocation21_spill]] %s4610_s1 }
   0x2   :  { %4630 = sst [smem:[#allocation22_spill]] %s4613_s4 }
   0x3   :  { %4631 = sst [smem:[#allocation23_spill]] %s4614_s5 }
   0x4   :  { %10 = vsyncpa [#allocation4], 0 }
   0x5   :  { %11 = vsyncpa [#allocation7], 0 }
   0x6   :  { %13 = vsyncpa [#allocation7 + $0x1], 0 }
   0x7   :  { %14 = vsyncpa [#allocation10], 0 }
   0x8   :  { %16 = vsyncpa [#allocation10 + $0x1], 0 }
   0x9   :  { %17 = vsyncpa [#allocation5], 0  ;;  %s3467_s18 = smov 0   ;;  %s3469_s19 = smov 0  }
   0xa   :  { %s3471_s20 = smov 0   ;;  %s3473_s21 = smov 0  }
   0xb   :  { %s3475_s22 = smov 0   ;;  %s3477_s23 = smov 0  }
   0xc LB: > { %4632 = sst [smem:[#allocation18_spill]] %s3415_s21  ;;  %s3496_s24 = sadd.s32 4294967295, %s3423_s23   ;;  %s3423_s23 = sphi %s3477_s23, %s23_s23   ;;  %s3419_s22 = sphi %s3475_s22, %s4665_s22   ;;  %s3415_s21 = sphi %s3473_s21, %s4664_s21   ;;  %s3411_s20 = sphi %s3471_s20, %s4663_s20   ;;  %s3407_s19 = sphi %s3469_s19, %s4662_s19   ;;  %s3403_s18 = sphi %s3467_s18, %s4661_s18  }
   0xd   : > { %s68_s25 = sadd.s32 1, %s3411_s20  ;;  %p75_p0 = scmp.ne.s32.totalorder %s3411_s20, %s3407_s19 }
   0xe   : > { %p76_p1 = scmp.eq.s32.totalorder %s3423_s23, 0  ;;  %p81_p2 = scmp.ne.s32.totalorder %s3407_s19, %s3403_s18 }
   0xf   : > { %p4615_p3 = scmp.eq.s32.totalorder %s3496_s24, 0  ;;  %p2264_p5 = scmp.ge.s32.totalorder %s3423_s23, 1 }
  0x10   : > { %p77_p4 = por %p76_p1, %p75_p0  ;;  %p191_p7 = scmp.lt.s32.totalorder %s3423_s23, 7 }
  0x11   : > { %p3507_p6 = por %p4615_p3, %p81_p2  ;;  %s3425_s28 = smov [#allocation11]  }
  0x12   : > { %p3512_p8 = pnand %p2264_p5, %p191_p7  ;;  %s218_s29 = sshll.u32 %s3425_s28, 4  ;;  %s219_s29 = int_to_ptr.vmem [resolvable:$true] %s218_s29 }
  0x13   : > { %s4633_s26 = scalar_select %p3507_p6, 1, 0 }
  0x14   : > { %s4634_s27 = scalar_select %p3512_p8, 1, 0 }
  0x15   : > { %p3096_p9 = pneg %p3512_p8  ;;  %p3115_p10 = scmp.lt.s32.totalorder %s3423_s23, 6 }
  0x16   : > { %s4619_s30 = sand.u32 1, %s3423_s23   ;;  %s4637_s4 = sld [smem:[#allocation22_spill]] }
  0x17   : > { %p3522_p11 = pnand %p3096_p9, %p4615_p3  ;;  %p3526_p12 = pnand %p3115_p10, %p77_p4 }
  0x19   : > { %s4635_s6 = scalar_select %p3522_p11, 1, 0 }
  0x1a   : > { %s4636_s7 = scalar_select %p3526_p12, 1, 0 }
  0x1b   : > { %p4620_p0 = pneg %p3522_p11 }
  0x1c   : > { %s3185_s10 = scalar_lea.hbm %s4637_s4, 96 }
  0x1d   : > { %p3186_p13 = scmp.ne.s32.totalorder %s4637_s4, %s3185_s10  ;;  %p3192_p4 = scmp.lt.u32.totalorder %s3185_s10, %s4637_s4 }
  0x1f   : > { %p3188_p1 = pnand %p4620_p0, %p3186_p13 }
  0x21   : > { %p3189_p2 = pneg %p3188_p1 }
  0x23   : > { %p3194_p5 = pnand %p3192_p4, %p3189_p2 }
  0x25   : > { %3197 = shalt.err (!%p3194_p5)
}
  0x26   : > { %s3198_s15 = scalar_lea.vmem %s219_s29, 96  ;;  %p3206_p3 = scmp.lt.s32.totalorder %s219_s29, %s219_s29 }
  0x27   : > { %p3199_p7 = scmp.ne.s32.totalorder %s219_s29, %s3198_s15  ;;  %p3207_p6 = scmp.lt.s32.totalorder %s3198_s15, %s3198_s15 }
  0x29   : > { %p3201_p9 = pnand %p3199_p7, %p4620_p0  ;;  %p3208_p8 = por %p3207_p6, %p3206_p3 }
  0x2b   : > { %p3202_p10 = pneg %p3201_p9 }
  0x2d   : > { %p3209_p12 = pnand %p3208_p8, %p3202_p10 }
  0x2f   : > { %3212 = shalt.err (!%p3209_p12)
}
  0x30   : > { %3102 = dma.hbm_to_vmem [thread:$0]  (!%p3522_p11), %s4637_s4, 96, %s219_s29, [#allocation10]  }
  0x31   : > { %s32_s18 = sadd.s32 1, %s3419_s22  ;;  %s4623_s28 = sand.u32 1, %s3411_s20  }
  0x32   : > { %p33_p3 = scmp.ge.s32.totalorder %s32_s18, 6  ;;  %s3556_s8 = smul.u32 3072, %s4623_s28 }
  0x33   : > { %s2286_s9 = sshll.u32 %s3419_s22, 9  ;;  %s4639_s1 = sld [smem:[#allocation21_spill]] }
  0x34   : > { %s4667_s18 = smov (%p33_p3, %s32_s18), 0  ;;  %s233_s13 = scalar_lea.vmem [#allocation6], %s3556_s8 }
  0x35   : > { %4638 = sst [smem:[#allocation19_spill]] %s4667_s18  ;;  %s65_s29 = ssub.s32 %s3419_s22, %s4667_s18 }
  0x36   : > { %s240_s14 = sshll.u32 %s233_s13, 4  ;;  %p66_p6 = scmp.eq.s32.totalorder %s65_s29, 0  ;;  %s3569_s14 = int_to_ptr.vmem [resolvable:$true] %s240_s14 }
  0x37   : > { %s3578_s16 = scalar_lea.sflag [#allocation7], %s4619_s30  ;;  %p4641_p12 = scmp.ne.s32.totalorder %s4636_s7, 0 }
  0x38   : > { %s3574_s15 = scalar_select %p66_p6, %s3411_s20, %s68_s25  }
  0x39   : > { %s3564_s12 = scalar_lea.hbm %s4639_s1, %s2286_s9  ;;  %p3584_p13 = pneg %p4641_p12 }
  0x3a   : > { %4640 = sst [smem:[#allocation20_spill]] %s3574_s15  ;;  %s3213_s17 = scalar_lea.hbm %s3564_s12, 49152 }
  0x3b   : > { %p3214_p8 = scmp.ne.s32.totalorder %s3564_s12, %s3213_s17  ;;  %s3218_s29 = scalar_lea.hbm %s4639_s1, 294912 }
  0x3c   : > { %s4642_s9 = scalar_select %p3584_p13, 1, 0 }
  0x3d   : > { %p3216_p1 = pnand %p3584_p13, %p3214_p8  ;;  %p3219_p4 = scmp.lt.u32.totalorder %s3564_s12, %s4639_s1 }
  0x3e   : > { %p3220_p5 = scmp.lt.u32.totalorder %s3218_s29, %s3213_s17  ;;  %p3222_p9 = scmp.lt.u32.totalorder %s3213_s17, %s3564_s12 }
  0x3f   : > { %p3217_p2 = pneg %p3216_p1 }
  0x40   : > { %p3221_p7 = por %p3220_p5, %p3219_p4 }
  0x42   : > { %p3223_p10 = por %p3222_p9, %p3221_p7 }
  0x44   : > { %p3224_p3 = pnand %p3223_p10, %p3217_p2 }
  0x46   : > { %3227 = shalt.err (!%p3224_p3)
}
  0x47   : > { %s3228_s30 = scalar_lea.vmem %s3569_s14, 49152  ;;  %s3426_s10 = smov [#allocation6]  }
  0x48   : > { %p3229_p6 = scmp.ne.s32.totalorder %s3569_s14, %s3228_s30  ;;  %s3233_s11 = sshll.u32 %s3426_s10, 4  ;;  %s3234_s11 = int_to_ptr.vmem [resolvable:$false] %s3233_s11 }
  0x49   : > { %s3235_s25 = scalar_lea.vmem %s3234_s11, 98304  ;;  %p3236_p0 = scmp.lt.s32.totalorder %s3569_s14, %s3234_s11 }
  0x4a   : > { %p3231_p8 = pnand %p3229_p6, %p3584_p13  ;;  %p3237_p11 = scmp.lt.s32.totalorder %s3235_s25, %s3228_s30 }
  0x4c   : > { %p3232_p1 = pneg %p3231_p8  ;;  %p3238_p4 = por %p3237_p11, %p3236_p0 }
  0x4e   : > { %p3239_p5 = pnand %p3238_p4, %p3232_p1 }
  0x50   : > { %3242 = shalt.err (!%p3239_p5)
}
  0x51   : > { %s3427_s17 = smov 3072   ;;  %s3428_s29 = smov 512  }
  0x52   : > { %s3429_s13 = smov 32   ;;  %s3430_s28 = smov [#allocation3]  }
  0x53   : > { %3106 = dma.hbm_to_vmem [thread:$0]  (!%p4641_p12), %s3564_s12, 49152, %s3569_s14, %s3578_s16, %s3427_s17, %s3428_s29, %s3429_s13  }
  0x54   : > { %s207_s10 = sshll.u32 %s3430_s28, 4  ;;  %s4643_s1 = sand.u32 1, %s3411_s20   ;;  %s208_s10 = int_to_ptr.vmem [resolvable:$true] %s207_s10 }
  0x55   : > { %s2270_s11 = sshll.u32 %s4643_s1, 2  ;;  %s3243_s4 = scalar_lea.hbm %s4609_s0, 768 }
  0x56   : > { %p3244_p11 = scmp.ne.s32.totalorder %s4609_s0, %s3243_s4  ;;  %p4644_p0 = scmp.ne.s32.totalorder %s4635_s6, 0 }
  0x57   : > { %p3250_p10 = scmp.lt.u32.totalorder %s3243_s4, %s4609_s0 }
  0x58   : > { %p4645_p2 = pneg %p4644_p0 }
  0x5a   : > { %p3246_p7 = pnand %p3244_p11, %p4645_p2 }
  0x5c   : > { %p3247_p9 = pneg %p3246_p7 }
  0x5e   : > { %p3252_p3 = pnand %p3250_p10, %p3247_p9 }
  0x60   : > { %3255 = shalt.err (!%p3252_p3)
}
  0x61   : > { %s3256_s28 = scalar_lea.vmem %s208_s10, 768  ;;  %p4646_p8 = pmov %p4645_p2 }
  0x62   : > { %p3257_p6 = scmp.ne.s32.totalorder %s208_s10, %s3256_s28  ;;  %p3264_p5 = scmp.lt.s32.totalorder %s208_s10, %s208_s10 }
  0x63   : > { %p3265_p12 = scmp.lt.s32.totalorder %s3256_s28, %s3256_s28 }
  0x64   : > { %p3259_p1 = pnand %p3257_p6, %p4646_p8 }
  0x65   : > { %p3266_p13 = por %p3265_p12, %p3264_p5 }
  0x66   : > { %p3260_p4 = pneg %p3259_p1 }
  0x68   : > { %p3267_p2 = pnand %p3266_p13, %p3260_p4 }
  0x6a   : > { %3270 = shalt.err (!%p3267_p2)
}
  0x6b   : > { %3099 = dma.hbm_to_vmem [thread:$0]  (!%p4644_p0), %s4609_s0, 768, %s208_s10, [#allocation4]  }
  0x6c   : > { %s2287_s4 = sshll.u32 %s3419_s22, 6  ;;  %s254_s14 = scalar_lea.vmem [#allocation8], %s2270_s11 }
  0x6d   : > { %s3634_s12 = scalar_lea.hbm %s4611_s2, %s2287_s4  ;;  %s262_s15 = sshll.u32 %s254_s14, 4  ;;  %s263_s15 = int_to_ptr.vmem [resolvable:$true] %s262_s15 }
  0x6e   : > { %s3271_s6 = scalar_lea.hbm %s3634_s12, 64  ;;  %p4647_p13 = scmp.ne.s32.totalorder %s4642_s9, 0 }
  0x6f   : > { %p3272_p12 = scmp.ne.s32.totalorder %s3634_s12, %s3271_s6  ;;  %s3276_s13 = scalar_lea.hbm %s4611_s2, 384 }
  0x70   : > { %p3277_p0 = scmp.lt.u32.totalorder %s3634_s12, %s4611_s2  ;;  %p3278_p9 = scmp.lt.u32.totalorder %s3276_s13, %s3271_s6 }
  0x71   : > { %p3274_p11 = pnand %p3272_p12, %p4647_p13  ;;  %p3280_p3 = scmp.lt.u32.totalorder %s3271_s6, %s3634_s12 }
  0x72   : > { %p3279_p10 = por %p3278_p9, %p3277_p0 }
  0x73   : > { %p3275_p7 = pneg %p3274_p11 }
  0x74   : > { %p3281_p6 = por %p3280_p3, %p3279_p10 }
  0x76   : > { %p3282_p8 = pnand %p3281_p6, %p3275_p7 }
  0x78   : > { %3285 = shalt.err (!%p3282_p8)
}
  0x79   : > { %s3286_s11 = scalar_lea.vmem %s263_s15, 64  ;;  %s3431_s25 = smov [#allocation8]  }
  0x7a   : > { %p3287_p1 = scmp.ne.s32.totalorder %s263_s15, %s3286_s11  ;;  %s3291_s28 = sshll.u32 %s3431_s25, 4  ;;  %s3292_s28 = int_to_ptr.vmem [resolvable:$false] %s3291_s28 }
  0x7b   : > { %s3293_s1 = scalar_lea.vmem %s3292_s28, 128  ;;  %p3294_p2 = scmp.lt.s32.totalorder %s263_s15, %s3292_s28 }
  0x7c   : > { %p3289_p4 = pnand %p3287_p1, %p4647_p13  ;;  %p3295_p12 = scmp.lt.s32.totalorder %s3293_s1, %s3286_s11 }
  0x7e   : > { %p3290_p5 = pneg %p3289_p4  ;;  %p3296_p11 = por %p3295_p12, %p3294_p2 }
  0x80   : > { %p3297_p0 = pnand %p3296_p11, %p3290_p5 }
  0x82   : > { %3300 = shalt.err (!%p3297_p0)
}
  0x83   : > { %p4648_p9 = scmp.ne.s32.totalorder %s4636_s7, 0  ;;  %s3076_s18 = smul.u32 49152, %s3419_s22 }
  0x84   : > { %s273_s4 = scalar_lea.vmem [#allocation9], %s3556_s8  ;;  %s4649_s17 = sand.u32 1, %s3423_s23  }
  0x85   : > { %3109 = dma.hbm_to_vmem [thread:$0]  (!%p4648_p9), %s3634_s12, 64, %s263_s15, %s3578_s16  }
  0x86   : > { %s281_s5 = sshll.u32 %s273_s4, 4  ;;  %s3659_s6 = scalar_lea.hbm %s4612_s3, %s3076_s18  ;;  %s3661_s5 = int_to_ptr.vmem [resolvable:$true] %s281_s5 }
  0x87   : > { %s3665_s29 = scalar_lea.sflag [#allocation10], %s4649_s17  ;;  %s3301_s13 = scalar_lea.hbm %s3659_s6, 49152 }
  0x88   : > { %p3302_p7 = scmp.ne.s32.totalorder %s3659_s6, %s3301_s13  ;;  %s3306_s12 = scalar_lea.hbm %s4612_s3, 294912 }
  0x89   : > { %p3307_p6 = scmp.lt.u32.totalorder %s3659_s6, %s4612_s3  ;;  %p3308_p8 = scmp.lt.u32.totalorder %s3306_s12, %s3301_s13 }
  0x8a   : > { %p3304_p10 = pnand %p3302_p7, %p4647_p13  ;;  %p3310_p4 = scmp.lt.u32.totalorder %s3301_s13, %s3659_s6 }
  0x8b   : > { %p3309_p1 = por %p3308_p8, %p3307_p6 }
  0x8c   : > { %p3305_p3 = pneg %p3304_p10 }
  0x8d   : > { %p3311_p5 = por %p3310_p4, %p3309_p1 }
  0x8f   : > { %p3312_p2 = pnand %p3311_p5, %p3305_p3 }
  0x91   : > { %3315 = shalt.err (!%p3312_p2)
}
  0x92   : > { %s3316_s30 = scalar_lea.vmem %s3661_s5, 49152  ;;  %s3432_s11 = smov [#allocation9]  }
  0x93   : > { %p3317_p12 = scmp.ne.s32.totalorder %s3661_s5, %s3316_s30  ;;  %s3321_s25 = sshll.u32 %s3432_s11, 4  ;;  %s3322_s25 = int_to_ptr.vmem [resolvable:$false] %s3321_s25 }
  0x94   : > { %s3323_s28 = scalar_lea.vmem %s3322_s25, 98304  ;;  %p3324_p7 = scmp.lt.s32.totalorder %s3661_s5, %s3322_s25 }
  0x95   : > { %p3319_p11 = pnand %p3317_p12, %p4647_p13  ;;  %p3325_p10 = scmp.lt.s32.totalorder %s3323_s28, %s3316_s30 }
  0x97   : > { %p3320_p0 = pneg %p3319_p11  ;;  %p3326_p6 = por %p3325_p10, %p3324_p7 }
  0x99   : > { %p3327_p8 = pnand %p3326_p6, %p3320_p0 }
  0x9b   : > { %3330 = shalt.err (!%p3327_p8)
}
  0x9c   : > { %s3433_s1 = smov 768   ;;  %s3434_s18 = smov 48  }
  0x9d   : > { %3112 = dma.hbm_to_vmem [thread:$0]  (!%p4648_p9), %s3659_s6, 49152, %s3661_s5, %s3665_s29, %s3433_s1, %s3433_s1, %s3434_s18  }
  0x9e   : > { %p4650_p13 = scmp.ne.s32.totalorder %s4634_s27, 0 }
  0x9f   : > { %p4651_p3 = scmp.eq.s32.totalorder (!%p4650_p13), %s3496_s24, 0 }
  0xa0   : > { %293 = sbr.rel (%p4650_p13) target bundleno = 1081 (0x439), region = 40 }
  0xa7   : > { %3382 = dma.done.wait (%p4651_p3), [#allocation4], 768   ;;  %p4652_p1 = pmov %p4651_p3 }
  0xa8   : > { %s299_s9 = sand.u32 1, %s3496_s24   ;;  %s301_s4 = sand.u32 1, %s3407_s19  }
  0xa9   : > { %3384 = vsyncadd (%p4652_p1), [#allocation4], 4294966528  ;;  %s3077_s21 = smul.u32 3072, %s301_s4  ;;  %s300_s14 = scalar_lea.sflag [#allocation7], %s299_s9 }
  0xaa   : > { %p4653_p4 = scmp.ne.s32.totalorder %s4633_s26, 0 }
  0xab   : > { %s3697_s17 = scalar_lea.vmem [#allocation6], %s3077_s21 }
  0xac   : > { %3386 = dma.done.wait (%p4653_p4), %s300_s14, 49216  }
  0xad   : > { %3388 = vsyncadd (%p4653_p4), %s300_s14, 4294918080  ;;  %s3703_s27 = sshll.u32 %s301_s4, 2  ;;  %s318_s5 = scalar_lea.sflag [#allocation10], %s299_s9 }
  0xae   : > { %s312_s7 = scalar_lea.vmem [#allocation8], %s3703_s27  ;;  %s3706_s6 = scalar_lea.vmem [#allocation9], %s3077_s21 }
  0xaf   : > { %3390 = dma.done.wait (%p4653_p4), %s318_s5, 49152  }
  0xb0   : > { %3392 = vsyncadd (%p4653_p4), %s318_s5, 4294918144  ;;  %p4654_p9 = pmov %p4652_p1 }
  0xb1   : > { %p4655_p5 = pmov %p4652_p1 }
  0xb2   : > { %3394 = dma.done.wait (%p4654_p9), [#allocation10], 96  }
  0xb3   : > { %3396 = vsyncadd (%p4655_p5), [#allocation10], 4294967200  ;;  %s4656_s29 = sld [smem:[#allocation18_spill]] }
  0xb9   : > { %p2280_p2 = scmp.ne.s32.totalorder %s4656_s29, 0 }
  0xba   : > { %v3435_v0 = vmov (!%p2280_p2), 0.0  }
  0xbb   : > { %363 = sbr.rel (%p2280_p2) target bundleno = 194 (0xc2), region = 64  ;;  %364 = vst [vmem:[#allocation2] sm:$0xff] (!%p2280_p2), %v3435_v0  ;;  %365 = vst [vmem:[#allocation2 + $0x8] sm:$0xff] (!%p2280_p2), %v3435_v0 }
  0xbc   : > { %366 = vst [vmem:[#allocation2 + $0x10] sm:$0xff] (!%p2280_p2), %v3435_v0  ;;  %367 = vst [vmem:[#allocation2 + $0x18] sm:$0xff] (!%p2280_p2), %v3435_v0 }
  0xbd   : > { %368 = vst [vmem:[#allocation2 + $0x20] sm:$0xff] (!%p2280_p2), %v3435_v0  ;;  %369 = vst [vmem:[#allocation2 + $0x28] sm:$0xff] (!%p2280_p2), %v3435_v0 }
  0xc2 PF: > { %v377_v1 = vld [vmem:[%s3697_s17 + $0x8] sm:$0xff]  ;;  %v376_v6 = vld [vmem:[%s3697_s17] sm:$0xff]  ;;  %s4657_s26 = sld [smem:[#allocation18_spill]] }
  0xc3   : > { %v381_v2 = vld [vmem:[%s3697_s17 + $0x28] sm:$0xff]  ;;  %v380_v7 = vld [vmem:[%s3697_s17 + $0x20] sm:$0xff] }
  0xc4   : > { %v505_v3 = vld [vmem:[%s3697_s17 + $0x408] sm:$0xff]  ;;  %v2288_v4 = vpack.c.bf16 %v381_v2, %v377_v1  ;;  %v2290_v9 = vpack.c.bf16 %v380_v7, %v376_v6  ;;  %v504_v10 = vld [vmem:[%s3697_s17 + $0x400] sm:$0xff] }
  0xc5   : > { %v509_v5 = vld [vmem:[%s3697_s17 + $0x428] sm:$0xff]  ;;  %v508_v11 = vld [vmem:[%s3697_s17 + $0x420] sm:$0xff] }
  0xc6   : > { %v2352_v8 = vpack.c.bf16 %v509_v5, %v505_v3  ;;  %v385_v12 = vld [vmem:[%s3697_s17 + $0x48] sm:$0xff]  ;;  %2289 = vmatprep.subr.bf16.mxu1 %v2288_v4  ;;  %v2354_v13 = vpack.c.bf16 %v508_v11, %v504_v10  ;;  %v384_v19 = vld [vmem:[%s3697_s17 + $0x40] sm:$0xff] }
  0xc7   : > { %v389_v14 = vld [vmem:[%s3697_s17 + $0x68] sm:$0xff]  ;;  %2291 = vmatpush1.bf16.msra.mxu1 %v2290_v9  ;;  %v388_v20 = vld [vmem:[%s3697_s17 + $0x60] sm:$0xff] }
  0xc8   : > { %v513_v15 = vld [vmem:[%s3697_s17 + $0x448] sm:$0xff]  ;;  %2353 = vmatprep.subr.bf16.mxu0 %v2352_v8  ;;  %v2292_v17 = vpack.c.bf16 %v389_v14, %v385_v12  ;;  %v512_v21 = vld [vmem:[%s3697_s17 + $0x440] sm:$0xff]  ;;  %v2294_v22 = vpack.c.bf16 %v388_v20, %v384_v19  ;;  %p2281_p12 = scmp.ne.s32.totalorder %s4657_s26, 5 }
  0xc9   : > { %v517_v16 = vld [vmem:[%s3697_s17 + $0x468] sm:$0xff]  ;;  %2355 = vmatpush1.bf16.msra.mxu0 %v2354_v13  ;;  %v516_v23 = vld [vmem:[%s3697_s17 + $0x460] sm:$0xff] }
  0xca   : > { %v2356_v18 = vpack.c.bf16 %v517_v16, %v513_v15  ;;  %v393_v24 = vld [vmem:[%s3697_s17 + $0x88] sm:$0xff]  ;;  %2293 = vmatprep.subr.bf16.mxu1 %v2292_v17  ;;  %v2358_v26 = vpack.c.bf16 %v516_v23, %v512_v21  ;;  %v392_v30 = vld [vmem:[%s3697_s17 + $0x80] sm:$0xff] }
  0xcb   : > { %v397_v25 = vld [vmem:[%s3697_s17 + $0xa8] sm:$0xff]  ;;  %v396_v32 = vld [vmem:[%s3697_s17 + $0xa0] sm:$0xff]  ;;  %2295 = vmatpush1.bf16.msra.mxu1 %v2294_v22 }
  0xcc   : > { %2357 = vmatprep.subr.bf16.mxu0 %v2356_v18  ;;  %v2296_v27 = vpack.c.bf16 %v397_v25, %v393_v24  ;;  %v521_v28 = vld [vmem:[%s3697_s17 + $0x488] sm:$0xff]  ;;  %v520_v33 = vld [vmem:[%s3697_s17 + $0x480] sm:$0xff]  ;;  %v2298_v35 = vpack.c.bf16 %v396_v32, %v392_v30 }
  0xcd   : > { %v525_v29 = vld [vmem:[%s3697_s17 + $0x4a8] sm:$0xff]  ;;  %v524_v34 = vld [vmem:[%s3697_s17 + $0x4a0] sm:$0xff]  ;;  %2359 = vmatpush1.bf16.msra.mxu0 %v2358_v26 }
  0xce   : > { %v2360_v31 = vpack.c.bf16 %v525_v29, %v521_v28  ;;  %v401_v36 = vld [vmem:[%s3697_s17 + $0xc8] sm:$0xff]  ;;  %2297 = vmatprep.subr.bf16.mxu1 %v2296_v27  ;;  %v2362_v39 = vpack.c.bf16 %v524_v34, %v520_v33  ;;  %v400_v42 = vld [vmem:[%s3697_s17 + $0xc0] sm:$0xff] }
  0xcf   : > { %v405_v37 = vld [vmem:[%s3697_s17 + $0xe8] sm:$0xff]  ;;  %v404_v43 = vld [vmem:[%s3697_s17 + $0xe0] sm:$0xff]  ;;  %2299 = vmatpush1.bf16.msra.mxu1 %v2298_v35 }
  0xd0   : > { %v529_v38 = vld [vmem:[%s3697_s17 + $0x4c8] sm:$0xff]  ;;  %v2300_v40 = vpack.c.bf16 %v405_v37, %v401_v36  ;;  %2361 = vmatprep.subr.bf16.mxu0 %v2360_v31  ;;  %v528_v45 = vld [vmem:[%s3697_s17 + $0x4c0] sm:$0xff]  ;;  %v2302_v51 = vpack.c.bf16 %v404_v43, %v400_v42 }
  0xd1   : > { %v533_v41 = vld [vmem:[%s3697_s17 + $0x4e8] sm:$0xff]  ;;  %v532_v46 = vld [vmem:[%s3697_s17 + $0x4e0] sm:$0xff]  ;;  %2363 = vmatpush1.bf16.msra.mxu0 %v2362_v39 }
  0xd2   : > { %v2364_v44 = vpack.c.bf16 %v533_v41, %v529_v38  ;;  %v409_v47 = vld [vmem:[%s3697_s17 + $0x108] sm:$0xff]  ;;  %2301 = vmatprep.subr.bf16.mxu1 %v2300_v40  ;;  %v2366_v52 = vpack.c.bf16 %v532_v46, %v528_v45  ;;  %v408_v54 = vld [vmem:[%s3697_s17 + $0x100] sm:$0xff] }
  0xd3   : > { %v413_v48 = vld [vmem:[%s3697_s17 + $0x128] sm:$0xff]  ;;  %v412_v55 = vld [vmem:[%s3697_s17 + $0x120] sm:$0xff]  ;;  %2303 = vmatpush1.bf16.msra.mxu1 %v2302_v51 }
  0xd4   : > { %v537_v49 = vld [vmem:[%s3697_s17 + $0x508] sm:$0xff]  ;;  %v2304_v53 = vpack.c.bf16 %v413_v48, %v409_v47  ;;  %v536_v56 = vld [vmem:[%s3697_s17 + $0x500] sm:$0xff]  ;;  %2365 = vmatprep.subr.bf16.mxu0 %v2364_v44  ;;  %v2306_v63 = vpack.c.bf16 %v412_v55, %v408_v54 }
  0xd5   : > { %v541_v50 = vld [vmem:[%s3697_s17 + $0x528] sm:$0xff]  ;;  %v540_v58 = vld [vmem:[%s3697_s17 + $0x520] sm:$0xff]  ;;  %2367 = vmatpush1.bf16.msra.mxu0 %v2366_v52 }
  0xd6   : > { %v2368_v57 = vpack.c.bf16 %v541_v50, %v537_v49  ;;  %v417_v59 = vld [vmem:[%s3697_s17 + $0x148] sm:$0xff]  ;;  %2305 = vmatprep.subr.bf16.mxu1 %v2304_v53  ;;  %v2370_v0 = vpack.c.bf16 %v540_v58, %v536_v56  ;;  %v416_v2 = vld [vmem:[%s3697_s17 + $0x140] sm:$0xff] }
  0xd7   : > { %v421_v60 = vld [vmem:[%s3697_s17 + $0x168] sm:$0xff]  ;;  %v420_v3 = vld [vmem:[%s3697_s17 + $0x160] sm:$0xff]  ;;  %2307 = vmatpush1.bf16.msra.mxu1 %v2306_v63 }
  0xd8   : > { %v545_v61 = vld [vmem:[%s3697_s17 + $0x548] sm:$0xff]  ;;  %v2308_v1 = vpack.c.bf16 %v421_v60, %v417_v59  ;;  %v544_v4 = vld [vmem:[%s3697_s17 + $0x540] sm:$0xff]  ;;  %2369 = vmatprep.subr.bf16.mxu0 %v2368_v57  ;;  %v2310_v11 = vpack.c.bf16 %v420_v3, %v416_v2 }
  0xd9   : > { %v549_v62 = vld [vmem:[%s3697_s17 + $0x568] sm:$0xff]  ;;  %v548_v6 = vld [vmem:[%s3697_s17 + $0x560] sm:$0xff]  ;;  %2371 = vmatpush1.bf16.msra.mxu0 %v2370_v0 }
  0xda   : > { %v2372_v5 = vpack.c.bf16 %v549_v62, %v545_v61  ;;  %v425_v7 = vld [vmem:[%s3697_s17 + $0x188] sm:$0xff]  ;;  %2309 = vmatprep.subr.bf16.mxu1 %v2308_v1  ;;  %v2374_v12 = vpack.c.bf16 %v548_v6, %v544_v4  ;;  %v424_v14 = vld [vmem:[%s3697_s17 + $0x180] sm:$0xff] }
  0xdb   : > { %v429_v8 = vld [vmem:[%s3697_s17 + $0x1a8] sm:$0xff]  ;;  %v428_v15 = vld [vmem:[%s3697_s17 + $0x1a0] sm:$0xff]  ;;  %2311 = vmatpush1.bf16.msra.mxu1 %v2310_v11 }
  0xdc   : > { %v553_v9 = vld [vmem:[%s3697_s17 + $0x588] sm:$0xff]  ;;  %v2312_v13 = vpack.c.bf16 %v429_v8, %v425_v7  ;;  %v552_v16 = vld [vmem:[%s3697_s17 + $0x580] sm:$0xff]  ;;  %2373 = vmatprep.subr.bf16.mxu0 %v2372_v5  ;;  %v2314_v23 = vpack.c.bf16 %v428_v15, %v424_v14 }
  0xdd   : > { %v557_v10 = vld [vmem:[%s3697_s17 + $0x5a8] sm:$0xff]  ;;  %v556_v18 = vld [vmem:[%s3697_s17 + $0x5a0] sm:$0xff]  ;;  %2375 = vmatpush1.bf16.msra.mxu0 %v2374_v12 }
  0xde   : > { %v2376_v17 = vpack.c.bf16 %v557_v10, %v553_v9  ;;  %v433_v19 = vld [vmem:[%s3697_s17 + $0x1c8] sm:$0xff]  ;;  %2313 = vmatprep.subr.bf16.mxu1 %v2312_v13  ;;  %v2378_v24 = vpack.c.bf16 %v556_v18, %v552_v16  ;;  %v432_v26 = vld [vmem:[%s3697_s17 + $0x1c0] sm:$0xff] }
  0xdf   : > { %v437_v20 = vld [vmem:[%s3697_s17 + $0x1e8] sm:$0xff]  ;;  %v436_v27 = vld [vmem:[%s3697_s17 + $0x1e0] sm:$0xff]  ;;  %2315 = vmatpush1.bf16.msra.mxu1 %v2314_v23 }
  0xe0   : > { %v561_v21 = vld [vmem:[%s3697_s17 + $0x5c8] sm:$0xff]  ;;  %v2316_v25 = vpack.c.bf16 %v437_v20, %v433_v19  ;;  %v560_v28 = vld [vmem:[%s3697_s17 + $0x5c0] sm:$0xff]  ;;  %2377 = vmatprep.subr.bf16.mxu0 %v2376_v17  ;;  %v2318_v35 = vpack.c.bf16 %v436_v27, %v432_v26  ;;  %v3815_v17 = vld [vmem:[#allocation3 + $0x8] sm:$0xff] }
  0xe1   : > { %v565_v22 = vld [vmem:[%s3697_s17 + $0x5e8] sm:$0xff]  ;;  %v564_v30 = vld [vmem:[%s3697_s17 + $0x5e0] sm:$0xff]  ;;  %2379 = vmatpush1.bf16.msra.mxu0 %v2378_v24  ;;  %846 = vmatprep.mubr.f32.mxu1 %v3815_v17 }
  0xe2   : > { %v2380_v29 = vpack.c.bf16 %v565_v22, %v561_v21  ;;  %v441_v31 = vld [vmem:[%s3697_s17 + $0x208] sm:$0xff]  ;;  %2317 = vmatprep.subr.bf16.mxu1 %v2316_v25  ;;  %v2382_v36 = vpack.c.bf16 %v564_v30, %v560_v28  ;;  %v440_v38 = vld [vmem:[%s3697_s17 + $0x200] sm:$0xff] }
  0xe3   : > { %v445_v32 = vld [vmem:[%s3697_s17 + $0x228] sm:$0xff]  ;;  %v444_v39 = vld [vmem:[%s3697_s17 + $0x220] sm:$0xff]  ;;  %2319 = vmatpush1.bf16.msra.mxu1 %v2318_v35 }
  0xe4   : > { %v569_v33 = vld [vmem:[%s3697_s17 + $0x608] sm:$0xff]  ;;  %v2320_v37 = vpack.c.bf16 %v445_v32, %v441_v31  ;;  %v568_v40 = vld [vmem:[%s3697_s17 + $0x600] sm:$0xff]  ;;  %2381 = vmatprep.subr.bf16.mxu0 %v2380_v29  ;;  %v2322_v47 = vpack.c.bf16 %v444_v39, %v440_v38 }
  0xe5   : > { %v573_v34 = vld [vmem:[%s3697_s17 + $0x628] sm:$0xff]  ;;  %v572_v42 = vld [vmem:[%s3697_s17 + $0x620] sm:$0xff]  ;;  %2383 = vmatpush1.bf16.msra.mxu0 %v2382_v36 }
  0xe6   : > { %v2384_v41 = vpack.c.bf16 %v573_v34, %v569_v33  ;;  %v449_v43 = vld [vmem:[%s3697_s17 + $0x248] sm:$0xff]  ;;  %2321 = vmatprep.subr.bf16.mxu1 %v2320_v37  ;;  %v2386_v48 = vpack.c.bf16 %v572_v42, %v568_v40  ;;  %v448_v50 = vld [vmem:[%s3697_s17 + $0x240] sm:$0xff] }
  0xe7   : > { %v453_v44 = vld [vmem:[%s3697_s17 + $0x268] sm:$0xff]  ;;  %v452_v51 = vld [vmem:[%s3697_s17 + $0x260] sm:$0xff]  ;;  %2323 = vmatpush1.bf16.msra.mxu1 %v2322_v47 }
  0xe8   : > { %v577_v45 = vld [vmem:[%s3697_s17 + $0x648] sm:$0xff]  ;;  %v2324_v49 = vpack.c.bf16 %v453_v44, %v449_v43  ;;  %v576_v52 = vld [vmem:[%s3697_s17 + $0x640] sm:$0xff]  ;;  %2385 = vmatprep.subr.bf16.mxu0 %v2384_v41  ;;  %v2326_v59 = vpack.c.bf16 %v452_v51, %v448_v50 }
  0xe9   : > { %v581_v46 = vld [vmem:[%s3697_s17 + $0x668] sm:$0xff]  ;;  %v580_v54 = vld [vmem:[%s3697_s17 + $0x660] sm:$0xff]  ;;  %2387 = vmatpush1.bf16.msra.mxu0 %v2386_v48 }
  0xea   : > { %v2388_v53 = vpack.c.bf16 %v581_v46, %v577_v45  ;;  %v457_v55 = vld [vmem:[%s3697_s17 + $0x288] sm:$0xff]  ;;  %2325 = vmatprep.subr.bf16.mxu1 %v2324_v49  ;;  %v2390_v60 = vpack.c.bf16 %v580_v54, %v576_v52  ;;  %v456_v62 = vld [vmem:[%s3697_s17 + $0x280] sm:$0xff] }
  0xeb   : > { %v461_v56 = vld [vmem:[%s3697_s17 + $0x2a8] sm:$0xff]  ;;  %v460_v63 = vld [vmem:[%s3697_s17 + $0x2a0] sm:$0xff]  ;;  %2327 = vmatpush1.bf16.msra.mxu1 %v2326_v59 }
  0xec   : > { %v585_v57 = vld [vmem:[%s3697_s17 + $0x688] sm:$0xff]  ;;  %v2328_v61 = vpack.c.bf16 %v461_v56, %v457_v55  ;;  %v584_v0 = vld [vmem:[%s3697_s17 + $0x680] sm:$0xff]  ;;  %2389 = vmatprep.subr.bf16.mxu0 %v2388_v53  ;;  %v2330_v7 = vpack.c.bf16 %v460_v63, %v456_v62 }
  0xed   : > { %v589_v58 = vld [vmem:[%s3697_s17 + $0x6a8] sm:$0xff]  ;;  %v588_v2 = vld [vmem:[%s3697_s17 + $0x6a0] sm:$0xff]  ;;  %2391 = vmatpush1.bf16.msra.mxu0 %v2390_v60 }
  0xee   : > { %v2392_v1 = vpack.c.bf16 %v589_v58, %v585_v57  ;;  %v465_v3 = vld [vmem:[%s3697_s17 + $0x2c8] sm:$0xff]  ;;  %v464_v8 = vld [vmem:[%s3697_s17 + $0x2c0] sm:$0xff]  ;;  %2329 = vmatprep.subr.bf16.mxu1 %v2328_v61  ;;  %v2394_v9 = vpack.c.bf16 %v588_v2, %v584_v0  ;;  %v383_v2 = vld [vmem:[%s3697_s17 + $0x38] sm:$0xff] }
  0xef   : > { %v469_v4 = vld [vmem:[%s3697_s17 + $0x2e8] sm:$0xff]  ;;  %v468_v11 = vld [vmem:[%s3697_s17 + $0x2e0] sm:$0xff]  ;;  %2331 = vmatpush1.bf16.msra.mxu1 %v2330_v7 }
  0xf0   : > { %v593_v5 = vld [vmem:[%s3697_s17 + $0x6c8] sm:$0xff]  ;;  %v2332_v10 = vpack.c.bf16 %v469_v4, %v465_v3  ;;  %v592_v12 = vld [vmem:[%s3697_s17 + $0x6c0] sm:$0xff]  ;;  %2393 = vmatprep.subr.bf16.mxu0 %v2392_v1  ;;  %v2334_v21 = vpack.c.bf16 %v468_v11, %v464_v8  ;;  %v379_v1 = vld [vmem:[%s3697_s17 + $0x18] sm:$0xff] }
  0xf1   : > { %v597_v6 = vld [vmem:[%s3697_s17 + $0x6e8] sm:$0xff]  ;;  %v596_v13 = vld [vmem:[%s3697_s17 + $0x6e0] sm:$0xff]  ;;  %2395 = vmatpush1.bf16.msra.mxu0 %v2394_v9  ;;  %v2480_v7 = vpack.c.bf16 %v383_v2, %v379_v1  ;;  %v378_v9 = vld [vmem:[%s3697_s17 + $0x10] sm:$0xff] }
  0xf2   : > { %v2396_v14 = vpack.c.bf16 %v597_v6, %v593_v5  ;;  %v473_v15 = vld [vmem:[%s3697_s17 + $0x308] sm:$0xff]  ;;  %2333 = vmatprep.subr.bf16.mxu1 %v2332_v10  ;;  %v2398_v22 = vpack.c.bf16 %v596_v13, %v592_v12  ;;  %v472_v24 = vld [vmem:[%s3697_s17 + $0x300] sm:$0xff]  ;;  %v382_v10 = vld [vmem:[%s3697_s17 + $0x30] sm:$0xff] }
  0xf3   : > { %v477_v16 = vld [vmem:[%s3697_s17 + $0x328] sm:$0xff]  ;;  %v476_v25 = vld [vmem:[%s3697_s17 + $0x320] sm:$0xff]  ;;  %2335 = vmatpush1.bf16.msra.mxu1 %v2334_v21  ;;  %v387_v13 = vld [vmem:[%s3697_s17 + $0x58] sm:$0xff]  ;;  %v2482_v21 = vpack.c.bf16 %v382_v10, %v378_v9 }
  0xf4   : > { %v601_v18 = vld [vmem:[%s3697_s17 + $0x708] sm:$0xff]  ;;  %v2336_v23 = vpack.c.bf16 %v477_v16, %v473_v15  ;;  %v600_v26 = vld [vmem:[%s3697_s17 + $0x700] sm:$0xff]  ;;  %2397 = vmatprep.subr.bf16.mxu0 %v2396_v14  ;;  %v2338_v33 = vpack.c.bf16 %v476_v25, %v472_v24  ;;  %v391_v14 = vld [vmem:[%s3697_s17 + $0x78] sm:$0xff] }
  0xf5   : > { %v605_v19 = vld [vmem:[%s3697_s17 + $0x728] sm:$0xff]  ;;  %v604_v28 = vld [vmem:[%s3697_s17 + $0x720] sm:$0xff]  ;;  %2399 = vmatpush1.bf16.msra.mxu0 %v2398_v22  ;;  %v386_v25 = vld [vmem:[%s3697_s17 + $0x50] sm:$0xff] }
  0xf6   : > { %v3820_v20 = vld [vmem:[#allocation3 + $0x18] sm:$0xff]  ;;  %v2400_v27 = vpack.c.bf16 %v605_v19, %v601_v18  ;;  %2337 = vmatprep.subr.bf16.mxu1 %v2336_v23  ;;  %v2402_v34 = vpack.c.bf16 %v604_v28, %v600_v26  ;;  %v480_v36 = vld [vmem:[%s3697_s17 + $0x340] sm:$0xff]  ;;  %v3863_v18 = vld [vmem:[#allocation3] sm:$0xff]  ;;  %v2484_v23 = vpack.c.bf16 %v391_v14, %v387_v13 }
  0xf7   : > { %917 = vmatprep.mubr.f32.mxu0 %v3820_v20  ;;  %v481_v29 = vld [vmem:[%s3697_s17 + $0x348] sm:$0xff]  ;;  %v484_v37 = vld [vmem:[%s3697_s17 + $0x360] sm:$0xff]  ;;  %2339 = vmatpush1.bf16.msra.mxu1 %v2338_v33  ;;  %v390_v26 = vld [vmem:[%s3697_s17 + $0x70] sm:$0xff] }
  0xf8   : > { %v485_v30 = vld [vmem:[%s3697_s17 + $0x368] sm:$0xff]  ;;  %v608_v38 = vld [vmem:[%s3697_s17 + $0x740] sm:$0xff]  ;;  %2401 = vmatprep.subr.bf16.mxu0 %v2400_v27  ;;  %v2342_v45 = vpack.c.bf16 %v484_v37, %v480_v36  ;;  %v2486_v33 = vpack.c.bf16 %v390_v26, %v386_v25  ;;  %v394_v37 = vld [vmem:[%s3697_s17 + $0x90] sm:$0xff] }
  0xf9   : > { %v609_v31 = vld [vmem:[%s3697_s17 + $0x748] sm:$0xff]  ;;  %v2340_v35 = vpack.c.bf16 %v485_v30, %v481_v29  ;;  %v612_v40 = vld [vmem:[%s3697_s17 + $0x760] sm:$0xff]  ;;  %2403 = vmatpush1.bf16.msra.mxu0 %v2402_v34  ;;  %v395_v29 = vld [vmem:[%s3697_s17 + $0x98] sm:$0xff] }
  0xfa   : > { %v613_v32 = vld [vmem:[%s3697_s17 + $0x768] sm:$0xff]  ;;  %v2406_v46 = vpack.c.bf16 %v612_v40, %v608_v38  ;;  %v488_v48 = vld [vmem:[%s3697_s17 + $0x380] sm:$0xff]  ;;  %v399_v30 = vld [vmem:[%s3697_s17 + $0xb8] sm:$0xff] }
  0xfb   : > { %v2404_v39 = vpack.c.bf16 %v613_v32, %v609_v31  ;;  %v489_v41 = vld [vmem:[%s3697_s17 + $0x388] sm:$0xff]  ;;  %2341 = vmatprep.subr.bf16.mxu1 %v2340_v35  ;;  %v492_v49 = vld [vmem:[%s3697_s17 + $0x3a0] sm:$0xff]  ;;  %v2488_v35 = vpack.c.bf16 %v399_v30, %v395_v29  ;;  %v398_v38 = vld [vmem:[%s3697_s17 + $0xb0] sm:$0xff] }
  0xfc   : > { %v493_v42 = vld [vmem:[%s3697_s17 + $0x3a8] sm:$0xff]  ;;  %v616_v50 = vld [vmem:[%s3697_s17 + $0x780] sm:$0xff]  ;;  %2343 = vmatpush1.bf16.msra.mxu1 %v2342_v45  ;;  %v2346_v57 = vpack.c.bf16 %v492_v49, %v488_v48  ;;  %v2490_v45 = vpack.c.bf16 %v398_v38, %v394_v37  ;;  %v402_v49 = vld [vmem:[%s3697_s17 + $0xd0] sm:$0xff] }
  0xfd   : > { %v617_v43 = vld [vmem:[%s3697_s17 + $0x788] sm:$0xff]  ;;  %v2344_v47 = vpack.c.bf16 %v493_v42, %v489_v41  ;;  %2405 = vmatprep.subr.bf16.mxu0 %v2404_v39  ;;  %v620_v52 = vld [vmem:[%s3697_s17 + $0x7a0] sm:$0xff]  ;;  %v403_v41 = vld [vmem:[%s3697_s17 + $0xd8] sm:$0xff] }
  0xfe   : > { %v621_v44 = vld [vmem:[%s3697_s17 + $0x7a8] sm:$0xff]  ;;  %2407 = vmatpush1.bf16.msra.mxu0 %v2406_v46  ;;  %v2410_v58 = vpack.c.bf16 %v620_v52, %v616_v50  ;;  %v496_v60 = vld [vmem:[%s3697_s17 + $0x3c0] sm:$0xff]  ;;  %v407_v42 = vld [vmem:[%s3697_s17 + $0xf8] sm:$0xff] }
  0xff   : > { %v2408_v51 = vpack.c.bf16 %v621_v44, %v617_v43  ;;  %v497_v53 = vld [vmem:[%s3697_s17 + $0x3c8] sm:$0xff]  ;;  %2345 = vmatprep.subr.bf16.mxu1 %v2344_v47  ;;  %v500_v61 = vld [vmem:[%s3697_s17 + $0x3e0] sm:$0xff]  ;;  %v2492_v47 = vpack.c.bf16 %v407_v42, %v403_v41  ;;  %v406_v50 = vld [vmem:[%s3697_s17 + $0xf0] sm:$0xff] }
 0x100   : > { %v501_v54 = vld [vmem:[%s3697_s17 + $0x3e8] sm:$0xff]  ;;  %v624_v62 = vld [vmem:[%s3697_s17 + $0x7c0] sm:$0xff]  ;;  %2347 = vmatpush1.bf16.msra.mxu1 %v2346_v57  ;;  %v2350_v5 = vpack.c.bf16 %v500_v61, %v496_v60  ;;  %v411_v52 = vld [vmem:[%s3697_s17 + $0x118] sm:$0xff] }
 0x101   : > { %v625_v55 = vld [vmem:[%s3697_s17 + $0x7c8] sm:$0xff]  ;;  %v2348_v59 = vpack.c.bf16 %v501_v54, %v497_v53  ;;  %2409 = vmatprep.subr.bf16.mxu0 %v2408_v51  ;;  %v628_v0 = vld [vmem:[%s3697_s17 + $0x7e0] sm:$0xff]  ;;  %v415_v53 = vld [vmem:[%s3697_s17 + $0x138] sm:$0xff] }
 0x102   : > { %v629_v56 = vld [vmem:[%s3697_s17 + $0x7e8] sm:$0xff]  ;;  %2411 = vmatpush1.bf16.msra.mxu0 %v2410_v58  ;;  %v2414_v6 = vpack.c.bf16 %v628_v0, %v624_v62  ;;  %v632_v8 = vld [vmem:[%s3697_s17 + $0x800] sm:$0xff]  ;;  %v2496_v58 = vpack.c.bf16 %v415_v53, %v411_v52  ;;  %v410_v60 = vld [vmem:[%s3697_s17 + $0x110] sm:$0xff] }
 0x103   : > { %v2412_v63 = vpack.c.bf16 %v629_v56, %v625_v55  ;;  %v633_v3 = vld [vmem:[%s3697_s17 + $0x808] sm:$0xff]  ;;  %2349 = vmatprep.subr.bf16.mxu1 %v2348_v59  ;;  %v636_v12 = vld [vmem:[%s3697_s17 + $0x820] sm:$0xff]  ;;  %v2494_v56 = vpack.c.bf16 %v406_v50, %v402_v49  ;;  %v414_v61 = vld [vmem:[%s3697_s17 + $0x130] sm:$0xff] }
 0x104   : > { %v637_v4 = vld [vmem:[%s3697_s17 + $0x828] sm:$0xff]  ;;  %2351 = vmatpush1.bf16.msra.mxu1 %v2350_v5  ;;  %v3865_v19 = vld [vmem:[#allocation3 + $0x10] sm:$0xff]  ;;  %v2418_v22 = vpack.c.bf16 %v636_v12, %v632_v8  ;;  %v419_v0 = vld [vmem:[%s3697_s17 + $0x158] sm:$0xff] }
 0x105   : > { %2413 = vmatprep.subr.bf16.mxu0 %v2412_v63  ;;  %v2416_v11 = vpack.c.bf16 %v637_v4, %v633_v3  ;;  %v641_v15 = vld [vmem:[%s3697_s17 + $0x848] sm:$0xff]  ;;  %2481 = vmatprep.subr.bf16.mxu1 %v2480_v7  ;;  %v640_v24 = vld [vmem:[%s3697_s17 + $0x840] sm:$0xff]  ;;  %v423_v1 = vld [vmem:[%s3697_s17 + $0x178] sm:$0xff]  ;;  %v2498_v4 = vpack.c.bf16 %v414_v61, %v410_v60 }
 0x106   : > { %v645_v16 = vld [vmem:[%s3697_s17 + $0x868] sm:$0xff]  ;;  %2415 = vmatpush1.bf16.msra.mxu0 %v2414_v6  ;;  %v644_v28 = vld [vmem:[%s3697_s17 + $0x860] sm:$0xff]  ;;  %v2500_v6 = vpack.c.bf16 %v423_v1, %v419_v0  ;;  %v418_v8 = vld [vmem:[%s3697_s17 + $0x150] sm:$0xff] }
 0x107   : > { %2417 = vmatprep.subr.bf16.mxu0 %v2416_v11  ;;  %v2420_v27 = vpack.c.bf16 %v645_v16, %v641_v15  ;;  %847 = vmatmul.mubr.f32.vlgmr.msra.gmra.mrb[0].mxu1 %v3863_v18  ;;  %v649_v31 = vld [vmem:[%s3697_s17 + $0x888] sm:$0xff]  ;;  %v2422_v34 = vpack.c.bf16 %v644_v28, %v640_v24  ;;  %v648_v36 = vld [vmem:[%s3697_s17 + $0x880] sm:$0xff]  ;;  %v422_v9 = vld [vmem:[%s3697_s17 + $0x170] sm:$0xff] }
 0x108   : > { %v653_v32 = vld [vmem:[%s3697_s17 + $0x8a8] sm:$0xff]  ;;  %2483 = vmatpush1.bf16.msra.mxu1 %v2482_v21  ;;  %v652_v40 = vld [vmem:[%s3697_s17 + $0x8a0] sm:$0xff]  ;;  %1059 = vmatprep.mubr.f32.mxu1 %v3815_v17  ;;  %v427_v12 = vld [vmem:[%s3697_s17 + $0x198] sm:$0xff]  ;;  %v2502_v16 = vpack.c.bf16 %v422_v9, %v418_v8 }
 0x109   : > { %918 = vmatmul.mubr.f32.vlgmr.msra.gmra.mrb[0].mxu0 %v3865_v19  ;;  %2485 = vmatprep.subr.bf16.mxu1 %v2484_v23  ;;  %v2424_v39 = vpack.c.bf16 %v653_v32, %v649_v31  ;;  %v657_v43 = vld [vmem:[%s3697_s17 + $0x8c8] sm:$0xff]  ;;  %v2426_v46 = vpack.c.bf16 %v652_v40, %v648_v36  ;;  %v656_v48 = vld [vmem:[%s3697_s17 + $0x8c0] sm:$0xff]  ;;  %v431_v13 = vld [vmem:[%s3697_s17 + $0x1b8] sm:$0xff] }
 0x10a   : > { %2419 = vmatpush1.bf16.msra.mxu0 %v2418_v22  ;;  %v661_v44 = vld [vmem:[%s3697_s17 + $0x8e8] sm:$0xff]  ;;  %v660_v17 = vld [vmem:[%s3697_s17 + $0x8e0] sm:$0xff]  ;;  %v2504_v23 = vpack.c.bf16 %v431_v13, %v427_v12  ;;  %v426_v25 = vld [vmem:[%s3697_s17 + $0x190] sm:$0xff] }
 0x10b   : > { %2421 = vmatprep.subr.bf16.mxu0 %v2420_v27  ;;  %v2428_v51 = vpack.c.bf16 %v661_v44, %v657_v43  ;;  %v665_v54 = vld [vmem:[%s3697_s17 + $0x908] sm:$0xff]  ;;  %v2430_v57 = vpack.c.bf16 %v660_v17, %v656_v48  ;;  %v664_v59 = vld [vmem:[%s3697_s17 + $0x900] sm:$0xff]  ;;  %v430_v26 = vld [vmem:[%s3697_s17 + $0x1b0] sm:$0xff] }
 0x10c   : > { %2487 = vmatpush1.bf16.msra.mxu1 %v2486_v33  ;;  %v669_v55 = vld [vmem:[%s3697_s17 + $0x928] sm:$0xff]  ;;  %v668_v63 = vld [vmem:[%s3697_s17 + $0x920] sm:$0xff]  ;;  %v435_v28 = vld [vmem:[%s3697_s17 + $0x1d8] sm:$0xff]  ;;  %v2506_v33 = vpack.c.bf16 %v430_v26, %v426_v25 }
 0x10d   : > { %2489 = vmatprep.subr.bf16.mxu1 %v2488_v35  ;;  %v2432_v62 = vpack.c.bf16 %v669_v55, %v665_v54  ;;  %v673_v2 = vld [vmem:[%s3697_s17 + $0x948] sm:$0xff]  ;;  %v2434_v5 = vpack.c.bf16 %v668_v63, %v664_v59  ;;  %v672_v7 = vld [vmem:[%s3697_s17 + $0x940] sm:$0xff]  ;;  %v439_v29 = vld [vmem:[%s3697_s17 + $0x1f8] sm:$0xff] }
 0x10e   : > { %2423 = vmatpush1.bf16.msra.mxu0 %v2422_v34  ;;  %v677_v3 = vld [vmem:[%s3697_s17 + $0x968] sm:$0xff]  ;;  %v676_v11 = vld [vmem:[%s3697_s17 + $0x960] sm:$0xff]  ;;  %v3916_v30 = vld [vmem:[#allocation3 + $0x28] sm:$0xff]  ;;  %v2508_v35 = vpack.c.bf16 %v439_v29, %v435_v28 }
 0x10f   : > { %2425 = vmatprep.subr.bf16.mxu0 %v2424_v39  ;;  %v2436_v10 = vpack.c.bf16 %v677_v3, %v673_v2  ;;  %v681_v14 = vld [vmem:[%s3697_s17 + $0x988] sm:$0xff]  ;;  %v680_v21 = vld [vmem:[%s3697_s17 + $0x980] sm:$0xff]  ;;  %v2438_v22 = vpack.c.bf16 %v676_v11, %v672_v7  ;;  %988 = vmatprep.mubr.f32.mxu0 %v3916_v30  ;;  %v434_v37 = vld [vmem:[%s3697_s17 + $0x1d0] sm:$0xff] }
 0x110   : > { %2491 = vmatpush1.bf16.msra.mxu1 %v2490_v45  ;;  %v685_v15 = vld [vmem:[%s3697_s17 + $0x9a8] sm:$0xff]  ;;  %v684_v24 = vld [vmem:[%s3697_s17 + $0x9a0] sm:$0xff]  ;;  %v438_v38 = vld [vmem:[%s3697_s17 + $0x1f0] sm:$0xff] }
 0x111   : > { %2493 = vmatprep.subr.bf16.mxu1 %v2492_v47  ;;  %v2440_v27 = vpack.c.bf16 %v685_v15, %v681_v14  ;;  %v689_v31 = vld [vmem:[%s3697_s17 + $0x9c8] sm:$0xff]  ;;  %v2442_v34 = vpack.c.bf16 %v684_v24, %v680_v21  ;;  %v688_v36 = vld [vmem:[%s3697_s17 + $0x9c0] sm:$0xff]  ;;  %v443_v41 = vld [vmem:[%s3697_s17 + $0x218] sm:$0xff]  ;;  %v2510_v45 = vpack.c.bf16 %v438_v38, %v434_v37 }
 0x112   : > { %2427 = vmatpush1.bf16.msra.mxu0 %v2426_v46  ;;  %v693_v32 = vld [vmem:[%s3697_s17 + $0x9e8] sm:$0xff]  ;;  %v692_v40 = vld [vmem:[%s3697_s17 + $0x9e0] sm:$0xff]  ;;  %v447_v42 = vld [vmem:[%s3697_s17 + $0x238] sm:$0xff] }
 0x113   : > { %2429 = vmatprep.subr.bf16.mxu0 %v2428_v51  ;;  %v2444_v39 = vpack.c.bf16 %v693_v32, %v689_v31  ;;  %v697_v43 = vld [vmem:[%s3697_s17 + $0xa08] sm:$0xff]  ;;  %v2446_v46 = vpack.c.bf16 %v692_v40, %v688_v36  ;;  %v2512_v47 = vpack.c.bf16 %v447_v42, %v443_v41  ;;  %v696_v48 = vld [vmem:[%s3697_s17 + $0xa00] sm:$0xff]  ;;  %v442_v49 = vld [vmem:[%s3697_s17 + $0x210] sm:$0xff] }
 0x114   : > { %2495 = vmatpush1.bf16.msra.mxu1 %v2494_v56  ;;  %v701_v44 = vld [vmem:[%s3697_s17 + $0xa28] sm:$0xff]  ;;  %v446_v50 = vld [vmem:[%s3697_s17 + $0x230] sm:$0xff]  ;;  %v700_v17 = vld [vmem:[%s3697_s17 + $0xa20] sm:$0xff] }
 0x115   : > { %2497 = vmatprep.subr.bf16.mxu1 %v2496_v58  ;;  %v2448_v51 = vpack.c.bf16 %v701_v44, %v697_v43  ;;  %v451_v52 = vld [vmem:[%s3697_s17 + $0x258] sm:$0xff]  ;;  %v705_v54 = vld [vmem:[%s3697_s17 + $0xa48] sm:$0xff]  ;;  %v2514_v56 = vpack.c.bf16 %v446_v50, %v442_v49  ;;  %v704_v59 = vld [vmem:[%s3697_s17 + $0xa40] sm:$0xff] }
 0x116   : > { %2431 = vmatpush1.bf16.msra.mxu0 %v2430_v57  ;;  %v455_v53 = vld [vmem:[%s3697_s17 + $0x278] sm:$0xff]  ;;  %v709_v55 = vld [vmem:[%s3697_s17 + $0xa68] sm:$0xff]  ;;  %v2450_v57 = vpack.c.bf16 %v700_v17, %v696_v48  ;;  %v450_v60 = vld [vmem:[%s3697_s17 + $0x250] sm:$0xff] }
 0x117   : > { %2433 = vmatprep.subr.bf16.mxu0 %v2432_v62  ;;  %v2516_v58 = vpack.c.bf16 %v455_v53, %v451_v52  ;;  %v454_v61 = vld [vmem:[%s3697_s17 + $0x270] sm:$0xff]  ;;  %v2452_v62 = vpack.c.bf16 %v709_v55, %v705_v54  ;;  %v708_v63 = vld [vmem:[%s3697_s17 + $0xa60] sm:$0xff]  ;;  %v459_v0 = vld [vmem:[%s3697_s17 + $0x298] sm:$0xff] }
 0x118   : > { %2499 = vmatpush1.bf16.msra.mxu1 %v2498_v4  ;;  %v463_v1 = vld [vmem:[%s3697_s17 + $0x2b8] sm:$0xff]  ;;  %v713_v2 = vld [vmem:[%s3697_s17 + $0xa88] sm:$0xff]  ;;  %v2518_v4 = vpack.c.bf16 %v454_v61, %v450_v60  ;;  %v712_v7 = vld [vmem:[%s3697_s17 + $0xa80] sm:$0xff] }
 0x119   : > { %2501 = vmatprep.subr.bf16.mxu1 %v2500_v6  ;;  %v717_v3 = vld [vmem:[%s3697_s17 + $0xaa8] sm:$0xff]  ;;  %v2520_v6 = vpack.c.bf16 %v463_v1, %v459_v0  ;;  %v458_v8 = vld [vmem:[%s3697_s17 + $0x290] sm:$0xff]  ;;  %v716_v11 = vld [vmem:[%s3697_s17 + $0xaa0] sm:$0xff] }
 0x11a   : > { %2435 = vmatpush1.bf16.msra.mxu0 %v2434_v5  ;;  %v2454_v5 = vpack.c.bf16 %v708_v63, %v704_v59  ;;  %v462_v9 = vld [vmem:[%s3697_s17 + $0x2b0] sm:$0xff]  ;;  %v467_v12 = vld [vmem:[%s3697_s17 + $0x2d8] sm:$0xff]  ;;  %v721_v14 = vld [vmem:[%s3697_s17 + $0xac8] sm:$0xff]  ;;  %v2458_v21 = vpack.c.bf16 %v716_v11, %v712_v7 }
 0x11b   : > { %2437 = vmatprep.subr.bf16.mxu0 %v2436_v10  ;;  %v2456_v10 = vpack.c.bf16 %v717_v3, %v713_v2  ;;  %v471_v13 = vld [vmem:[%s3697_s17 + $0x2f8] sm:$0xff]  ;;  %v725_v15 = vld [vmem:[%s3697_s17 + $0xae8] sm:$0xff]  ;;  %v466_v24 = vld [vmem:[%s3697_s17 + $0x2d0] sm:$0xff] }
 0x11c   : > { %2503 = vmatpush1.bf16.msra.mxu1 %v2502_v16  ;;  %v2522_v16 = vpack.c.bf16 %v462_v9, %v458_v8  ;;  %v470_v25 = vld [vmem:[%s3697_s17 + $0x2f0] sm:$0xff]  ;;  %v2460_v26 = vpack.c.bf16 %v725_v15, %v721_v14  ;;  %v475_v28 = vld [vmem:[%s3697_s17 + $0x318] sm:$0xff]  ;;  %v729_v31 = vld [vmem:[%s3697_s17 + $0xb08] sm:$0xff] }
 0x11d   : > { %2505 = vmatprep.subr.bf16.mxu1 %v2504_v23  ;;  %v720_v23 = vld [vmem:[%s3697_s17 + $0xac0] sm:$0xff]  ;;  %v479_v29 = vld [vmem:[%s3697_s17 + $0x338] sm:$0xff]  ;;  %v733_v32 = vld [vmem:[%s3697_s17 + $0xb28] sm:$0xff] }
 0x11e   : > { %2439 = vmatpush1.bf16.msra.mxu0 %v2438_v22  ;;  %v2524_v22 = vpack.c.bf16 %v471_v13, %v467_v12  ;;  %v728_v36 = vld [vmem:[%s3697_s17 + $0xb00] sm:$0xff]  ;;  %v474_v37 = vld [vmem:[%s3697_s17 + $0x310] sm:$0xff]  ;;  %v483_v41 = vld [vmem:[%s3697_s17 + $0x358] sm:$0xff] }
 0x11f   : > { %2441 = vmatprep.subr.bf16.mxu0 %v2440_v27  ;;  %v724_v27 = vld [vmem:[%s3697_s17 + $0xae0] sm:$0xff]  ;;  %v478_v38 = vld [vmem:[%s3697_s17 + $0x330] sm:$0xff]  ;;  %v487_v42 = vld [vmem:[%s3697_s17 + $0x378] sm:$0xff] }
 0x120   : > { %2507 = vmatpush1.bf16.msra.mxu1 %v2506_v33  ;;  %v2526_v33 = vpack.c.bf16 %v470_v25, %v466_v24  ;;  %v732_v40 = vld [vmem:[%s3697_s17 + $0xb20] sm:$0xff]  ;;  %v737_v43 = vld [vmem:[%s3697_s17 + $0xb48] sm:$0xff]  ;;  %v482_v49 = vld [vmem:[%s3697_s17 + $0x350] sm:$0xff] }
 0x121   : > { %2509 = vmatprep.subr.bf16.mxu1 %v2508_v35  ;;  %v2528_v35 = vpack.c.bf16 %v479_v29, %v475_v28  ;;  %v741_v44 = vld [vmem:[%s3697_s17 + $0xb68] sm:$0xff]  ;;  %v736_v48 = vld [vmem:[%s3697_s17 + $0xb40] sm:$0xff]  ;;  %v486_v50 = vld [vmem:[%s3697_s17 + $0x370] sm:$0xff] }
 0x122   : > { %2443 = vmatpush1.bf16.msra.mxu0 %v2442_v34  ;;  %v2462_v34 = vpack.c.bf16 %v724_v27, %v720_v23  ;;  %v740_v17 = vld [vmem:[%s3697_s17 + $0xb60] sm:$0xff]  ;;  %v491_v52 = vld [vmem:[%s3697_s17 + $0x398] sm:$0xff]  ;;  %v745_v54 = vld [vmem:[%s3697_s17 + $0xb88] sm:$0xff] }
 0x123   : > { %2445 = vmatprep.subr.bf16.mxu0 %v2444_v39  ;;  %v2464_v39 = vpack.c.bf16 %v733_v32, %v729_v31  ;;  %v495_v53 = vld [vmem:[%s3697_s17 + $0x3b8] sm:$0xff]  ;;  %v749_v55 = vld [vmem:[%s3697_s17 + $0xba8] sm:$0xff]  ;;  %v744_v59 = vld [vmem:[%s3697_s17 + $0xb80] sm:$0xff] }
 0x124   : > { %2511 = vmatpush1.bf16.msra.mxu1 %v2510_v45  ;;  %v2530_v45 = vpack.c.bf16 %v478_v38, %v474_v37  ;;  %v490_v60 = vld [vmem:[%s3697_s17 + $0x390] sm:$0xff]  ;;  %v748_v63 = vld [vmem:[%s3697_s17 + $0xba0] sm:$0xff]  ;;  %v499_v0 = vld [vmem:[%s3697_s17 + $0x3d8] sm:$0xff] }
 0x125   : > { %2513 = vmatprep.subr.bf16.mxu1 %v2512_v47  ;;  %v2532_v47 = vpack.c.bf16 %v487_v42, %v483_v41  ;;  %v494_v61 = vld [vmem:[%s3697_s17 + $0x3b0] sm:$0xff]  ;;  %v503_v1 = vld [vmem:[%s3697_s17 + $0x3f8] sm:$0xff]  ;;  %v753_v2 = vld [vmem:[%s3697_s17 + $0xbc8] sm:$0xff] }
 0x126   : > { %2447 = vmatpush1.bf16.msra.mxu0 %v2446_v46  ;;  %v2466_v46 = vpack.c.bf16 %v732_v40, %v728_v36  ;;  %v757_v3 = vld [vmem:[%s3697_s17 + $0xbe8] sm:$0xff]  ;;  %v752_v7 = vld [vmem:[%s3697_s17 + $0xbc0] sm:$0xff]  ;;  %v498_v8 = vld [vmem:[%s3697_s17 + $0x3d0] sm:$0xff] }
 0x127   : > { %2449 = vmatprep.subr.bf16.mxu0 %v2448_v51  ;;  %v2468_v51 = vpack.c.bf16 %v741_v44, %v737_v43  ;;  %v502_v9 = vld [vmem:[%s3697_s17 + $0x3f0] sm:$0xff]  ;;  %v756_v11 = vld [vmem:[%s3697_s17 + $0xbe0] sm:$0xff]  ;;  %v507_v12 = vld [vmem:[%s3697_s17 + $0x418] sm:$0xff] }
 0x128   : > { %2515 = vmatpush1.bf16.msra.mxu1 %v2514_v56  ;;  %v2534_v56 = vpack.c.bf16 %v486_v50, %v482_v49  ;;  %v511_v13 = vld [vmem:[%s3697_s17 + $0x438] sm:$0xff]  ;;  %v2542_v14 = vpack.c.bf16 %v502_v9, %v498_v8  ;;  %v2478_v15 = vpack.c.bf16 %v756_v11, %v752_v7  ;;  %v514_v28 = vld [vmem:[%s3697_s17 + $0x450] sm:$0xff]  ;;  %v1269_v9 = vld [vmem:[%s3706_s6 + $0x98] sm:$0xff] }
 0x129   : > { %2517 = vmatprep.subr.bf16.mxu1 %v2516_v58  ;;  %v2536_v58 = vpack.c.bf16 %v495_v53, %v491_v52  ;;  %v515_v23 = vld [vmem:[%s3697_s17 + $0x458] sm:$0xff]  ;;  %v518_v29 = vld [vmem:[%s3697_s17 + $0x470] sm:$0xff] }
 0x12a   : > { %2451 = vmatpush1.bf16.msra.mxu0 %v2450_v57  ;;  %v2470_v57 = vpack.c.bf16 %v740_v17, %v736_v48  ;;  %v519_v24 = vld [vmem:[%s3697_s17 + $0x478] sm:$0xff]  ;;  %v526_v36 = vld [vmem:[%s3697_s17 + $0x4b0] sm:$0xff] }
 0x12b   : > { %2453 = vmatprep.subr.bf16.mxu0 %v2452_v62  ;;  %v2472_v62 = vpack.c.bf16 %v749_v55, %v745_v54  ;;  %v2548_v27 = vpack.c.bf16 %v519_v24, %v515_v23  ;;  %v523_v31 = vld [vmem:[%s3697_s17 + $0x498] sm:$0xff]  ;;  %v530_v40 = vld [vmem:[%s3697_s17 + $0x4d0] sm:$0xff]  ;;  %v1281_v23 = vld [vmem:[%s3706_s6 + $0xf8] sm:$0xff] }
 0x12c   : > { %2519 = vmatpush1.bf16.msra.mxu1 %v2518_v4  ;;  %v2538_v4 = vpack.c.bf16 %v494_v61, %v490_v60  ;;  %v527_v32 = vld [vmem:[%s3697_s17 + $0x4b8] sm:$0xff]  ;;  %v534_v41 = vld [vmem:[%s3697_s17 + $0x4f0] sm:$0xff] }
 0x12d   : > { %2521 = vmatprep.subr.bf16.mxu1 %v2520_v6  ;;  %v2540_v6 = vpack.c.bf16 %v503_v1, %v499_v0  ;;  %v531_v37 = vld [vmem:[%s3697_s17 + $0x4d8] sm:$0xff]  ;;  %v2558_v44 = vpack.c.bf16 %v534_v41, %v530_v40  ;;  %v550_v17 = vld [vmem:[%s3697_s17 + $0x570] sm:$0xff] }
 0x12e   : > { %2455 = vmatpush1.bf16.msra.mxu0 %v2454_v5  ;;  %v2474_v5 = vpack.c.bf16 %v748_v63, %v744_v59  ;;  %v535_v38 = vld [vmem:[%s3697_s17 + $0x4f8] sm:$0xff]  ;;  %v562_v61 = vld [vmem:[%s3697_s17 + $0x5d0] sm:$0xff]  ;;  %v1257_v63 = vld [vmem:[%s3706_s6 + $0x38] sm:$0xff] }
 0x12f   : > { %2457 = vmatprep.subr.bf16.mxu0 %v2456_v10  ;;  %v2476_v10 = vpack.c.bf16 %v757_v3, %v753_v2  ;;  %v539_v42 = vld [vmem:[%s3697_s17 + $0x518] sm:$0xff]  ;;  %v566_v1 = vld [vmem:[%s3697_s17 + $0x5f0] sm:$0xff]  ;;  %v1250_v3 = vld [vmem:[%s3706_s6] sm:$0xff] }
 0x130   : > { %2523 = vmatpush1.bf16.msra.mxu1 %v2522_v16  ;;  %v2544_v16 = vpack.c.bf16 %v511_v13, %v507_v12  ;;  %v543_v43 = vld [vmem:[%s3697_s17 + $0x538] sm:$0xff]  ;;  %v1263_v8 = vld [vmem:[%s3706_s6 + $0x68] sm:$0xff]  ;;  %v1262_v13 = vld [vmem:[%s3706_s6 + $0x60] sm:$0xff] }
 0x131   : > { %2525 = vmatprep.subr.bf16.mxu1 %v2524_v22  ;;  %v510_v22 = vld [vmem:[%s3697_s17 + $0x430] sm:$0xff]  ;;  %v551_v48 = vld [vmem:[%s3697_s17 + $0x578] sm:$0xff]  ;;  %v2676_v12 = vpack.c.bf16 %v1269_v9, %v1263_v8  ;;  %v1322_v9 = vld [vmem:[%s3706_s6 + $0x240] sm:$0xff] }
 0x132   : > { %2459 = vmatpush1.bf16.msra.mxu0 %v2458_v21  ;;  %v506_v21 = vld [vmem:[%s3697_s17 + $0x410] sm:$0xff]  ;;  %v555_v52 = vld [vmem:[%s3697_s17 + $0x598] sm:$0xff] }
 0x133   : > { %2461 = vmatprep.subr.bf16.mxu0 %v2460_v26  ;;  %v2546_v25 = vpack.c.bf16 %v510_v22, %v506_v21  ;;  %v3995_v26 = vld [vmem:[#allocation3 + $0x20] sm:$0xff]  ;;  %v559_v53 = vld [vmem:[%s3697_s17 + $0x5b8] sm:$0xff] }
 0x134   : > { %2527 = vmatpush1.bf16.msra.mxu1 %v2526_v33  ;;  %v2550_v33 = vpack.c.bf16 %v518_v29, %v514_v28  ;;  %v2568_v55 = vpack.c.bf16 %v559_v53, %v555_v52  ;;  %v567_v59 = vld [vmem:[%s3697_s17 + $0x5f8] sm:$0xff]  ;;  %v570_v11 = vld [vmem:[%s3697_s17 + $0x610] sm:$0xff]  ;;  %v1274_v28 = vld [vmem:[%s3706_s6 + $0xc0] sm:$0xff] }
 0x135   : > { %2529 = vmatprep.subr.bf16.mxu1 %v2528_v35  ;;  %v522_v35 = vld [vmem:[%s3697_s17 + $0x490] sm:$0xff]  ;;  %v579_v24 = vld [vmem:[%s3697_s17 + $0x658] sm:$0xff]  ;;  %v1317_v53 = vld [vmem:[%s3706_s6 + $0x218] sm:$0xff] }
 0x136   : > { %2463 = vmatpush1.bf16.msra.mxu0 %v2462_v34  ;;  %v2552_v34 = vpack.c.bf16 %v527_v32, %v523_v31  ;;  %v1275_v22 = vld [vmem:[%s3706_s6 + $0xc8] sm:$0xff]  ;;  %v1280_v29 = vld [vmem:[%s3706_s6 + $0xf0] sm:$0xff] }
 0x137   : > { %2465 = vmatprep.subr.bf16.mxu0 %v2464_v39  ;;  %v2556_v39 = vpack.c.bf16 %v535_v38, %v531_v37  ;;  %v578_v32 = vld [vmem:[%s3697_s17 + $0x650] sm:$0xff]  ;;  %v587_v40 = vld [vmem:[%s3697_s17 + $0x698] sm:$0xff] }
 0x138   : > { %2531 = vmatpush1.bf16.msra.mxu1 %v2530_v45  ;;  %v538_v45 = vld [vmem:[%s3697_s17 + $0x510] sm:$0xff]  ;;  %v591_v41 = vld [vmem:[%s3697_s17 + $0x6b8] sm:$0xff] }
 0x139   : > { %2533 = vmatprep.subr.bf16.mxu1 %v2532_v47  ;;  %v547_v47 = vld [vmem:[%s3697_s17 + $0x558] sm:$0xff]  ;;  %v582_v37 = vld [vmem:[%s3697_s17 + $0x670] sm:$0xff] }
 0x13a   : > { %2467 = vmatpush1.bf16.msra.mxu0 %v2466_v46  ;;  %v542_v46 = vld [vmem:[%s3697_s17 + $0x530] sm:$0xff]  ;;  %v2564_v50 = vpack.c.bf16 %v551_v48, %v547_v47  ;;  %v2584_v47 = vpack.c.bf16 %v591_v41, %v587_v40  ;;  %v595_v48 = vld [vmem:[%s3697_s17 + $0x6d8] sm:$0xff] }
 0x13b   : > { %2469 = vmatprep.subr.bf16.mxu0 %v2468_v51  ;;  %v2562_v49 = vpack.c.bf16 %v542_v46, %v538_v45  ;;  %v546_v51 = vld [vmem:[%s3697_s17 + $0x550] sm:$0xff]  ;;  %v631_v40 = vld [vmem:[%s3697_s17 + $0x7f8] sm:$0xff] }
 0x13c   : > { %2535 = vmatpush1.bf16.msra.mxu1 %v2534_v56  ;;  %v2566_v54 = vpack.c.bf16 %v550_v17, %v546_v51  ;;  %v554_v56 = vld [vmem:[%s3697_s17 + $0x590] sm:$0xff]  ;;  %v1304_v51 = vld [vmem:[%s3706_s6 + $0x1b0] sm:$0xff] }
 0x13d   : > { %2537 = vmatprep.subr.bf16.mxu1 %v2536_v58  ;;  %v563_v58 = vld [vmem:[%s3697_s17 + $0x5d8] sm:$0xff]  ;;  %v590_v45 = vld [vmem:[%s3697_s17 + $0x6b0] sm:$0xff] }
 0x13e   : > { %2471 = vmatpush1.bf16.msra.mxu0 %v2470_v57  ;;  %v558_v57 = vld [vmem:[%s3697_s17 + $0x5b0] sm:$0xff]  ;;  %v2572_v0 = vpack.c.bf16 %v567_v59, %v563_v58  ;;  %v599_v17 = vld [vmem:[%s3697_s17 + $0x6f8] sm:$0xff] }
 0x13f   : > { %2473 = vmatprep.subr.bf16.mxu0 %v2472_v62  ;;  %v2570_v60 = vpack.c.bf16 %v558_v57, %v554_v56  ;;  %v1251_v62 = vld [vmem:[%s3706_s6 + $0x8] sm:$0xff]  ;;  %v2588_v58 = vpack.c.bf16 %v599_v17, %v595_v48  ;;  %v603_v59 = vld [vmem:[%s3697_s17 + $0x718] sm:$0xff] }
 0x140   : > { %2539 = vmatpush1.bf16.msra.mxu1 %v2538_v4  ;;  %v2672_v2 = vpack.c.bf16 %v1257_v63, %v1251_v62  ;;  %v1256_v4 = vld [vmem:[%s3706_s6 + $0x30] sm:$0xff]  ;;  %v1311_v52 = vld [vmem:[%s3706_s6 + $0x1e8] sm:$0xff] }
 0x141   : > { %2541 = vmatprep.subr.bf16.mxu1 %v2540_v6  ;;  %v575_v6 = vld [vmem:[%s3697_s17 + $0x638] sm:$0xff]  ;;  %v2674_v7 = vpack.c.bf16 %v1256_v4, %v1250_v3  ;;  %v598_v56 = vld [vmem:[%s3697_s17 + $0x6f0] sm:$0xff] }
 0x142   : > { %2475 = vmatpush1.bf16.msra.mxu0 %v2474_v5  ;;  %v571_v5 = vld [vmem:[%s3697_s17 + $0x618] sm:$0xff]  ;;  %v602_v3 = vld [vmem:[%s3697_s17 + $0x710] sm:$0xff] }
 0x143   : > { %2477 = vmatprep.subr.bf16.mxu0 %v2476_v10  ;;  %v2574_v10 = vpack.c.bf16 %v566_v1, %v562_v61  ;;  %v1310_v61 = vld [vmem:[%s3706_s6 + $0x1e0] sm:$0xff]  ;;  %v1316_v62 = vld [vmem:[%s3706_s6 + $0x210] sm:$0xff]  ;;  %v1329_v1 = vld [vmem:[%s3706_s6 + $0x278] sm:$0xff] }
 0x144   : > { %2543 = vmatpush1.bf16.msra.mxu1 %v2542_v14  ;;  %v1268_v14 = vld [vmem:[%s3706_s6 + $0x90] sm:$0xff]  ;;  %v606_v4 = vld [vmem:[%s3697_s17 + $0x730] sm:$0xff] }
 0x145   : > { %2545 = vmatprep.subr.bf16.mxu1 %v2544_v16  ;;  %v574_v16 = vld [vmem:[%s3697_s17 + $0x630] sm:$0xff]  ;;  %v2678_v21 = vpack.c.bf16 %v1268_v14, %v1262_v13  ;;  %v607_v63 = vld [vmem:[%s3697_s17 + $0x738] sm:$0xff]  ;;  %v1341_v13 = vld [vmem:[%s3706_s6 + $0x2d8] sm:$0xff]  ;;  %v2594_v14 = vpack.c.bf16 %v606_v4, %v602_v3 }
 0x146   : > { %2479 = vmatpush1.bf16.msra.mxu0 %v2478_v15  ;;  %v2576_v15 = vpack.c.bf16 %v575_v6, %v571_v5  ;;  %v2578_v31 = vpack.c.bf16 %v574_v16, %v570_v11  ;;  %v2694_v5 = vpack.c.bf16 %v1316_v62, %v1310_v61  ;;  %v2592_v6 = vpack.c.bf16 %v607_v63, %v603_v59  ;;  %v615_v11 = vld [vmem:[%s3697_s17 + $0x778] sm:$0xff]  ;;  %v614_v16 = vld [vmem:[%s3697_s17 + $0x770] sm:$0xff] }
 0x147   : > { %1060 = vmatmul.mubr.f32.vlgmr.msra.gmra.mrb[2].mxu1 %v3863_v18  ;;  %v2554_v18 = vpack.c.bf16 %v526_v36, %v522_v35  ;;  %2673 = vmatprep.subr.bf16.mxu0 %v2672_v2  ;;  %v1293_v35 = vld [vmem:[%s3706_s6 + $0x158] sm:$0xff]  ;;  %v647_v17 = vld [vmem:[%s3697_s17 + $0x878] sm:$0xff]  ;;  %v654_v61 = vld [vmem:[%s3697_s17 + $0x8b0] sm:$0xff] }
 0x148   : > { %2547 = vmatpush1.bf16.msra.mxu1 %v2546_v25  ;;  %1130 = vmatprep.mubr.f32.mxu1 %v3820_v20  ;;  %v2560_v20 = vpack.c.bf16 %v543_v43, %v539_v42  ;;  %v583_v25 = vld [vmem:[%s3697_s17 + $0x678] sm:$0xff]  ;;  %v1299_v42 = vld [vmem:[%s3706_s6 + $0x188] sm:$0xff]  ;;  %v1305_v43 = vld [vmem:[%s3706_s6 + $0x1b8] sm:$0xff] }
 0x149   : > { %989 = vmatmul.mubr.f32.vlgmr.msra.gmra.mrb[0].mxu0 %v3995_v26  ;;  %2549 = vmatprep.subr.bf16.mxu1 %v2548_v27  ;;  %v2680_v27 = vpack.c.bf16 %v1281_v23, %v1275_v22  ;;  %v2580_v36 = vpack.c.bf16 %v583_v25, %v579_v24  ;;  %v619_v23 = vld [vmem:[%s3697_s17 + $0x798] sm:$0xff]  ;;  %v1334_v25 = vld [vmem:[%s3706_s6 + $0x2a0] sm:$0xff] }
 0x14a   : > { %2675 = vmatpush1.bf16.msra.mxu0 %v2674_v7  ;;  %v611_v7 = vld [vmem:[%s3697_s17 + $0x758] sm:$0xff] }
 0x14b   : > { %2677 = vmatprep.subr.bf16.mxu0 %v2676_v12  ;;  %v1335_v12 = vld [vmem:[%s3706_s6 + $0x2a8] sm:$0xff]  ;;  %v2596_v22 = vpack.c.bf16 %v615_v11, %v611_v7  ;;  %v659_v62 = vld [vmem:[%s3697_s17 + $0x8d8] sm:$0xff] }
 0x14c   : > { %2551 = vmatpush1.bf16.msra.mxu1 %v2550_v33  ;;  %v2682_v33 = vpack.c.bf16 %v1280_v29, %v1274_v28  ;;  %v2700_v24 = vpack.c.bf16 %v1341_v13, %v1335_v12  ;;  %v623_v28 = vld [vmem:[%s3697_s17 + $0x7b8] sm:$0xff]  ;;  %v1347_v29 = vld [vmem:[%s3706_s6 + $0x308] sm:$0xff] }
 0x14d   : > { %2553 = vmatprep.subr.bf16.mxu1 %v2552_v34  ;;  %v1287_v34 = vld [vmem:[%s3706_s6 + $0x128] sm:$0xff]  ;;  %v663_v63 = vld [vmem:[%s3697_s17 + $0x8f8] sm:$0xff] }
 0x14e   : > { %2679 = vmatpush1.bf16.msra.mxu0 %v2678_v21  ;;  %v2684_v38 = vpack.c.bf16 %v1293_v35, %v1287_v34  ;;  %v2600_v35 = vpack.c.bf16 %v623_v28, %v619_v23  ;;  %v667_v3 = vld [vmem:[%s3697_s17 + $0x918] sm:$0xff]  ;;  %v670_v7 = vld [vmem:[%s3697_s17 + $0x930] sm:$0xff]  ;;  %v1365_v28 = vld [vmem:[%s3706_s6 + $0x398] sm:$0xff] }
 0x14f   : > { %2681 = vmatprep.subr.bf16.mxu0 %v2680_v27  ;;  %v1340_v27 = vld [vmem:[%s3706_s6 + $0x2d0] sm:$0xff]  ;;  %v674_v12 = vld [vmem:[%s3697_s17 + $0x950] sm:$0xff] }
 0x150   : > { %2555 = vmatpush1.bf16.msra.mxu1 %v2554_v18  ;;  %v1286_v18 = vld [vmem:[%s3706_s6 + $0x120] sm:$0xff]  ;;  %v2702_v34 = vpack.c.bf16 %v1340_v27, %v1334_v25  ;;  %v678_v13 = vld [vmem:[%s3697_s17 + $0x970] sm:$0xff]  ;;  %v695_v25 = vld [vmem:[%s3697_s17 + $0x9f8] sm:$0xff] }
 0x151   : > { %2557 = vmatprep.subr.bf16.mxu1 %v2556_v39  ;;  %v1292_v39 = vld [vmem:[%s3706_s6 + $0x150] sm:$0xff]  ;;  %v686_v23 = vld [vmem:[%s3697_s17 + $0x9b0] sm:$0xff] }
 0x152   : > { %2683 = vmatpush1.bf16.msra.mxu0 %v2682_v33  ;;  %v2686_v46 = vpack.c.bf16 %v1292_v39, %v1286_v18  ;;  %v618_v33 = vld [vmem:[%s3697_s17 + $0x790] sm:$0xff]  ;;  %v1352_v18 = vld [vmem:[%s3706_s6 + $0x330] sm:$0xff] }
 0x153   : > { %2685 = vmatprep.subr.bf16.mxu0 %v2684_v38  ;;  %v1346_v38 = vld [vmem:[%s3706_s6 + $0x300] sm:$0xff]  ;;  %v627_v39 = vld [vmem:[%s3697_s17 + $0x7d8] sm:$0xff]  ;;  %v1359_v27 = vld [vmem:[%s3706_s6 + $0x368] sm:$0xff] }
 0x154   : > { %2559 = vmatpush1.bf16.msra.mxu1 %v2558_v44  ;;  %v2582_v44 = vpack.c.bf16 %v582_v37, %v578_v32 }
 0x155   : > { %2561 = vmatprep.subr.bf16.mxu1 %v2560_v20  ;;  %v586_v20 = vld [vmem:[%s3697_s17 + $0x690] sm:$0xff] }
 0x156   : > { %2687 = vmatpush1.bf16.msra.mxu0 %v2686_v46  ;;  %v639_v46 = vld [vmem:[%s3697_s17 + $0x838] sm:$0xff] }
 0x158   : > { %2563 = vmatpush1.bf16.msra.mxu1 %v2562_v49  ;;  %v2688_v49 = vpack.c.bf16 %v1305_v43, %v1299_v42  ;;  %v2706_v42 = vpack.c.bf16 %v1352_v18, %v1346_v38  ;;  %v2604_v43 = vpack.c.bf16 %v631_v40, %v627_v39  ;;  %v699_v38 = vld [vmem:[%s3697_s17 + $0xa18] sm:$0xff]  ;;  %v1371_v39 = vld [vmem:[%s3706_s6 + $0x3c8] sm:$0xff]  ;;  %v1377_v40 = vld [vmem:[%s3706_s6 + $0x3f8] sm:$0xff] }
 0x159   : > { %2565 = vmatprep.subr.bf16.mxu1 %v2564_v50  ;;  %v1298_v50 = vld [vmem:[%s3706_s6 + $0x180] sm:$0xff]  ;;  %v703_v18 = vld [vmem:[%s3697_s17 + $0xa38] sm:$0xff] }
 0x15a   : > { %v2690_v57 = vpack.c.bf16 %v1304_v51, %v1298_v50  ;;  %2689 = vmatprep.subr.bf16.mxu0 %v2688_v49  ;;  %v634_v49 = vld [vmem:[%s3697_s17 + $0x810] sm:$0xff]  ;;  %v643_v51 = vld [vmem:[%s3697_s17 + $0x858] sm:$0xff] }
 0x15b   : > { %v638_v50 = vld [vmem:[%s3697_s17 + $0x830] sm:$0xff] }
 0x15c   : > { %2567 = vmatpush1.bf16.msra.mxu1 %v2566_v54  ;;  %v2586_v54 = vpack.c.bf16 %v590_v45, %v586_v20  ;;  %2691 = vmatpush1.bf16.msra.mxu0 %v2690_v57  ;;  %v630_v20 = vld [vmem:[%s3697_s17 + $0x7f0] sm:$0xff]  ;;  %v635_v45 = vld [vmem:[%s3697_s17 + $0x818] sm:$0xff] }
 0x15d   : > { %2569 = vmatprep.subr.bf16.mxu1 %v2568_v55  ;;  %v594_v55 = vld [vmem:[%s3697_s17 + $0x6d0] sm:$0xff]  ;;  %v2608_v48 = vpack.c.bf16 %v639_v46, %v635_v45  ;;  %v655_v57 = vld [vmem:[%s3697_s17 + $0x8b8] sm:$0xff]  ;;  %v2640_v45 = vpack.c.bf16 %v703_v18, %v699_v38 }
 0x15e   : > { %v2590_v2 = vpack.c.bf16 %v598_v56, %v594_v55  ;;  %v646_v55 = vld [vmem:[%s3697_s17 + $0x870] sm:$0xff]  ;;  %v651_v56 = vld [vmem:[%s3697_s17 + $0x898] sm:$0xff] }
 0x15f   : > { %v2616_v59 = vpack.c.bf16 %v655_v57, %v651_v56  ;;  %v698_v46 = vld [vmem:[%s3697_s17 + $0xa10] sm:$0xff] }
 0x160   : > { %2571 = vmatpush1.bf16.msra.mxu1 %v2570_v60  ;;  %v2692_v60 = vpack.c.bf16 %v1317_v53, %v1311_v52  ;;  %v2610_v52 = vpack.c.bf16 %v638_v50, %v634_v49  ;;  %v2612_v53 = vpack.c.bf16 %v647_v17, %v643_v51  ;;  %v711_v49 = vld [vmem:[%s3697_s17 + $0xa78] sm:$0xff]  ;;  %v1383_v50 = vld [vmem:[%s3706_s6 + $0x428] sm:$0xff]  ;;  %v1389_v51 = vld [vmem:[%s3706_s6 + $0x458] sm:$0xff] }
 0x161   : > { %2573 = vmatprep.subr.bf16.mxu1 %v2572_v0  ;;  %v1323_v0 = vld [vmem:[%s3706_s6 + $0x248] sm:$0xff]  ;;  %v2716_v17 = vpack.c.bf16 %v1389_v51, %v1383_v50 }
 0x162   : > { %2693 = vmatprep.subr.bf16.mxu0 %v2692_v60  ;;  %v2696_v8 = vpack.c.bf16 %v1329_v1, %v1323_v0  ;;  %v650_v60 = vld [vmem:[%s3697_s17 + $0x890] sm:$0xff] }
 0x163   : > { %2695 = vmatpush1.bf16.msra.mxu0 %v2694_v5  ;;  %v2618_v0 = vpack.c.bf16 %v654_v61, %v650_v60  ;;  %v658_v1 = vld [vmem:[%s3697_s17 + $0x8d0] sm:$0xff]  ;;  %v719_v60 = vld [vmem:[%s3697_s17 + $0xab8] sm:$0xff] }
 0x164   : > { %2575 = vmatpush1.bf16.msra.mxu1 %v2574_v10  ;;  %v1328_v10 = vld [vmem:[%s3706_s6 + $0x270] sm:$0xff]  ;;  %2697 = vmatprep.subr.bf16.mxu0 %v2696_v8  ;;  %v706_v57 = vld [vmem:[%s3697_s17 + $0xa50] sm:$0xff] }
 0x165   : > { %2577 = vmatprep.subr.bf16.mxu1 %v2576_v15  ;;  %v610_v15 = vld [vmem:[%s3697_s17 + $0x750] sm:$0xff]  ;;  %v2698_v21 = vpack.c.bf16 %v1328_v10, %v1322_v9  ;;  %v675_v8 = vld [vmem:[%s3697_s17 + $0x958] sm:$0xff] }
 0x166   : > { %v2598_v32 = vpack.c.bf16 %v614_v16, %v610_v15  ;;  %v679_v9 = vld [vmem:[%s3697_s17 + $0x978] sm:$0xff]  ;;  %v2630_v16 = vpack.c.bf16 %v678_v13, %v674_v12  ;;  %v1395_v61 = vld [vmem:[%s3706_s6 + $0x488] sm:$0xff] }
 0x167   : > { %2699 = vmatpush1.bf16.msra.mxu0 %v2698_v21  ;;  %v2628_v11 = vpack.c.bf16 %v679_v9, %v675_v8  ;;  %v687_v15 = vld [vmem:[%s3697_s17 + $0x9b8] sm:$0xff]  ;;  %v1419_v13 = vld [vmem:[%s3706_s6 + $0x548] sm:$0xff] }
 0x168   : > { %2579 = vmatpush1.bf16.msra.mxu1 %v2578_v31  ;;  %v1353_v31 = vld [vmem:[%s3706_s6 + $0x338] sm:$0xff]  ;;  %2701 = vmatprep.subr.bf16.mxu0 %v2700_v24  ;;  %v691_v24 = vld [vmem:[%s3697_s17 + $0x9d8] sm:$0xff]  ;;  %v730_v38 = vld [vmem:[%s3697_s17 + $0xb10] sm:$0xff] }
 0x169   : > { %2581 = vmatprep.subr.bf16.mxu1 %v2580_v36  ;;  %v622_v36 = vld [vmem:[%s3697_s17 + $0x7b0] sm:$0xff]  ;;  %v2704_v37 = vpack.c.bf16 %v1353_v31, %v1347_v29  ;;  %v2708_v29 = vpack.c.bf16 %v1365_v28, %v1359_v27  ;;  %v1358_v31 = vld [vmem:[%s3706_s6 + $0x360] sm:$0xff]  ;;  %v727_v8 = vld [vmem:[%s3697_s17 + $0xaf8] sm:$0xff] }
 0x16a   : > { %v2602_v41 = vpack.c.bf16 %v622_v36, %v618_v33  ;;  %v690_v36 = vld [vmem:[%s3697_s17 + $0x9d0] sm:$0xff]  ;;  %v1424_v27 = vld [vmem:[%s3706_s6 + $0x570] sm:$0xff] }
 0x16b   : > { %2703 = vmatpush1.bf16.msra.mxu0 %v2702_v34  ;;  %v735_v28 = vld [vmem:[%s3697_s17 + $0xb38] sm:$0xff]  ;;  %v734_v18 = vld [vmem:[%s3697_s17 + $0xb30] sm:$0xff] }
 0x16c   : > { %2583 = vmatpush1.bf16.msra.mxu1 %v2582_v44  ;;  %v626_v44 = vld [vmem:[%s3697_s17 + $0x7d0] sm:$0xff]  ;;  %2705 = vmatprep.subr.bf16.mxu0 %v2704_v37 }
 0x16d   : > { %2585 = vmatprep.subr.bf16.mxu1 %v2584_v47  ;;  %v2606_v47 = vpack.c.bf16 %v630_v20, %v626_v44  ;;  %v694_v37 = vld [vmem:[%s3697_s17 + $0x9f0] sm:$0xff] }
 0x16e   : > { %v2638_v44 = vpack.c.bf16 %v694_v37, %v690_v36  ;;  %v750_v50 = vld [vmem:[%s3697_s17 + $0xbb0] sm:$0xff] }
 0x16f   : > { %2707 = vmatpush1.bf16.msra.mxu0 %v2706_v42  ;;  %v1370_v42 = vld [vmem:[%s3706_s6 + $0x3c0] sm:$0xff]  ;;  %v1443_v51 = vld [vmem:[%s3706_s6 + $0x608] sm:$0xff] }
 0x170   : > { %2587 = vmatpush1.bf16.msra.mxu1 %v2586_v54  ;;  %v642_v54 = vld [vmem:[%s3697_s17 + $0x850] sm:$0xff]  ;;  %2709 = vmatprep.subr.bf16.mxu0 %v2708_v29 }
 0x171   : > { %2589 = vmatprep.subr.bf16.mxu1 %v2588_v58  ;;  %v2614_v58 = vpack.c.bf16 %v646_v55, %v642_v54 }
 0x174   : > { %2591 = vmatpush1.bf16.msra.mxu1 %v2590_v2  ;;  %v662_v2 = vld [vmem:[%s3697_s17 + $0x8f0] sm:$0xff] }
 0x175   : > { %2593 = vmatprep.subr.bf16.mxu1 %v2592_v6  ;;  %v2622_v4 = vpack.c.bf16 %v662_v2, %v658_v1  ;;  %v666_v6 = vld [vmem:[%s3697_s17 + $0x910] sm:$0xff] }
 0x176   : > { %v2626_v10 = vpack.c.bf16 %v670_v7, %v666_v6  ;;  %v714_v2 = vld [vmem:[%s3697_s17 + $0xa90] sm:$0xff]  ;;  %v723_v6 = vld [vmem:[%s3697_s17 + $0xad8] sm:$0xff]  ;;  %v1413_v7 = vld [vmem:[%s3706_s6 + $0x518] sm:$0xff] }
 0x178   : > { %2595 = vmatpush1.bf16.msra.mxu1 %v2594_v14  ;;  %v683_v14 = vld [vmem:[%s3697_s17 + $0x998] sm:$0xff] }
 0x179   : > { %2597 = vmatprep.subr.bf16.mxu1 %v2596_v22  ;;  %v2632_v21 = vpack.c.bf16 %v687_v15, %v683_v14  ;;  %v682_v22 = vld [vmem:[%s3697_s17 + $0x990] sm:$0xff]  ;;  %v1425_v14 = vld [vmem:[%s3706_s6 + $0x578] sm:$0xff] }
 0x17a   : > { %v2634_v33 = vpack.c.bf16 %v686_v23, %v682_v22  ;;  %v1418_v22 = vld [vmem:[%s3706_s6 + $0x540] sm:$0xff]  ;;  %v2652_v23 = vpack.c.bf16 %v727_v8, %v723_v6  ;;  %v1283_v6 = vld [vmem:[%s3706_s6 + $0x108] sm:$0xff] }
 0x17b   : > { %v2730_v29 = vpack.c.bf16 %v1424_v27, %v1418_v22  ;;  %v1313_v27 = vld [vmem:[%s3706_s6 + $0x1f8] sm:$0xff] }
 0x17c   : > { %2599 = vmatpush1.bf16.msra.mxu1 %v2598_v32  ;;  %v1364_v32 = vld [vmem:[%s3706_s6 + $0x390] sm:$0xff] }
 0x17d   : > { %2601 = vmatprep.subr.bf16.mxu1 %v2600_v35  ;;  %v2710_v34 = vpack.c.bf16 %v1364_v32, %v1358_v31  ;;  %v2636_v35 = vpack.c.bf16 %v695_v25, %v691_v24  ;;  %v726_v24 = vld [vmem:[%s3697_s17 + $0xaf0] sm:$0xff]  ;;  %v731_v25 = vld [vmem:[%s3697_s17 + $0xb18] sm:$0xff]  ;;  %v1437_v32 = vld [vmem:[%s3706_s6 + $0x5d8] sm:$0xff] }
 0x17e   : > { %v1431_v31 = vld [vmem:[%s3706_s6 + $0x5a8] sm:$0xff]  ;;  %v2656_v37 = vpack.c.bf16 %v735_v28, %v731_v25  ;;  %v1306_v25 = vld [vmem:[%s3706_s6 + $0x1c0] sm:$0xff] }
 0x17f   : > { %2711 = vmatpush1.bf16.msra.mxu0 %v2710_v34  ;;  %v1430_v34 = vld [vmem:[%s3706_s6 + $0x5a0] sm:$0xff]  ;;  %v1319_v28 = vld [vmem:[%s3706_s6 + $0x228] sm:$0xff] }
 0x180   : > { %2603 = vmatpush1.bf16.msra.mxu1 %v2602_v41  ;;  %v2712_v41 = vpack.c.bf16 %v1377_v40, %v1371_v39  ;;  %v739_v39 = vld [vmem:[%s3697_s17 + $0xb58] sm:$0xff] }
 0x181   : > { %2605 = vmatprep.subr.bf16.mxu1 %v2604_v43  ;;  %v1376_v43 = vld [vmem:[%s3706_s6 + $0x3f0] sm:$0xff] }
 0x182   : > { %v2714_v20 = vpack.c.bf16 %v1376_v43, %v1370_v42  ;;  %2713 = vmatprep.subr.bf16.mxu0 %v2712_v41  ;;  %v743_v40 = vld [vmem:[%s3697_s17 + $0xb78] sm:$0xff]  ;;  %v2658_v42 = vpack.c.bf16 %v734_v18, %v730_v38  ;;  %v1330_v18 = vld [vmem:[%s3706_s6 + $0x280] sm:$0xff] }
 0x183   : > { %v2660_v43 = vpack.c.bf16 %v743_v40, %v739_v39  ;;  %v1324_v38 = vld [vmem:[%s3706_s6 + $0x250] sm:$0xff]  ;;  %v1337_v40 = vld [vmem:[%s3706_s6 + $0x2b8] sm:$0xff] }
 0x184   : > { %2607 = vmatpush1.bf16.msra.mxu1 %v2606_v47  ;;  %v702_v47 = vld [vmem:[%s3697_s17 + $0xa30] sm:$0xff]  ;;  %2715 = vmatpush1.bf16.msra.mxu0 %v2714_v20 }
 0x185   : > { %2609 = vmatprep.subr.bf16.mxu1 %v2608_v48  ;;  %v707_v48 = vld [vmem:[%s3697_s17 + $0xa58] sm:$0xff]  ;;  %v2642_v54 = vpack.c.bf16 %v702_v47, %v698_v46  ;;  %2717 = vmatprep.subr.bf16.mxu0 %v2716_v17  ;;  %v742_v20 = vld [vmem:[%s3697_s17 + $0xb70] sm:$0xff]  ;;  %v1449_v17 = vld [vmem:[%s3706_s6 + $0x638] sm:$0xff] }
 0x186   : > { %v2644_v56 = vpack.c.bf16 %v711_v49, %v707_v48  ;;  %v751_v46 = vld [vmem:[%s3697_s17 + $0xbb8] sm:$0xff]  ;;  %v746_v48 = vld [vmem:[%s3697_s17 + $0xb90] sm:$0xff] }
 0x187   : > { %1131 = vmatmul.mubr.f32.vlgmr.msra.gmra.mrb[2].mxu1 %v3865_v19  ;;  %v2620_v19 = vpack.c.bf16 %v663_v63, %v659_v62  ;;  %v1401_v62 = vld [vmem:[%s3706_s6 + $0x4b8] sm:$0xff] }
 0x188   : > { %2611 = vmatpush1.bf16.msra.mxu1 %v2610_v52  ;;  %1201 = vmatprep.mubr.f32.mxu1 %v3916_v30  ;;  %v671_v30 = vld [vmem:[%s3697_s17 + $0x938] sm:$0xff]  ;;  %v1382_v52 = vld [vmem:[%s3706_s6 + $0x420] sm:$0xff]  ;;  %v2720_v63 = vpack.c.bf16 %v1401_v62, %v1395_v61 }
 0x189   : > { %2613 = vmatprep.subr.bf16.mxu1 %v2612_v53  ;;  %v2624_v5 = vpack.c.bf16 %v671_v30, %v667_v3  ;;  %v1388_v53 = vld [vmem:[%s3706_s6 + $0x450] sm:$0xff]  ;;  %v1407_v30 = vld [vmem:[%s3706_s6 + $0x4e8] sm:$0xff] }
 0x18a   : > { %v2718_v55 = vpack.c.bf16 %v1388_v53, %v1382_v52  ;;  %v2724_v9 = vpack.c.bf16 %v1413_v7, %v1407_v30  ;;  %v755_v52 = vld [vmem:[%s3697_s17 + $0xbd8] sm:$0xff] }
 0x18b   : > { %v759_v53 = vld [vmem:[%s3697_s17 + $0xbf8] sm:$0xff] }
 0x18c   : > { %2615 = vmatpush1.bf16.msra.mxu1 %v2614_v58  ;;  %v710_v58 = vld [vmem:[%s3697_s17 + $0xa70] sm:$0xff]  ;;  %2719 = vmatpush1.bf16.msra.mxu0 %v2718_v55  ;;  %v2666_v55 = vpack.c.bf16 %v750_v50, %v746_v48  ;;  %v1264_v30 = vld [vmem:[%s3706_s6 + $0x70] sm:$0xff] }
 0x18d   : > { %2617 = vmatprep.subr.bf16.mxu1 %v2616_v59  ;;  %v715_v59 = vld [vmem:[%s3697_s17 + $0xa98] sm:$0xff]  ;;  %v2646_v1 = vpack.c.bf16 %v710_v58, %v706_v57  ;;  %2721 = vmatprep.subr.bf16.mxu0 %v2720_v63  ;;  %v754_v57 = vld [vmem:[%s3697_s17 + $0xbd0] sm:$0xff] }
 0x18e   : > { %v758_v58 = vld [vmem:[%s3697_s17 + $0xbf0] sm:$0xff]  ;;  %v1252_v63 = vld [vmem:[%s3706_s6 + $0x10] sm:$0xff] }
 0x18f   : > { %v2670_v61 = vpack.c.bf16 %v758_v58, %v754_v57  ;;  %v1348_v50 = vld [vmem:[%s3706_s6 + $0x310] sm:$0xff]  ;;  %v1373_v57 = vld [vmem:[%s3706_s6 + $0x3d8] sm:$0xff]  ;;  %v1379_v58 = vld [vmem:[%s3706_s6 + $0x408] sm:$0xff] }
 0x190   : > { %2619 = vmatpush1.bf16.msra.mxu1 %v2618_v0  ;;  %v1394_v0 = vld [vmem:[%s3706_s6 + $0x480] sm:$0xff] }
 0x191   : > { %2621 = vmatprep.subr.bf16.mxu1 %v2620_v19  ;;  %v1400_v19 = vld [vmem:[%s3706_s6 + $0x4b0] sm:$0xff] }
 0x192   : > { %v2722_v3 = vpack.c.bf16 %v1400_v19, %v1394_v0  ;;  %v1258_v0 = vld [vmem:[%s3706_s6 + $0x40] sm:$0xff]  ;;  %v1265_v19 = vld [vmem:[%s3706_s6 + $0x78] sm:$0xff] }
 0x194   : > { %2623 = vmatpush1.bf16.msra.mxu1 %v2622_v4  ;;  %v2648_v4 = vpack.c.bf16 %v719_v60, %v715_v59  ;;  %2723 = vmatpush1.bf16.msra.mxu0 %v2722_v3  ;;  %v1253_v59 = vld [vmem:[%s3706_s6 + $0x18] sm:$0xff]  ;;  %v1259_v60 = vld [vmem:[%s3706_s6 + $0x48] sm:$0xff] }
 0x195   : > { %2625 = vmatprep.subr.bf16.mxu1 %v2624_v5  ;;  %v718_v5 = vld [vmem:[%s3697_s17 + $0xab0] sm:$0xff]  ;;  %2725 = vmatprep.subr.bf16.mxu0 %v2724_v9  ;;  %v2800_v62 = vpack.c.bf16 %v1259_v60, %v1253_v59  ;;  %v1276_v9 = vld [vmem:[%s3706_s6 + $0xd0] sm:$0xff]  ;;  %v2840_v60 = vpack.c.bf16 %v1379_v58, %v1373_v57  ;;  %v1442_v57 = vld [vmem:[%s3706_s6 + $0x600] sm:$0xff] }
 0x196   : > { %v2650_v15 = vpack.c.bf16 %v718_v5, %v714_v2  ;;  %v2802_v2 = vpack.c.bf16 %v1258_v0, %v1252_v63  ;;  %v1277_v5 = vld [vmem:[%s3706_s6 + $0xd8] sm:$0xff]  ;;  %v1391_v0 = vld [vmem:[%s3706_s6 + $0x468] sm:$0xff]  ;;  %v1448_v58 = vld [vmem:[%s3706_s6 + $0x630] sm:$0xff] }
 0x197   : > { %v2808_v8 = vpack.c.bf16 %v1283_v6, %v1277_v5  ;;  %v1385_v63 = vld [vmem:[%s3706_s6 + $0x438] sm:$0xff] }
 0x198   : > { %2627 = vmatpush1.bf16.msra.mxu1 %v2626_v10  ;;  %v1406_v10 = vld [vmem:[%s3706_s6 + $0x4e0] sm:$0xff] }
 0x199   : > { %2629 = vmatprep.subr.bf16.mxu1 %v2628_v11  ;;  %v1412_v11 = vld [vmem:[%s3706_s6 + $0x510] sm:$0xff] }
 0x19a   : > { %v2726_v12 = vpack.c.bf16 %v1412_v11, %v1406_v10  ;;  %v1282_v10 = vld [vmem:[%s3706_s6 + $0x100] sm:$0xff]  ;;  %v1289_v11 = vld [vmem:[%s3706_s6 + $0x138] sm:$0xff] }
 0x19c   : > { %2631 = vmatpush1.bf16.msra.mxu1 %v2630_v16  ;;  %v722_v16 = vld [vmem:[%s3697_s17 + $0xad0] sm:$0xff]  ;;  %2727 = vmatpush1.bf16.msra.mxu0 %v2726_v12 }
 0x19d   : > { %2633 = vmatprep.subr.bf16.mxu1 %v2632_v21  ;;  %v2728_v21 = vpack.c.bf16 %v1425_v14, %v1419_v13  ;;  %v2654_v36 = vpack.c.bf16 %v726_v24, %v722_v16  ;;  %v1295_v12 = vld [vmem:[%s3706_s6 + $0x168] sm:$0xff]  ;;  %v2810_v13 = vpack.c.bf16 %v1282_v10, %v1276_v9  ;;  %v1301_v16 = vld [vmem:[%s3706_s6 + $0x198] sm:$0xff]  ;;  %v1300_v24 = vld [vmem:[%s3706_s6 + $0x190] sm:$0xff] }
 0x19e   : > { %v2812_v14 = vpack.c.bf16 %v1295_v12, %v1289_v11  ;;  %v1409_v9 = vld [vmem:[%s3706_s6 + $0x4f8] sm:$0xff]  ;;  %v1415_v10 = vld [vmem:[%s3706_s6 + $0x528] sm:$0xff] }
 0x19f   : > { %2729 = vmatprep.subr.bf16.mxu0 %v2728_v21  ;;  %v1307_v21 = vld [vmem:[%s3706_s6 + $0x1c8] sm:$0xff]  ;;  %v2852_v12 = vpack.c.bf16 %v1415_v10, %v1409_v9 }
 0x1a0   : > { %2635 = vmatpush1.bf16.msra.mxu1 %v2634_v33  ;;  %v2732_v33 = vpack.c.bf16 %v1437_v32, %v1431_v31  ;;  %2731 = vmatpush1.bf16.msra.mxu0 %v2730_v29  ;;  %v2818_v29 = vpack.c.bf16 %v1306_v25, %v1300_v24  ;;  %v2820_v31 = vpack.c.bf16 %v1319_v28, %v1313_v27  ;;  %v1312_v32 = vld [vmem:[%s3706_s6 + $0x1f0] sm:$0xff]  ;;  %v1433_v24 = vld [vmem:[%s3706_s6 + $0x5b8] sm:$0xff]  ;;  %v1439_v25 = vld [vmem:[%s3706_s6 + $0x5e8] sm:$0xff] }
 0x1a1   : > { %2637 = vmatprep.subr.bf16.mxu1 %v2636_v35  ;;  %v1436_v35 = vld [vmem:[%s3706_s6 + $0x5d0] sm:$0xff]  ;;  %v2860_v28 = vpack.c.bf16 %v1439_v25, %v1433_v24 }
 0x1a2   : > { %v2734_v41 = vpack.c.bf16 %v1436_v35, %v1430_v34  ;;  %2733 = vmatprep.subr.bf16.mxu0 %v2732_v33  ;;  %v1318_v33 = vld [vmem:[%s3706_s6 + $0x220] sm:$0xff]  ;;  %v1325_v34 = vld [vmem:[%s3706_s6 + $0x258] sm:$0xff]  ;;  %v1331_v35 = vld [vmem:[%s3706_s6 + $0x288] sm:$0xff] }
 0x1a3   : > { %v1472_v24 = vld [vmem:[%s3706_s6 + $0x6f0] sm:$0xff] }
 0x1a4   : > { %2639 = vmatpush1.bf16.msra.mxu1 %v2638_v44  ;;  %v738_v44 = vld [vmem:[%s3697_s17 + $0xb50] sm:$0xff]  ;;  %2735 = vmatpush1.bf16.msra.mxu0 %v2734_v41 }
 0x1a5   : > { %2641 = vmatprep.subr.bf16.mxu1 %v2640_v45  ;;  %v747_v45 = vld [vmem:[%s3697_s17 + $0xb98] sm:$0xff]  ;;  %v2662_v47 = vpack.c.bf16 %v742_v20, %v738_v44  ;;  %v1343_v41 = vld [vmem:[%s3706_s6 + $0x2e8] sm:$0xff] }
 0x1a6   : > { %v2664_v49 = vpack.c.bf16 %v751_v46, %v747_v45  ;;  %v2828_v44 = vpack.c.bf16 %v1343_v41, %v1337_v40  ;;  %v1336_v20 = vld [vmem:[%s3706_s6 + $0x2b0] sm:$0xff]  ;;  %v1342_v45 = vld [vmem:[%s3706_s6 + $0x2e0] sm:$0xff]  ;;  %v1349_v46 = vld [vmem:[%s3706_s6 + $0x318] sm:$0xff] }
 0x1a7   : > { %v2830_v48 = vpack.c.bf16 %v1342_v45, %v1336_v20 }
 0x1a8   : > { %2643 = vmatpush1.bf16.msra.mxu1 %v2642_v54  ;;  %v2736_v54 = vpack.c.bf16 %v1449_v17, %v1443_v51  ;;  %v1354_v51 = vld [vmem:[%s3706_s6 + $0x340] sm:$0xff]  ;;  %v1361_v17 = vld [vmem:[%s3706_s6 + $0x378] sm:$0xff] }
 0x1a9   : > { %2645 = vmatprep.subr.bf16.mxu1 %v2644_v56  ;;  %v2668_v56 = vpack.c.bf16 %v759_v53, %v755_v52  ;;  %v1367_v52 = vld [vmem:[%s3706_s6 + $0x3a8] sm:$0xff]  ;;  %v2834_v53 = vpack.c.bf16 %v1354_v51, %v1348_v50 }
 0x1aa   : > { %2737 = vmatprep.subr.bf16.mxu0 %v2736_v54  ;;  %v2836_v54 = vpack.c.bf16 %v1367_v52, %v1361_v17 }
 0x1ac   : > { %2647 = vmatpush1.bf16.msra.mxu1 %v2646_v1  ;;  %v1271_v1 = vld [vmem:[%s3706_s6 + $0xa8] sm:$0xff] }
 0x1ad   : > { %2649 = vmatprep.subr.bf16.mxu1 %v2648_v4  ;;  %v2804_v3 = vpack.c.bf16 %v1271_v1, %v1265_v19  ;;  %v1270_v4 = vld [vmem:[%s3706_s6 + $0xa0] sm:$0xff]  ;;  %v2844_v1 = vpack.c.bf16 %v1391_v0, %v1385_v63  ;;  %v1455_v63 = vld [vmem:[%s3706_s6 + $0x668] sm:$0xff] }
 0x1ae   : > { %v2806_v7 = vpack.c.bf16 %v1270_v4, %v1264_v30  ;;  %v1397_v30 = vld [vmem:[%s3706_s6 + $0x498] sm:$0xff]  ;;  %v1403_v4 = vld [vmem:[%s3706_s6 + $0x4c8] sm:$0xff] }
 0x1af   : > { %v2848_v6 = vpack.c.bf16 %v1403_v4, %v1397_v30 }
 0x1b0   : > { %2651 = vmatpush1.bf16.msra.mxu1 %v2650_v15  ;;  %v1288_v15 = vld [vmem:[%s3706_s6 + $0x130] sm:$0xff] }
 0x1b1   : > { %2653 = vmatprep.subr.bf16.mxu1 %v2652_v23  ;;  %v2816_v23 = vpack.c.bf16 %v1307_v21, %v1301_v16 }
 0x1b4   : > { %2655 = vmatpush1.bf16.msra.mxu1 %v2654_v36  ;;  %v2822_v36 = vpack.c.bf16 %v1318_v33, %v1312_v32  ;;  %v1445_v32 = vld [vmem:[%s3706_s6 + $0x618] sm:$0xff]  ;;  %v1451_v33 = vld [vmem:[%s3706_s6 + $0x648] sm:$0xff] }
 0x1b5   : > { %2657 = vmatprep.subr.bf16.mxu1 %v2656_v37  ;;  %v2824_v37 = vpack.c.bf16 %v1331_v35, %v1325_v34  ;;  %v2864_v35 = vpack.c.bf16 %v1451_v33, %v1445_v32  ;;  %v1485_v32 = vld [vmem:[%s3706_s6 + $0x758] sm:$0xff] }
 0x1b6   : > { %v1481_v33 = vld [vmem:[%s3706_s6 + $0x738] sm:$0xff] }
 0x1b8   : > { %2659 = vmatpush1.bf16.msra.mxu1 %v2658_v42 }
 0x1b9   : > { %2661 = vmatprep.subr.bf16.mxu1 %v2660_v43  ;;  %v2826_v43 = vpack.c.bf16 %v1330_v18, %v1324_v38  ;;  %v4266_v18 = vld [vmem:[%s312_s7] sm:$0xf] }
 0x1bc   : > { %2663 = vmatpush1.bf16.msra.mxu1 %v2662_v47  ;;  %v1355_v47 = vld [vmem:[%s3706_s6 + $0x348] sm:$0xff] }
 0x1bd   : > { %2665 = vmatprep.subr.bf16.mxu1 %v2664_v49  ;;  %v2832_v49 = vpack.c.bf16 %v1355_v47, %v1349_v46 }
 0x1c0   : > { %2667 = vmatpush1.bf16.msra.mxu1 %v2666_v55  ;;  %v1360_v55 = vld [vmem:[%s3706_s6 + $0x370] sm:$0xff] }
 0x1c1   : > { %2669 = vmatprep.subr.bf16.mxu1 %v2668_v56  ;;  %v1366_v56 = vld [vmem:[%s3706_s6 + $0x3a0] sm:$0xff] }
 0x1c2   : > { %v2838_v59 = vpack.c.bf16 %v1366_v56, %v1360_v55 }
 0x1c4   : > { %2671 = vmatpush1.bf16.msra.mxu1 %v2670_v61  ;;  %v1372_v61 = vld [vmem:[%s3706_s6 + $0x3d0] sm:$0xff] }
 0x1c5   : > { %2801 = vmatprep.subr.bf16.mxu1 %v2800_v62  ;;  %v1378_v62 = vld [vmem:[%s3706_s6 + $0x400] sm:$0xff] }
 0x1c6   : > { %v2842_v19 = vpack.c.bf16 %v1378_v62, %v1372_v61  ;;  %v1444_v61 = vld [vmem:[%s3706_s6 + $0x610] sm:$0xff]  ;;  %v1450_v62 = vld [vmem:[%s3706_s6 + $0x640] sm:$0xff] }
 0x1c7   : > { %1202 = vmatmul.mubr.f32.vlgmr.msra.gmra.mrb[2].mxu1 %v3995_v26  ;;  %v1294_v26 = vld [vmem:[%s3706_s6 + $0x160] sm:$0xff] }
 0x1c8   : > { %2803 = vmatpush1.bf16.msra.mxu1 %v2802_v2  ;;  %v2814_v22 = vpack.c.bf16 %v1294_v26, %v1288_v15  ;;  %v1384_v2 = vld [vmem:[%s3706_s6 + $0x430] sm:$0xff]  ;;  %v1421_v15 = vld [vmem:[%s3706_s6 + $0x558] sm:$0xff]  ;;  %v1427_v26 = vld [vmem:[%s3706_s6 + $0x588] sm:$0xff] }
 0x1c9   : > { %2805 = vmatprep.subr.bf16.mxu1 %v2804_v3  ;;  %v1390_v3 = vld [vmem:[%s3706_s6 + $0x460] sm:$0xff]  ;;  %v2856_v21 = vpack.c.bf16 %v1427_v26, %v1421_v15  ;;  %v1473_v15 = vld [vmem:[%s3706_s6 + $0x6f8] sm:$0xff] }
 0x1ca   : > { %v2846_v5 = vpack.c.bf16 %v1390_v3, %v1384_v2  ;;  %v1457_v2 = vld [vmem:[%s3706_s6 + $0x678] sm:$0xff]  ;;  %v1463_v3 = vld [vmem:[%s3706_s6 + $0x6a8] sm:$0xff] }
 0x1cb   : > { %v1469_v26 = vld [vmem:[%s3706_s6 + $0x6d8] sm:$0xff] }
 0x1cc   : > { %2807 = vmatpush1.bf16.msra.mxu1 %v2806_v7  ;;  %v1396_v7 = vld [vmem:[%s3706_s6 + $0x490] sm:$0xff] }
 0x1cd   : > { %2809 = vmatprep.subr.bf16.mxu1 %v2808_v8  ;;  %v1402_v8 = vld [vmem:[%s3706_s6 + $0x4c0] sm:$0xff] }
 0x1ce   : > { %v2850_v11 = vpack.c.bf16 %v1402_v8, %v1396_v7  ;;  %v1454_v7 = vld [vmem:[%s3706_s6 + $0x660] sm:$0xff]  ;;  %v1460_v8 = vld [vmem:[%s3706_s6 + $0x690] sm:$0xff] }
 0x1d0   : > { %2811 = vmatpush1.bf16.msra.mxu1 %v2810_v13  ;;  %v1408_v13 = vld [vmem:[%s3706_s6 + $0x4f0] sm:$0xff] }
 0x1d1   : > { %2813 = vmatprep.subr.bf16.mxu1 %v2812_v14  ;;  %v1414_v14 = vld [vmem:[%s3706_s6 + $0x520] sm:$0xff] }
 0x1d2   : > { %v2854_v16 = vpack.c.bf16 %v1414_v14, %v1408_v13  ;;  %v1462_v13 = vld [vmem:[%s3706_s6 + $0x6a0] sm:$0xff]  ;;  %v1467_v14 = vld [vmem:[%s3706_s6 + $0x6c8] sm:$0xff] }
 0x1d3   : > { %v2744_v25 = vpack.c.bf16 %v1473_v15, %v1467_v14  ;;  %v1516_v14 = vld [vmem:[%s3706_s6 + $0x850] sm:$0xff]  ;;  %v1522_v15 = vld [vmem:[%s3706_s6 + $0x880] sm:$0xff] }
 0x1d4   : > { %2815 = vmatpush1.bf16.msra.mxu1 %v2814_v22  ;;  %v1420_v22 = vld [vmem:[%s3706_s6 + $0x550] sm:$0xff] }
 0x1d5   : > { %2817 = vmatprep.subr.bf16.mxu1 %v2816_v23  ;;  %v1426_v23 = vld [vmem:[%s3706_s6 + $0x580] sm:$0xff] }
 0x1d6   : > { %v2858_v27 = vpack.c.bf16 %v1426_v23, %v1420_v22  ;;  %v1466_v23 = vld [vmem:[%s3706_s6 + $0x6c0] sm:$0xff] }
 0x1d8   : > { %2819 = vmatpush1.bf16.msra.mxu1 %v2818_v29  ;;  %v1432_v29 = vld [vmem:[%s3706_s6 + $0x5b0] sm:$0xff] }
 0x1d9   : > { %2821 = vmatprep.subr.bf16.mxu1 %v2820_v31  ;;  %v1438_v31 = vld [vmem:[%s3706_s6 + $0x5e0] sm:$0xff] }
 0x1da   : > { %v4219_v39 = vpop.f32.mrb[0].mxu1  ;;  %v2862_v34 = vpack.c.bf16 %v1438_v31, %v1432_v29  ;;  %v1474_v29 = vld [vmem:[%s3706_s6 + $0x700] sm:$0xff]  ;;  %v1479_v31 = vld [vmem:[%s3706_s6 + $0x728] sm:$0xff] }
 0x1db   : > { %v4223_v42 = vpop.f32.mrb[1].mxu1 }
 0x1dc   : > { %2823 = vmatpush1.bf16.msra.mxu1 %v2822_v36  ;;  %v762_v36 = vlaneseq }
 0x1dd   : > { %2825 = vmatprep.subr.bf16.mxu1 %v2824_v37 }
 0x1de   : > { %v4261_v37 = vshrl.u32 %v762_v36, 7 }
 0x1e0   : > { %2827 = vmatpush1.bf16.msra.mxu1 %v2826_v43  ;;  %v764_v38 = vsub.s32 0, %v4261_v37  ;;  %v768_v40 = vsub.s32 1, %v4261_v37 }
 0x1e1   : > { %2829 = vmatprep.subr.bf16.mxu1 %v2828_v44 }
 0x1e2   : > { %v765_v41 = vrot.slane %v4266_v18, %v764_v38  ;;  %v769_v43 = vrot.slane %v4266_v18, %v768_v40 }
 0x1e4   : > { %2831 = vmatpush1.bf16.msra.mxu1 %v2830_v48  ;;  %v849_v44 = vadd.f32 %v4219_v39, %v765_v41  ;;  %v851_v20 = vadd.f32 %v4223_v42, %v769_v43  ;;  %v1478_v41 = vld [vmem:[%s3706_s6 + $0x720] sm:$0xff]  ;;  %v1484_v43 = vld [vmem:[%s3706_s6 + $0x750] sm:$0xff] }
 0x1e5   : > { %2833 = vmatprep.subr.bf16.mxu1 %v2832_v49 }
 0x1e8   : > { %2835 = vmatpush1.bf16.msra.mxu1 %v2834_v53 }
 0x1e9   : > { %2837 = vmatprep.subr.bf16.mxu1 %v2836_v54 }
 0x1ec   : > { %2839 = vmatpush1.bf16.msra.mxu1 %v2838_v59 }
 0x1ed   : > { %2841 = vmatprep.subr.bf16.mxu1 %v2840_v60 }
 0x1f0   : > { %2843 = vmatpush1.bf16.msra.mxu1 %v2842_v19 }
 0x1f1   : > { %2845 = vmatprep.subr.bf16.mxu1 %v2844_v1  ;;  %v1461_v1 = vld [vmem:[%s3706_s6 + $0x698] sm:$0xff] }
 0x1f2   : > { %v2740_v10 = vpack.c.bf16 %v1461_v1, %v1455_v63  ;;  %v1508_v63 = vld [vmem:[%s3706_s6 + $0x810] sm:$0xff] }
 0x1f3   : > { %v1504_v1 = vld [vmem:[%s3706_s6 + $0x7f0] sm:$0xff] }
 0x1f4   : > { %2847 = vmatpush1.bf16.msra.mxu1 %v2846_v5  ;;  %v2738_v5 = vpack.c.bf16 %v1448_v58, %v1442_v57  ;;  %v1509_v57 = vld [vmem:[%s3706_s6 + $0x818] sm:$0xff] }
 0x1f5   : > { %2849 = vmatprep.subr.bf16.mxu1 %v2848_v6  ;;  %v2866_v6 = vpack.c.bf16 %v1450_v62, %v1444_v61  ;;  %v1505_v58 = vld [vmem:[%s3706_s6 + $0x7f8] sm:$0xff]  ;;  %v1502_v62 = vld [vmem:[%s3706_s6 + $0x7e0] sm:$0xff] }
 0x1f8   : > { %2851 = vmatpush1.bf16.msra.mxu1 %v2850_v11  ;;  %v2868_v11 = vpack.c.bf16 %v1463_v3, %v1457_v2  ;;  %v1510_v2 = vld [vmem:[%s3706_s6 + $0x820] sm:$0xff]  ;;  %v1515_v3 = vld [vmem:[%s3706_s6 + $0x848] sm:$0xff] }
 0x1f9   : > { %2853 = vmatprep.subr.bf16.mxu1 %v2852_v12  ;;  %v1456_v12 = vld [vmem:[%s3706_s6 + $0x670] sm:$0xff] }
 0x1fa   : > { %v2870_v22 = vpack.c.bf16 %v1462_v13, %v1456_v12 }
 0x1fc   : > { %2855 = vmatpush1.bf16.msra.mxu1 %v2854_v16  ;;  %v1475_v16 = vld [vmem:[%s3706_s6 + $0x708] sm:$0xff] }
 0x1fd   : > { %2857 = vmatprep.subr.bf16.mxu1 %v2856_v21  ;;  %v2742_v21 = vpack.c.bf16 %v1460_v8, %v1454_v7  ;;  %v2758_v7 = vpack.c.bf16 %v1508_v63, %v1502_v62  ;;  %v2886_v8 = vpack.c.bf16 %v1510_v2, %v1504_v1 }
 0x200   : > { %2859 = vmatpush1.bf16.msra.mxu1 %v2858_v27  ;;  %v2872_v27 = vpack.c.bf16 %v1475_v16, %v1469_v26  ;;  %v1527_v26 = vld [vmem:[%s3706_s6 + $0x8a8] sm:$0xff]  ;;  %v1533_v16 = vld [vmem:[%s3706_s6 + $0x8d8] sm:$0xff] }
 0x201   : > { %2861 = vmatprep.subr.bf16.mxu1 %v2860_v28  ;;  %v1468_v28 = vld [vmem:[%s3706_s6 + $0x6d0] sm:$0xff] }
 0x202   : > { %v2874_v36 = vpack.c.bf16 %v1474_v29, %v1468_v28  ;;  %v2764_v28 = vpack.c.bf16 %v1533_v16, %v1527_v26  ;;  %v1576_v26 = vld [vmem:[%s3706_s6 + $0xa30] sm:$0xff]  ;;  %v1582_v16 = vld [vmem:[%s3706_s6 + $0xa60] sm:$0xff] }
 0x204   : > { %2863 = vmatpush1.bf16.msra.mxu1 %v2862_v34  ;;  %v1487_v34 = vld [vmem:[%s3706_s6 + $0x768] sm:$0xff] }
 0x205   : > { %2865 = vmatprep.subr.bf16.mxu1 %v2864_v35  ;;  %v2746_v35 = vpack.c.bf16 %v1472_v24, %v1466_v23  ;;  %v2890_v24 = vpack.c.bf16 %v1522_v15, %v1516_v14 }
 0x21c   : > { %v990_v45 = vpop.f32.mrb[0].mxu0 }
 0x21d   : > { %v3057_v46 = vadd.f32 %v990_v45, %v849_v44  ;;  %v992_v47 = vpop.f32.mrb[1].mxu0  ;;  %v2748_v44 = vpack.c.bf16 %v1485_v32, %v1479_v31  ;;  %v1480_v45 = vld [vmem:[%s3706_s6 + $0x730] sm:$0xff]  ;;  %v1534_v32 = vld [vmem:[%s3706_s6 + $0x8e0] sm:$0xff] }
 0x21e   : > { %v3059_v48 = vadd.f32 %v992_v47, %v851_v20  ;;  %v2876_v20 = vpack.c.bf16 %v1487_v34, %v1481_v33  ;;  %v1491_v47 = vld [vmem:[%s3706_s6 + $0x788] sm:$0xff]  ;;  %v1528_v31 = vld [vmem:[%s3706_s6 + $0x8b0] sm:$0xff]  ;;  %v1545_v34 = vld [vmem:[%s3706_s6 + $0x938] sm:$0xff] }
 0x21f   : > { %v1208_v49 = vmul.f32 0.044715, %v3057_v46  ;;  %v1228_v30 = vmul.f32 0.5, %v3057_v46  ;;  %v1539_v33 = vld [vmem:[%s3706_s6 + $0x908] sm:$0xff] }
 0x220   : > { %v1209_v50 = vmul.f32 0.044715, %v3059_v48  ;;  %v1229_v0 = vmul.f32 0.5, %v3059_v48 }
 0x221   : > { %v1212_v51 = vmul.f32 %v3057_v46, %v1208_v49  ;;  %v1493_v49 = vld [vmem:[%s3706_s6 + $0x798] sm:$0xff] }
 0x222   : > { %v1213_v17 = vmul.f32 %v3059_v48, %v1209_v50  ;;  %v1499_v50 = vld [vmem:[%s3706_s6 + $0x7c8] sm:$0xff] }
 0x223   : > { %v1216_v52 = vadd.f32 1.0, %v1212_v51  ;;  %v2750_v51 = vpack.c.bf16 %v1484_v43, %v1478_v41  ;;  %v2894_v43 = vpack.c.bf16 %v1534_v32, %v1528_v31 }
 0x224   : > { %v1217_v53 = vadd.f32 1.0, %v1213_v17 }
 0x225   : > { %v1220_v54 = vmul.f32 %v3057_v46, %v1216_v52  ;;  %v1486_v46 = vld [vmem:[%s3706_s6 + $0x760] sm:$0xff] }
 0x226   : > { %v1221_v39 = vmul.f32 %v3059_v48, %v1217_v53  ;;  %v1497_v48 = vld [vmem:[%s3706_s6 + $0x7b8] sm:$0xff]  ;;  %v2878_v17 = vpack.c.bf16 %v1486_v46, %v1480_v45  ;;  %v1490_v52 = vld [vmem:[%s3706_s6 + $0x780] sm:$0xff]  ;;  %v1496_v53 = vld [vmem:[%s3706_s6 + $0x7b0] sm:$0xff]  ;;  %v2768_v45 = vpack.c.bf16 %v1545_v34, %v1539_v33 }
 0x227   : > { %v1224_v42 = vmul.f32 0.7978846, %v1220_v54  ;;  %v2752_v54 = vpack.c.bf16 %v1497_v48, %v1491_v47  ;;  %v1540_v47 = vld [vmem:[%s3706_s6 + $0x910] sm:$0xff]  ;;  %v1546_v48 = vld [vmem:[%s3706_s6 + $0x940] sm:$0xff] }
 0x228   : > { %v1225_v55 = vmul.f32 0.7978846, %v1221_v39  ;;  %v2880_v39 = vpack.c.bf16 %v1499_v50, %v1493_v49  ;;  %v1551_v49 = vld [vmem:[%s3706_s6 + $0x968] sm:$0xff]  ;;  %v1557_v50 = vld [vmem:[%s3706_s6 + $0x998] sm:$0xff]  ;;  %v1588_v33 = vld [vmem:[%s3706_s6 + $0xa90] sm:$0xff] }
 0x229   : > { %3177 = vtanh.f32 %v1224_v42  ;;  %v1492_v42 = vld [vmem:[%s3706_s6 + $0x790] sm:$0xff]  ;;  %v1594_v34 = vld [vmem:[%s3706_s6 + $0xac0] sm:$0xff] }
 0x22a   : > { %3179 = vtanh.f32 %v1225_v55  ;;  %v1498_v55 = vld [vmem:[%s3706_s6 + $0x7c0] sm:$0xff] }
 0x22b   : > { %v2882_v61 = vpack.c.bf16 %v1498_v55, %v1492_v42  ;;  %v2772_v42 = vpack.c.bf16 %v1557_v50, %v1551_v49  ;;  %v1600_v49 = vld [vmem:[%s3706_s6 + $0xaf0] sm:$0xff]  ;;  %v1606_v50 = vld [vmem:[%s3706_s6 + $0xb20] sm:$0xff] }
 0x233   : > { %v3178_v56 = vpop.eup %3177 }
 0x234   : > { %v3180_v59 = vpop.eup %3179  ;;  %v1236_v60 = vadd.f32 1.0, %v3178_v56  ;;  %v1503_v56 = vld [vmem:[%s3706_s6 + $0x7e8] sm:$0xff] }
 0x235   : > { %v1237_v19 = vadd.f32 1.0, %v3180_v59  ;;  %v1511_v59 = vld [vmem:[%s3706_s6 + $0x828] sm:$0xff] }
 0x236   : > { %v4289_v9 = vmul.f32 %v1236_v60, %v1228_v30  ;;  %v2754_v60 = vpack.c.bf16 %v1496_v53, %v1490_v52  ;;  %v1521_v30 = vld [vmem:[%s3706_s6 + $0x878] sm:$0xff]  ;;  %v2898_v53 = vpack.c.bf16 %v1546_v48, %v1540_v47 }
 0x237   : > { %v4285_v4 = vmul.f32 %v1237_v19, %v1229_v0  ;;  %v2756_v0 = vpack.c.bf16 %v1509_v57, %v1503_v56  ;;  %v2884_v19 = vpack.c.bf16 %v1511_v59, %v1505_v58  ;;  %v2760_v12 = vpack.c.bf16 %v1521_v30, %v1515_v3  ;;  %v1552_v56 = vld [vmem:[%s3706_s6 + $0x970] sm:$0xff]  ;;  %v1558_v57 = vld [vmem:[%s3706_s6 + $0x9a0] sm:$0xff]  ;;  %v1563_v58 = vld [vmem:[%s3706_s6 + $0x9c8] sm:$0xff] }
 0x238   : > { %v1569_v59 = vld [vmem:[%s3706_s6 + $0x9f8] sm:$0xff]  ;;  %v2902_v63 = vpack.c.bf16 %v1558_v57, %v1552_v56  ;;  %v1564_v3 = vld [vmem:[%s3706_s6 + $0x9d0] sm:$0xff]  ;;  %v1570_v30 = vld [vmem:[%s3706_s6 + $0xa00] sm:$0xff] }
 0x239   : > { %1698 = vmatprep.mubr.f32.mxu0 %v4285_v4  ;;  %1840 = vmatprep.mubr.f32.mxu1 %v4285_v4  ;;  %v2776_v1 = vpack.c.bf16 %v1569_v59, %v1563_v58  ;;  %v1612_v58 = vld [vmem:[%s3706_s6 + $0xb50] sm:$0xff]  ;;  %v1618_v59 = vld [vmem:[%s3706_s6 + $0xb80] sm:$0xff] }
 0x23a   : > { %1699 = vmatmul.mubr.f32.vlgmr.msra.gmra.mrb[2].mxu0 %v4289_v9  ;;  %1841 = vmatmul.mubr.f32.vlgmr.msra.gmra.mrb[4].mxu1 %v4289_v9 }
 0x23b   : > { %2739 = vmatpush1.bf16.msra.mxu0 %v2738_v5  ;;  %2867 = vmatpush1.bf16.msra.mxu1 %v2866_v6  ;;  %v1517_v5 = vld [vmem:[%s3706_s6 + $0x858] sm:$0xff]  ;;  %v1523_v6 = vld [vmem:[%s3706_s6 + $0x888] sm:$0xff] }
 0x23c   : > { %2741 = vmatprep.subr.bf16.mxu0 %v2740_v10  ;;  %2869 = vmatprep.subr.bf16.mxu1 %v2868_v11  ;;  %v1514_v10 = vld [vmem:[%s3706_s6 + $0x840] sm:$0xff]  ;;  %v1520_v11 = vld [vmem:[%s3706_s6 + $0x870] sm:$0xff]  ;;  %v2888_v13 = vpack.c.bf16 %v1523_v6, %v1517_v5  ;;  %v1575_v5 = vld [vmem:[%s3706_s6 + $0xa28] sm:$0xff] }
 0x23d   : > { %v2762_v23 = vpack.c.bf16 %v1520_v11, %v1514_v10  ;;  %v1581_v6 = vld [vmem:[%s3706_s6 + $0xa58] sm:$0xff]  ;;  %v2906_v11 = vpack.c.bf16 %v1570_v30, %v1564_v3  ;;  %v1628_v3 = vld [vmem:[%s3706_s6 + $0xbd0] sm:$0xff] }
 0x23e   : > { %v2780_v14 = vpack.c.bf16 %v1581_v6, %v1575_v5  ;;  %v1624_v5 = vld [vmem:[%s3706_s6 + $0xbb0] sm:$0xff]  ;;  %v1630_v6 = vld [vmem:[%s3706_s6 + $0xbe0] sm:$0xff] }
 0x23f   : > { %2743 = vmatpush1.bf16.msra.mxu0 %v2742_v21  ;;  %2871 = vmatpush1.bf16.msra.mxu1 %v2870_v22  ;;  %v1529_v21 = vld [vmem:[%s3706_s6 + $0x8b8] sm:$0xff]  ;;  %v1535_v22 = vld [vmem:[%s3706_s6 + $0x8e8] sm:$0xff] }
 0x240   : > { %2745 = vmatprep.subr.bf16.mxu0 %v2744_v25  ;;  %2873 = vmatprep.subr.bf16.mxu1 %v2872_v27  ;;  %v1526_v25 = vld [vmem:[%s3706_s6 + $0x8a0] sm:$0xff]  ;;  %v1532_v27 = vld [vmem:[%s3706_s6 + $0x8d0] sm:$0xff]  ;;  %v2892_v29 = vpack.c.bf16 %v1535_v22, %v1529_v21  ;;  %v1587_v21 = vld [vmem:[%s3706_s6 + $0xa88] sm:$0xff] }
 0x241   : > { %v2766_v41 = vpack.c.bf16 %v1532_v27, %v1526_v25  ;;  %v1593_v22 = vld [vmem:[%s3706_s6 + $0xab8] sm:$0xff]  ;;  %v2910_v27 = vpack.c.bf16 %v1582_v16, %v1576_v26 }
 0x242   : > { %v2784_v31 = vpack.c.bf16 %v1593_v22, %v1587_v21 }
 0x243   : > { %2747 = vmatpush1.bf16.msra.mxu0 %v2746_v35  ;;  %2875 = vmatpush1.bf16.msra.mxu1 %v2874_v36  ;;  %v1541_v35 = vld [vmem:[%s3706_s6 + $0x918] sm:$0xff]  ;;  %v1547_v36 = vld [vmem:[%s3706_s6 + $0x948] sm:$0xff] }
 0x244   : > { %2749 = vmatprep.subr.bf16.mxu0 %v2748_v44  ;;  %2877 = vmatprep.subr.bf16.mxu1 %v2876_v20  ;;  %v1538_v44 = vld [vmem:[%s3706_s6 + $0x900] sm:$0xff]  ;;  %v1544_v20 = vld [vmem:[%s3706_s6 + $0x930] sm:$0xff]  ;;  %v2896_v46 = vpack.c.bf16 %v1547_v36, %v1541_v35  ;;  %v1599_v35 = vld [vmem:[%s3706_s6 + $0xae8] sm:$0xff] }
 0x245   : > { %v2770_v52 = vpack.c.bf16 %v1544_v20, %v1538_v44  ;;  %v1605_v36 = vld [vmem:[%s3706_s6 + $0xb18] sm:$0xff]  ;;  %v2914_v20 = vpack.c.bf16 %v1594_v34, %v1588_v33 }
 0x246   : > { %v2788_v47 = vpack.c.bf16 %v1605_v36, %v1599_v35 }
 0x247   : > { %2751 = vmatpush1.bf16.msra.mxu0 %v2750_v51  ;;  %2879 = vmatpush1.bf16.msra.mxu1 %v2878_v17  ;;  %v1553_v51 = vld [vmem:[%s3706_s6 + $0x978] sm:$0xff]  ;;  %v1559_v17 = vld [vmem:[%s3706_s6 + $0x9a8] sm:$0xff] }
 0x248   : > { %2753 = vmatprep.subr.bf16.mxu0 %v2752_v54  ;;  %2881 = vmatprep.subr.bf16.mxu1 %v2880_v39  ;;  %v1550_v54 = vld [vmem:[%s3706_s6 + $0x960] sm:$0xff]  ;;  %v1556_v39 = vld [vmem:[%s3706_s6 + $0x990] sm:$0xff]  ;;  %v2900_v55 = vpack.c.bf16 %v1559_v17, %v1553_v51  ;;  %v1611_v51 = vld [vmem:[%s3706_s6 + $0xb48] sm:$0xff] }
 0x249   : > { %v2774_v62 = vpack.c.bf16 %v1556_v39, %v1550_v54  ;;  %v1617_v17 = vld [vmem:[%s3706_s6 + $0xb78] sm:$0xff]  ;;  %v2918_v39 = vpack.c.bf16 %v1606_v50, %v1600_v49 }
 0x24a   : > { %v2792_v56 = vpack.c.bf16 %v1617_v17, %v1611_v51 }
 0x24b   : > { %2755 = vmatpush1.bf16.msra.mxu0 %v2754_v60  ;;  %2883 = vmatpush1.bf16.msra.mxu1 %v2882_v61  ;;  %v1565_v60 = vld [vmem:[%s3706_s6 + $0x9d8] sm:$0xff]  ;;  %v1571_v61 = vld [vmem:[%s3706_s6 + $0xa08] sm:$0xff] }
 0x24c   : > { %2757 = vmatprep.subr.bf16.mxu0 %v2756_v0  ;;  %2885 = vmatprep.subr.bf16.mxu1 %v2884_v19  ;;  %v1562_v0 = vld [vmem:[%s3706_s6 + $0x9c0] sm:$0xff]  ;;  %v1568_v19 = vld [vmem:[%s3706_s6 + $0x9f0] sm:$0xff]  ;;  %v2904_v2 = vpack.c.bf16 %v1571_v61, %v1565_v60  ;;  %v1623_v60 = vld [vmem:[%s3706_s6 + $0xba8] sm:$0xff] }
 0x24d   : > { %v2778_v10 = vpack.c.bf16 %v1568_v19, %v1562_v0  ;;  %v1629_v61 = vld [vmem:[%s3706_s6 + $0xbd8] sm:$0xff]  ;;  %v2922_v19 = vpack.c.bf16 %v1618_v59, %v1612_v58  ;;  %v1291_v58 = vld [vmem:[%s3706_s6 + $0x148] sm:$0xff] }
 0x24e   : > { %v1297_v59 = vld [vmem:[%s3706_s6 + $0x178] sm:$0xff] }
 0x24f   : > { %2759 = vmatpush1.bf16.msra.mxu0 %v2758_v7  ;;  %2887 = vmatpush1.bf16.msra.mxu1 %v2886_v8  ;;  %v1577_v7 = vld [vmem:[%s3706_s6 + $0xa38] sm:$0xff]  ;;  %v1583_v8 = vld [vmem:[%s3706_s6 + $0xa68] sm:$0xff] }
 0x250   : > { %2761 = vmatprep.subr.bf16.mxu0 %v2760_v12  ;;  %2889 = vmatprep.subr.bf16.mxu1 %v2888_v13  ;;  %v1574_v12 = vld [vmem:[%s3706_s6 + $0xa20] sm:$0xff]  ;;  %v1580_v13 = vld [vmem:[%s3706_s6 + $0xa50] sm:$0xff]  ;;  %v2908_v15 = vpack.c.bf16 %v1583_v8, %v1577_v7  ;;  %v1255_v7 = vld [vmem:[%s3706_s6 + $0x28] sm:$0xff] }
 0x251   : > { %v2782_v25 = vpack.c.bf16 %v1580_v13, %v1574_v12  ;;  %v1261_v8 = vld [vmem:[%s3706_s6 + $0x58] sm:$0xff]  ;;  %v772_v13 = vsub.s32 2, %v4261_v37 }
 0x252   : > { %v2928_v12 = vpack.c.bf16 %v1261_v8, %v1255_v7  ;;  %v1314_v8 = vld [vmem:[%s3706_s6 + $0x200] sm:$0xff] }
 0x253   : > { %2763 = vmatpush1.bf16.msra.mxu0 %v2762_v23  ;;  %2891 = vmatpush1.bf16.msra.mxu1 %v2890_v24  ;;  %v1589_v23 = vld [vmem:[%s3706_s6 + $0xa98] sm:$0xff]  ;;  %v1595_v24 = vld [vmem:[%s3706_s6 + $0xac8] sm:$0xff] }
 0x254   : > { %2765 = vmatprep.subr.bf16.mxu0 %v2764_v28  ;;  %2893 = vmatprep.subr.bf16.mxu1 %v2892_v29  ;;  %v1586_v28 = vld [vmem:[%s3706_s6 + $0xa80] sm:$0xff]  ;;  %v1592_v29 = vld [vmem:[%s3706_s6 + $0xab0] sm:$0xff]  ;;  %v2912_v32 = vpack.c.bf16 %v1595_v24, %v1589_v23 }
 0x255   : > { %v2786_v44 = vpack.c.bf16 %v1592_v29, %v1586_v28 }
 0x257   : > { %2767 = vmatpush1.bf16.msra.mxu0 %v2766_v41  ;;  %2895 = vmatpush1.bf16.msra.mxu1 %v2894_v43  ;;  %v1601_v41 = vld [vmem:[%s3706_s6 + $0xaf8] sm:$0xff]  ;;  %v1607_v43 = vld [vmem:[%s3706_s6 + $0xb28] sm:$0xff] }
 0x258   : > { %2769 = vmatprep.subr.bf16.mxu0 %v2768_v45  ;;  %2897 = vmatprep.subr.bf16.mxu1 %v2896_v46  ;;  %v1598_v45 = vld [vmem:[%s3706_s6 + $0xae0] sm:$0xff]  ;;  %v1604_v46 = vld [vmem:[%s3706_s6 + $0xb10] sm:$0xff]  ;;  %v2916_v48 = vpack.c.bf16 %v1607_v43, %v1601_v41 }
 0x259   : > { %v2790_v54 = vpack.c.bf16 %v1604_v46, %v1598_v45  ;;  %v1254_v43 = vld [vmem:[%s3706_s6 + $0x20] sm:$0xff]  ;;  %v1267_v46 = vld [vmem:[%s3706_s6 + $0x88] sm:$0xff] }
 0x25b   : > { %2771 = vmatpush1.bf16.msra.mxu0 %v2770_v52  ;;  %2899 = vmatpush1.bf16.msra.mxu1 %v2898_v53  ;;  %v1613_v52 = vld [vmem:[%s3706_s6 + $0xb58] sm:$0xff]  ;;  %v1619_v53 = vld [vmem:[%s3706_s6 + $0xb88] sm:$0xff] }
 0x25c   : > { %2773 = vmatprep.subr.bf16.mxu0 %v2772_v42  ;;  %2901 = vmatprep.subr.bf16.mxu1 %v2900_v55  ;;  %v1610_v42 = vld [vmem:[%s3706_s6 + $0xb40] sm:$0xff]  ;;  %v1616_v55 = vld [vmem:[%s3706_s6 + $0xb70] sm:$0xff]  ;;  %v2920_v57 = vpack.c.bf16 %v1619_v53, %v1613_v52 }
 0x25d   : > { %v2794_v0 = vpack.c.bf16 %v1616_v55, %v1610_v42  ;;  %v1266_v52 = vld [vmem:[%s3706_s6 + $0x80] sm:$0xff]  ;;  %v1272_v53 = vld [vmem:[%s3706_s6 + $0xb0] sm:$0xff] }
 0x25e   : > { %v2934_v42 = vpack.c.bf16 %v1272_v53, %v1266_v52  ;;  %v1387_v52 = vld [vmem:[%s3706_s6 + $0x448] sm:$0xff]  ;;  %v1393_v53 = vld [vmem:[%s3706_s6 + $0x478] sm:$0xff] }
 0x25f   : > { %2775 = vmatpush1.bf16.msra.mxu0 %v2774_v62  ;;  %2903 = vmatpush1.bf16.msra.mxu1 %v2902_v63  ;;  %v1625_v62 = vld [vmem:[%s3706_s6 + $0xbb8] sm:$0xff]  ;;  %v1631_v63 = vld [vmem:[%s3706_s6 + $0xbe8] sm:$0xff] }
 0x260   : > { %2777 = vmatprep.subr.bf16.mxu0 %v2776_v1  ;;  %2905 = vmatprep.subr.bf16.mxu1 %v2904_v2  ;;  %v1622_v1 = vld [vmem:[%s3706_s6 + $0xba0] sm:$0xff]  ;;  %v2796_v2 = vpack.c.bf16 %v1629_v61, %v1623_v60  ;;  %v2924_v30 = vpack.c.bf16 %v1631_v63, %v1625_v62  ;;  %v2940_v61 = vpack.c.bf16 %v1297_v59, %v1291_v58  ;;  %v1296_v63 = vld [vmem:[%s3706_s6 + $0x170] sm:$0xff] }
 0x261   : > { %v1290_v62 = vld [vmem:[%s3706_s6 + $0x140] sm:$0xff] }
 0x263   : > { %2779 = vmatpush1.bf16.msra.mxu0 %v2778_v10  ;;  %2907 = vmatpush1.bf16.msra.mxu1 %v2906_v11  ;;  %v2798_v10 = vpack.c.bf16 %v1628_v3, %v1622_v1  ;;  %v2926_v11 = vpack.c.bf16 %v1630_v6, %v1624_v5  ;;  %v1308_v3 = vld [vmem:[%s3706_s6 + $0x1d0] sm:$0xff]  ;;  %v1321_v5 = vld [vmem:[%s3706_s6 + $0x238] sm:$0xff] }
 0x264   : > { %2781 = vmatprep.subr.bf16.mxu0 %v2780_v14  ;;  %2909 = vmatprep.subr.bf16.mxu1 %v2908_v15  ;;  %v776_v14 = vsub.s32 3, %v4261_v37  ;;  %v773_v15 = vrot.slane %v4266_v18, %v772_v13 }
 0x266   : > { %v777_v26 = vrot.slane %v4266_v18, %v776_v14 }
 0x267   : > { %2783 = vmatpush1.bf16.msra.mxu0 %v2782_v25  ;;  %2911 = vmatpush1.bf16.msra.mxu1 %v2910_v27 }
 0x268   : > { %2785 = vmatprep.subr.bf16.mxu0 %v2784_v31  ;;  %2913 = vmatprep.subr.bf16.mxu1 %v2912_v32 }
 0x26b   : > { %2787 = vmatpush1.bf16.msra.mxu0 %v2786_v44  ;;  %2915 = vmatpush1.bf16.msra.mxu1 %v2914_v20  ;;  %v1260_v44 = vld [vmem:[%s3706_s6 + $0x50] sm:$0xff] }
 0x26c   : > { %2789 = vmatprep.subr.bf16.mxu0 %v2788_v47  ;;  %2917 = vmatprep.subr.bf16.mxu1 %v2916_v48  ;;  %v1273_v47 = vld [vmem:[%s3706_s6 + $0xb8] sm:$0xff]  ;;  %v2930_v50 = vpack.c.bf16 %v1260_v44, %v1254_v43  ;;  %v1362_v44 = vld [vmem:[%s3706_s6 + $0x380] sm:$0xff] }
 0x26d   : > { %v2932_v17 = vpack.c.bf16 %v1273_v47, %v1267_v46  ;;  %v1381_v46 = vld [vmem:[%s3706_s6 + $0x418] sm:$0xff] }
 0x26f   : > { %2791 = vmatpush1.bf16.msra.mxu0 %v2790_v54  ;;  %2919 = vmatpush1.bf16.msra.mxu1 %v2918_v39  ;;  %v1279_v54 = vld [vmem:[%s3706_s6 + $0xe8] sm:$0xff]  ;;  %v1285_v39 = vld [vmem:[%s3706_s6 + $0x118] sm:$0xff] }
 0x270   : > { %2793 = vmatprep.subr.bf16.mxu0 %v2792_v56  ;;  %2921 = vmatprep.subr.bf16.mxu1 %v2920_v57  ;;  %v2936_v55 = vpack.c.bf16 %v1285_v39, %v1279_v54  ;;  %v1278_v56 = vld [vmem:[%s3706_s6 + $0xe0] sm:$0xff]  ;;  %v1284_v57 = vld [vmem:[%s3706_s6 + $0x110] sm:$0xff]  ;;  %v2972_v39 = vpack.c.bf16 %v1393_v53, %v1387_v52 }
 0x271   : > { %v2938_v60 = vpack.c.bf16 %v1284_v57, %v1278_v56  ;;  %v1399_v56 = vld [vmem:[%s3706_s6 + $0x4a8] sm:$0xff]  ;;  %v1405_v57 = vld [vmem:[%s3706_s6 + $0x4d8] sm:$0xff]  ;;  %v1494_v52 = vld [vmem:[%s3706_s6 + $0x7a0] sm:$0xff] }
 0x272   : > { %v2976_v59 = vpack.c.bf16 %v1405_v57, %v1399_v56  ;;  %v1500_v53 = vld [vmem:[%s3706_s6 + $0x7d0] sm:$0xff]  ;;  %v1506_v56 = vld [vmem:[%s3706_s6 + $0x800] sm:$0xff] }
 0x273   : > { %2795 = vmatpush1.bf16.msra.mxu0 %v2794_v0  ;;  %2923 = vmatpush1.bf16.msra.mxu1 %v2922_v19  ;;  %v1309_v0 = vld [vmem:[%s3706_s6 + $0x1d8] sm:$0xff]  ;;  %v2942_v19 = vpack.c.bf16 %v1296_v63, %v1290_v62  ;;  %v1411_v62 = vld [vmem:[%s3706_s6 + $0x508] sm:$0xff]  ;;  %v1512_v57 = vld [vmem:[%s3706_s6 + $0x830] sm:$0xff] }
 0x274   : > { %2797 = vmatprep.subr.bf16.mxu0 %v2796_v2  ;;  %2925 = vmatprep.subr.bf16.mxu1 %v2924_v30  ;;  %v1302_v2 = vld [vmem:[%s3706_s6 + $0x1a0] sm:$0xff]  ;;  %v1315_v30 = vld [vmem:[%s3706_s6 + $0x208] sm:$0xff]  ;;  %v1417_v63 = vld [vmem:[%s3706_s6 + $0x538] sm:$0xff] }
 0x275   : > { %v2946_v6 = vpack.c.bf16 %v1308_v3, %v1302_v2  ;;  %v2948_v7 = vpack.c.bf16 %v1321_v5, %v1315_v30  ;;  %v1423_v2 = vld [vmem:[%s3706_s6 + $0x568] sm:$0xff]  ;;  %v1429_v3 = vld [vmem:[%s3706_s6 + $0x598] sm:$0xff] }
 0x276   : > { %v2984_v5 = vpack.c.bf16 %v1429_v3, %v1423_v2  ;;  %v1530_v2 = vld [vmem:[%s3706_s6 + $0x8c0] sm:$0xff]  ;;  %v1536_v3 = vld [vmem:[%s3706_s6 + $0x8f0] sm:$0xff] }
 0x277   : > { %2799 = vmatpush1.bf16.msra.mxu0 %v2798_v10  ;;  %2927 = vmatpush1.bf16.msra.mxu1 %v2926_v11  ;;  %v1320_v10 = vld [vmem:[%s3706_s6 + $0x230] sm:$0xff]  ;;  %v1327_v11 = vld [vmem:[%s3706_s6 + $0x268] sm:$0xff] }
 0x278   : > { %2929 = vmatprep.subr.bf16.mxu0 %v2928_v12  ;;  %v1333_v12 = vld [vmem:[%s3706_s6 + $0x298] sm:$0xff] }
 0x29a   : > { %v1203_v16 = vpop.f32.mrb[2].mxu1 }
 0x29b   : > { %v3060_v21 = vadd.f32 %v1203_v16, %v773_v15  ;;  %v1205_v22 = vpop.f32.mrb[3].mxu1  ;;  %v2950_v15 = vpack.c.bf16 %v1320_v10, %v1314_v8  ;;  %v1326_v16 = vld [vmem:[%s3706_s6 + $0x260] sm:$0xff]  ;;  %v1435_v8 = vld [vmem:[%s3706_s6 + $0x5c8] sm:$0xff]  ;;  %v1441_v10 = vld [vmem:[%s3706_s6 + $0x5f8] sm:$0xff] }
 0x29c   : > { %v3061_v23 = vadd.f32 %v1205_v22, %v777_v26  ;;  %v2952_v26 = vpack.c.bf16 %v1333_v12, %v1327_v11  ;;  %v1339_v22 = vld [vmem:[%s3706_s6 + $0x2c8] sm:$0xff]  ;;  %v2988_v12 = vpack.c.bf16 %v1441_v10, %v1435_v8  ;;  %v1542_v8 = vld [vmem:[%s3706_s6 + $0x920] sm:$0xff]  ;;  %v1548_v10 = vld [vmem:[%s3706_s6 + $0x950] sm:$0xff] }
 0x29d   : > { %v1210_v24 = vmul.f32 0.044715, %v3060_v21  ;;  %v1230_v48 = vmul.f32 0.5, %v3060_v21 }
 0x29e   : > { %v1211_v25 = vmul.f32 0.044715, %v3061_v23  ;;  %v1231_v20 = vmul.f32 0.5, %v3061_v23 }
 0x29f   : > { %v1214_v27 = vmul.f32 %v3060_v21, %v1210_v24 }
 0x2a0   : > { %v1215_v28 = vmul.f32 %v3061_v23, %v1211_v25 }
 0x2a1   : > { %v1218_v29 = vadd.f32 1.0, %v1214_v27  ;;  %v1338_v27 = vld [vmem:[%s3706_s6 + $0x2c0] sm:$0xff] }
 0x2a2   : > { %v1219_v31 = vadd.f32 1.0, %v1215_v28  ;;  %v1344_v28 = vld [vmem:[%s3706_s6 + $0x2f0] sm:$0xff] }
 0x2a3   : > { %v1222_v32 = vmul.f32 %v3060_v21, %v1218_v29  ;;  %v1332_v21 = vld [vmem:[%s3706_s6 + $0x290] sm:$0xff]  ;;  %v1351_v29 = vld [vmem:[%s3706_s6 + $0x328] sm:$0xff] }
 0x2a4   : > { %v1223_v33 = vmul.f32 %v3061_v23, %v1219_v31  ;;  %v1345_v23 = vld [vmem:[%s3706_s6 + $0x2f8] sm:$0xff]  ;;  %v2954_v24 = vpack.c.bf16 %v1332_v21, %v1326_v16  ;;  %v1447_v16 = vld [vmem:[%s3706_s6 + $0x628] sm:$0xff] }
 0x2a5   : > { %v1226_v34 = vmul.f32 0.7978846, %v1222_v32  ;;  %v2956_v25 = vpack.c.bf16 %v1345_v23, %v1339_v22  ;;  %v1357_v31 = vld [vmem:[%s3706_s6 + $0x358] sm:$0xff]  ;;  %v2958_v32 = vpack.c.bf16 %v1344_v28, %v1338_v27  ;;  %v1459_v27 = vld [vmem:[%s3706_s6 + $0x688] sm:$0xff] }
 0x2a6   : > { %v1227_v35 = vmul.f32 0.7978846, %v1223_v33  ;;  %v2960_v33 = vpack.c.bf16 %v1357_v31, %v1351_v29  ;;  %v1453_v21 = vld [vmem:[%s3706_s6 + $0x658] sm:$0xff] }
 0x2a7   : > { %3181 = vtanh.f32 %v1226_v34  ;;  %v1350_v34 = vld [vmem:[%s3706_s6 + $0x320] sm:$0xff]  ;;  %v2992_v23 = vpack.c.bf16 %v1453_v21, %v1447_v16  ;;  %v1465_v28 = vld [vmem:[%s3706_s6 + $0x6b8] sm:$0xff]  ;;  %v1560_v21 = vld [vmem:[%s3706_s6 + $0x9b0] sm:$0xff] }
 0x2a8   : > { %3183 = vtanh.f32 %v1227_v35  ;;  %v1356_v35 = vld [vmem:[%s3706_s6 + $0x350] sm:$0xff]  ;;  %v2996_v31 = vpack.c.bf16 %v1465_v28, %v1459_v27  ;;  %v1554_v16 = vld [vmem:[%s3706_s6 + $0x980] sm:$0xff] }
 0x2a9   : > { %v1566_v27 = vld [vmem:[%s3706_s6 + $0x9e0] sm:$0xff]  ;;  %v1572_v28 = vld [vmem:[%s3706_s6 + $0xa10] sm:$0xff] }
 0x2b1   : > { %v3182_v18 = vpop.eup %3181 }
 0x2b2   : > { %v3184_v36 = vpop.eup %3183  ;;  %v1238_v41 = vadd.f32 1.0, %v3182_v18  ;;  %v1363_v18 = vld [vmem:[%s3706_s6 + $0x388] sm:$0xff] }
 0x2b3   : > { %v1239_v45 = vadd.f32 1.0, %v3184_v36  ;;  %v1369_v36 = vld [vmem:[%s3706_s6 + $0x3b8] sm:$0xff] }
 0x2b4   : > { %v4425_v51 = vmul.f32 %v1238_v41, %v1230_v48  ;;  %v2962_v41 = vpack.c.bf16 %v1356_v35, %v1350_v34  ;;  %v2964_v43 = vpack.c.bf16 %v1369_v36, %v1363_v18  ;;  %v1471_v34 = vld [vmem:[%s3706_s6 + $0x6e8] sm:$0xff]  ;;  %v1477_v35 = vld [vmem:[%s3706_s6 + $0x718] sm:$0xff] }
 0x2b5   : > { %v4423_v49 = vmul.f32 %v1239_v45, %v1231_v20  ;;  %v1368_v20 = vld [vmem:[%s3706_s6 + $0x3b0] sm:$0xff]  ;;  %v1375_v45 = vld [vmem:[%s3706_s6 + $0x3e8] sm:$0xff]  ;;  %v3000_v36 = vpack.c.bf16 %v1477_v35, %v1471_v34  ;;  %v1578_v34 = vld [vmem:[%s3706_s6 + $0xa40] sm:$0xff] }
 0x2b6   : > { %v2966_v47 = vpack.c.bf16 %v1368_v20, %v1362_v44  ;;  %v2968_v48 = vpack.c.bf16 %v1381_v46, %v1375_v45  ;;  %v1483_v44 = vld [vmem:[%s3706_s6 + $0x748] sm:$0xff]  ;;  %v1489_v20 = vld [vmem:[%s3706_s6 + $0x778] sm:$0xff]  ;;  %v1482_v46 = vld [vmem:[%s3706_s6 + $0x740] sm:$0xff] }
 0x2b7   : > { %1769 = vmatprep.mubr.f32.mxu0 %v4423_v49  ;;  %1911 = vmatprep.mubr.f32.mxu1 %v4423_v49  ;;  %v1584_v35 = vld [vmem:[%s3706_s6 + $0xa70] sm:$0xff] }
 0x2b8   : > { %1770 = vmatmul.mubr.f32.vlgmr.msra.gmra.mrb[2].mxu0 %v4425_v51  ;;  %1912 = vmatmul.mubr.f32.vlgmr.msra.gmra.mrb[4].mxu1 %v4425_v51 }
 0x2b9   : > { %2931 = vmatpush1.bf16.msra.mxu0 %v2930_v50  ;;  %1982 = vmatprep.mubr.f32.mxu0 %v4285_v4  ;;  %v1303_v4 = vld [vmem:[%s3706_s6 + $0x1a8] sm:$0xff]  ;;  %v1374_v50 = vld [vmem:[%s3706_s6 + $0x3e0] sm:$0xff] }
 0x2ba   : > { %2933 = vmatprep.subr.bf16.mxu0 %v2932_v17  ;;  %v2944_v1 = vpack.c.bf16 %v1309_v0, %v1303_v4  ;;  %v1380_v17 = vld [vmem:[%s3706_s6 + $0x410] sm:$0xff]  ;;  %v2980_v0 = vpack.c.bf16 %v1417_v63, %v1411_v62  ;;  %v1518_v62 = vld [vmem:[%s3706_s6 + $0x860] sm:$0xff] }
 0x2bb   : > { %v2970_v54 = vpack.c.bf16 %v1380_v17, %v1374_v50  ;;  %v1524_v63 = vld [vmem:[%s3706_s6 + $0x890] sm:$0xff] }
 0x2bd   : > { %2935 = vmatpush1.bf16.msra.mxu0 %v2934_v42  ;;  %v1386_v42 = vld [vmem:[%s3706_s6 + $0x440] sm:$0xff] }
 0x2be   : > { %2937 = vmatprep.subr.bf16.mxu0 %v2936_v55  ;;  %v1392_v55 = vld [vmem:[%s3706_s6 + $0x470] sm:$0xff] }
 0x2bf   : > { %v2974_v58 = vpack.c.bf16 %v1392_v55, %v1386_v42  ;;  %v3010_v42 = vpack.c.bf16 %v1500_v53, %v1494_v52 }
 0x2c1   : > { %2939 = vmatpush1.bf16.msra.mxu0 %v2938_v60  ;;  %v1398_v60 = vld [vmem:[%s3706_s6 + $0x4a0] sm:$0xff] }
 0x2c2   : > { %2941 = vmatprep.subr.bf16.mxu0 %v2940_v61  ;;  %v1404_v61 = vld [vmem:[%s3706_s6 + $0x4d0] sm:$0xff] }
 0x2c3   : > { %v2978_v4 = vpack.c.bf16 %v1404_v61, %v1398_v60  ;;  %v3014_v60 = vpack.c.bf16 %v1512_v57, %v1506_v56 }
 0x2c5   : > { %2943 = vmatpush1.bf16.msra.mxu0 %v2942_v19  ;;  %v1410_v19 = vld [vmem:[%s3706_s6 + $0x500] sm:$0xff] }
 0x2c6   : > { %2945 = vmatprep.subr.bf16.mxu0 %v2944_v1  ;;  %v1416_v1 = vld [vmem:[%s3706_s6 + $0x530] sm:$0xff] }
 0x2c7   : > { %v2982_v30 = vpack.c.bf16 %v1416_v1, %v1410_v19  ;;  %v3018_v19 = vpack.c.bf16 %v1524_v63, %v1518_v62  ;;  %v1246_v62 = vld [vmem:[#allocation2 + $0x10] sm:$0xff]  ;;  %v1245_v63 = vld [vmem:[#allocation2 + $0x8] sm:$0xff] }
 0x2c9   : > { %2947 = vmatpush1.bf16.msra.mxu0 %v2946_v6  ;;  %v1422_v6 = vld [vmem:[%s3706_s6 + $0x560] sm:$0xff] }
 0x2ca   : > { %2949 = vmatprep.subr.bf16.mxu0 %v2948_v7  ;;  %v1428_v7 = vld [vmem:[%s3706_s6 + $0x590] sm:$0xff] }
 0x2cb   : > { %v2986_v11 = vpack.c.bf16 %v1428_v7, %v1422_v6  ;;  %v3022_v6 = vpack.c.bf16 %v1536_v3, %v1530_v2 }
 0x2cd   : > { %2951 = vmatpush1.bf16.msra.mxu0 %v2950_v15  ;;  %v1434_v15 = vld [vmem:[%s3706_s6 + $0x5c0] sm:$0xff] }
 0x2ce   : > { %2953 = vmatprep.subr.bf16.mxu0 %v2952_v26  ;;  %v1440_v26 = vld [vmem:[%s3706_s6 + $0x5f0] sm:$0xff] }
 0x2cf   : > { %v2990_v22 = vpack.c.bf16 %v1440_v26, %v1434_v15  ;;  %v3026_v15 = vpack.c.bf16 %v1548_v10, %v1542_v8  ;;  %v1249_v8 = vld [vmem:[#allocation2 + $0x28] sm:$0xff] }
 0x2d1   : > { %2955 = vmatpush1.bf16.msra.mxu0 %v2954_v24  ;;  %v1446_v24 = vld [vmem:[%s3706_s6 + $0x620] sm:$0xff] }
 0x2d2   : > { %2957 = vmatprep.subr.bf16.mxu0 %v2956_v25  ;;  %v1452_v25 = vld [vmem:[%s3706_s6 + $0x650] sm:$0xff] }
 0x2d3   : > { %v2994_v29 = vpack.c.bf16 %v1452_v25, %v1446_v24  ;;  %v3030_v24 = vpack.c.bf16 %v1560_v21, %v1554_v16  ;;  %v2102_v21 = vsub.s32 (!%p2281_p12), 4, %v4261_v37 }
 0x2d5   : > { %2959 = vmatpush1.bf16.msra.mxu0 %v2958_v32  ;;  %v1458_v32 = vld [vmem:[%s3706_s6 + $0x680] sm:$0xff] }
 0x2d6   : > { %2961 = vmatprep.subr.bf16.mxu0 %v2960_v33  ;;  %v1464_v33 = vld [vmem:[%s3706_s6 + $0x6b0] sm:$0xff] }
 0x2d7   : > { %v2998_v18 = vpack.c.bf16 %v1464_v33, %v1458_v32  ;;  %v3034_v32 = vpack.c.bf16 %v1572_v28, %v1566_v27 }
 0x2d9   : > { %2963 = vmatpush1.bf16.msra.mxu0 %v2962_v41  ;;  %v1470_v41 = vld [vmem:[%s3706_s6 + $0x6e0] sm:$0xff] }
 0x2da   : > { %2965 = vmatprep.subr.bf16.mxu0 %v2964_v43  ;;  %v1476_v43 = vld [vmem:[%s3706_s6 + $0x710] sm:$0xff] }
 0x2db   : > { %v3002_v45 = vpack.c.bf16 %v1476_v43, %v1470_v41  ;;  %v3038_v41 = vpack.c.bf16 %v1584_v35, %v1578_v34 }
 0x2dd   : > { %2967 = vmatpush1.bf16.msra.mxu0 %v2966_v47  ;;  %v1488_v47 = vld [vmem:[%s3706_s6 + $0x770] sm:$0xff] }
 0x2de   : > { %2969 = vmatprep.subr.bf16.mxu0 %v2968_v48  ;;  %v1501_v48 = vld [vmem:[%s3706_s6 + $0x7d8] sm:$0xff]  ;;  %v3006_v50 = vpack.c.bf16 %v1488_v47, %v1482_v46 }
 0x2e1   : > { %2971 = vmatpush1.bf16.msra.mxu0 %v2970_v54  ;;  %v1507_v54 = vld [vmem:[%s3706_s6 + $0x808] sm:$0xff] }
 0x2e2   : > { %2973 = vmatprep.subr.bf16.mxu0 %v2972_v39  ;;  %v1513_v39 = vld [vmem:[%s3706_s6 + $0x838] sm:$0xff] }
 0x2e3   : > { %v3012_v55 = vpack.c.bf16 %v1513_v39, %v1507_v54  ;;  %v1614_v54 = vld [vmem:[%s3706_s6 + $0xb60] sm:$0xff]  ;;  %v1620_v39 = vld [vmem:[%s3706_s6 + $0xb90] sm:$0xff] }
 0x2e4   : > { %v3050_v56 = vpack.c.bf16 %v1620_v39, %v1614_v54 }
 0x2e5   : > { %2975 = vmatpush1.bf16.msra.mxu0 %v2974_v58  ;;  %v1519_v58 = vld [vmem:[%s3706_s6 + $0x868] sm:$0xff] }
 0x2e6   : > { %2977 = vmatprep.subr.bf16.mxu0 %v2976_v59  ;;  %v1525_v59 = vld [vmem:[%s3706_s6 + $0x898] sm:$0xff] }
 0x2e7   : > { %v3016_v61 = vpack.c.bf16 %v1525_v59, %v1519_v58  ;;  %v1626_v58 = vld [vmem:[%s3706_s6 + $0xbc0] sm:$0xff]  ;;  %v1632_v59 = vld [vmem:[%s3706_s6 + $0xbf0] sm:$0xff] }
 0x2e9   : > { %2979 = vmatpush1.bf16.msra.mxu0 %v2978_v4  ;;  %v1531_v4 = vld [vmem:[%s3706_s6 + $0x8c8] sm:$0xff] }
 0x2ea   : > { %2981 = vmatprep.subr.bf16.mxu0 %v2980_v0  ;;  %v1537_v0 = vld [vmem:[%s3706_s6 + $0x8f8] sm:$0xff] }
 0x2eb   : > { %v3020_v1 = vpack.c.bf16 %v1537_v0, %v1531_v4  ;;  %v1247_v4 = vld [vmem:[#allocation2 + $0x18] sm:$0xff] }
 0x2ed   : > { %2983 = vmatpush1.bf16.msra.mxu0 %v2982_v30  ;;  %v1543_v30 = vld [vmem:[%s3706_s6 + $0x928] sm:$0xff] }
 0x2ee   : > { %2985 = vmatprep.subr.bf16.mxu0 %v2984_v5  ;;  %v1549_v5 = vld [vmem:[%s3706_s6 + $0x958] sm:$0xff] }
 0x2ef   : > { %v3024_v7 = vpack.c.bf16 %v1549_v5, %v1543_v30 }
 0x2f1   : > { %2987 = vmatpush1.bf16.msra.mxu0 %v2986_v11  ;;  %v1555_v11 = vld [vmem:[%s3706_s6 + $0x988] sm:$0xff] }
 0x2f2   : > { %2989 = vmatprep.subr.bf16.mxu0 %v2988_v12  ;;  %v1561_v12 = vld [vmem:[%s3706_s6 + $0x9b8] sm:$0xff] }
 0x2f3   : > { %v3028_v26 = vpack.c.bf16 %v1561_v12, %v1555_v11 }
 0x2f5   : > { %2991 = vmatpush1.bf16.msra.mxu0 %v2990_v22  ;;  %v1567_v22 = vld [vmem:[%s3706_s6 + $0x9e8] sm:$0xff] }
 0x2f6   : > { %2993 = vmatprep.subr.bf16.mxu0 %v2992_v23  ;;  %v1573_v23 = vld [vmem:[%s3706_s6 + $0xa18] sm:$0xff] }
 0x2f7   : > { %v3032_v25 = vpack.c.bf16 %v1573_v23, %v1567_v22  ;;  %v2106_v22 = vsub.s32 (!%p2281_p12), 5, %v4261_v37 }
 0x2f8   : > { %1983 = vmatmul.mubr.f32.vlgmr.msra.gmra.mrb[4].mxu0 %v4289_v9  ;;  %v3004_v9 = vpack.c.bf16 %v1489_v20, %v1483_v44  ;;  %v1590_v44 = vld [vmem:[%s3706_s6 + $0xaa0] sm:$0xff]  ;;  %v1596_v20 = vld [vmem:[%s3706_s6 + $0xad0] sm:$0xff] }
 0x2f9   : > { %2995 = vmatpush1.bf16.msra.mxu0 %v2994_v29  ;;  %2053 = vmatprep.mubr.f32.mxu0 %v4423_v49  ;;  %v1495_v49 = vld [vmem:[%s3706_s6 + $0x7a8] sm:$0xff]  ;;  %v3042_v46 = vpack.c.bf16 %v1596_v20, %v1590_v44 }
 0x2fa   : > { %2997 = vmatprep.subr.bf16.mxu0 %v2996_v31  ;;  %v3008_v17 = vpack.c.bf16 %v1501_v48, %v1495_v49  ;;  %v1579_v29 = vld [vmem:[%s3706_s6 + $0xa48] sm:$0xff]  ;;  %v1585_v31 = vld [vmem:[%s3706_s6 + $0xa78] sm:$0xff]  ;;  %v1602_v49 = vld [vmem:[%s3706_s6 + $0xb00] sm:$0xff] }
 0x2fb   : > { %v3036_v33 = vpack.c.bf16 %v1585_v31, %v1579_v29  ;;  %v1608_v48 = vld [vmem:[%s3706_s6 + $0xb30] sm:$0xff] }
 0x2fc   : > { %v3046_v52 = vpack.c.bf16 %v1608_v48, %v1602_v49 }
 0x2fd   : > { %2999 = vmatpush1.bf16.msra.mxu0 %v2998_v18  ;;  %v1591_v18 = vld [vmem:[%s3706_s6 + $0xaa8] sm:$0xff] }
 0x2fe   : > { %3001 = vmatprep.subr.bf16.mxu0 %v3000_v36  ;;  %v1597_v36 = vld [vmem:[%s3706_s6 + $0xad8] sm:$0xff] }
 0x2ff   : > { %v3040_v43 = vpack.c.bf16 %v1597_v36, %v1591_v18 }
 0x301   : > { %3003 = vmatpush1.bf16.msra.mxu0 %v3002_v45  ;;  %v1603_v45 = vld [vmem:[%s3706_s6 + $0xb08] sm:$0xff] }
 0x302   : > { %3005 = vmatprep.subr.bf16.mxu0 %v3004_v9  ;;  %v1609_v9 = vld [vmem:[%s3706_s6 + $0xb38] sm:$0xff] }
 0x303   : > { %v3044_v47 = vpack.c.bf16 %v1609_v9, %v1603_v45 }
 0x305   : > { %3007 = vmatpush1.bf16.msra.mxu0 %v3006_v50  ;;  %v1615_v50 = vld [vmem:[%s3706_s6 + $0xb68] sm:$0xff] }
 0x306   : > { %3009 = vmatprep.subr.bf16.mxu0 %v3008_v17  ;;  %v1621_v17 = vld [vmem:[%s3706_s6 + $0xb98] sm:$0xff] }
 0x307   : > { %v3048_v53 = vpack.c.bf16 %v1621_v17, %v1615_v50 }
 0x309   : > { %3011 = vmatpush1.bf16.msra.mxu0 %v3010_v42  ;;  %v1627_v42 = vld [vmem:[%s3706_s6 + $0xbc8] sm:$0xff] }
 0x30a   : > { %3013 = vmatprep.subr.bf16.mxu0 %v3012_v55  ;;  %v1633_v55 = vld [vmem:[%s3706_s6 + $0xbf8] sm:$0xff] }
 0x30b   : > { %v3052_v57 = vpack.c.bf16 %v1633_v55, %v1627_v42 }
 0x30d   : > { %3015 = vmatpush1.bf16.msra.mxu0 %v3014_v60  ;;  %v3054_v60 = vpack.c.bf16 %v1632_v59, %v1626_v58 }
 0x30e   : > { %3017 = vmatprep.subr.bf16.mxu0 %v3016_v61  ;;  %v1244_v61 = vld [vmem:[#allocation2] sm:$0xff] }
 0x311   : > { %3019 = vmatpush1.bf16.msra.mxu0 %v3018_v19 }
 0x312   : > { %3021 = vmatprep.subr.bf16.mxu0 %v3020_v1 }
 0x315   : > { %3023 = vmatpush1.bf16.msra.mxu0 %v3022_v6 }
 0x316   : > { %3025 = vmatprep.subr.bf16.mxu0 %v3024_v7  ;;  %v1248_v7 = vld [vmem:[#allocation2 + $0x20] sm:$0xff] }
 0x319   : > { %3027 = vmatpush1.bf16.msra.mxu0 %v3026_v15 }
 0x31a   : > { %3029 = vmatprep.subr.bf16.mxu0 %v3028_v26  ;;  %v2082_v26 = vld [vmem:[#allocation11] sm:$0x3f] (!%p2281_p12) }
 0x31b   : > { %v2087_v23 = vrot.slane (!%p2281_p12), %v2082_v26, %v764_v38  ;;  %v2095_v27 = vrot.slane (!%p2281_p12), %v2082_v26, %v772_v13  ;;  %v2099_v29 = vrot.slane (!%p2281_p12), %v2082_v26, %v776_v14  ;;  %v2107_v34 = vrot.slane (!%p2281_p12), %v2082_v26, %v2106_v22 }
 0x31d   : > { %3031 = vmatpush1.bf16.msra.mxu0 %v3030_v24  ;;  %v2091_v24 = vrot.slane (!%p2281_p12), %v2082_v26, %v768_v40 }
 0x31e   : > { %3033 = vmatprep.subr.bf16.mxu0 %v3032_v25 }
 0x321   : > { %3035 = vmatpush1.bf16.msra.mxu0 %v3034_v32  ;;  %v2103_v32 = vrot.slane (!%p2281_p12), %v2082_v26, %v2102_v21 }
 0x322   : > { %3037 = vmatprep.subr.bf16.mxu0 %v3036_v33 }
 0x325   : > { %3039 = vmatpush1.bf16.msra.mxu0 %v3038_v41 }
 0x326   : > { %3041 = vmatprep.subr.bf16.mxu0 %v3040_v43 }
 0x329   : > { %3043 = vmatpush1.bf16.msra.mxu0 %v3042_v46 }
 0x32a   : > { %3045 = vmatprep.subr.bf16.mxu0 %v3044_v47 }
 0x32d   : > { %3047 = vmatpush1.bf16.msra.mxu0 %v3046_v52 }
 0x32e   : > { %3049 = vmatprep.subr.bf16.mxu0 %v3048_v53 }
 0x331   : > { %3051 = vmatpush1.bf16.msra.mxu0 %v3050_v56 }
 0x332   : > { %3053 = vmatprep.subr.bf16.mxu0 %v3052_v57 }
 0x335   : > { %3055 = vmatpush1.bf16.msra.mxu0 %v3054_v60 }
 0x338   : > { %2054 = vmatmul.mubr.f32.vlgmr.msra.gmra.mrb[4].mxu0 %v4425_v51 }
 0x38b   : > { %v1771_v0 = vpop.f32.mrb[2].mxu0  ;;  %v1913_v19 = vpop.f32.mrb[4].mxu1 }
 0x38c   : > { %v2060_v1 = vadd.f32 %v1771_v0, %v1244_v61  ;;  %v2062_v2 = vadd.f32 %v1913_v19, %v1246_v62  ;;  %v1773_v3 = vpop.f32.mrb[3].mxu0  ;;  %v1915_v30 = vpop.f32.mrb[5].mxu1 }
 0x38d   : > { %v2061_v5 = vadd.f32 %v1773_v3, %v1245_v63  ;;  %v2063_v6 = vadd.f32 %v1915_v30, %v1247_v4 }
 0x38e   : > { %2066 = vst [vmem:[#allocation2] sm:$0xff] %v2060_v1  ;;  %2068 = vst [vmem:[#allocation2 + $0x10] sm:$0xff] %v2062_v2 }
 0x38f   : > { %2067 = vst [vmem:[#allocation2 + $0x8] sm:$0xff] %v2061_v5  ;;  %2069 = vst [vmem:[#allocation2 + $0x18] sm:$0xff] %v2063_v6 }
 0x395   : > { %v2076_v15 = vld [vmem:[#allocation2] sm:$0xff] (!%p2281_p12)  ;;  %v2078_v25 = vld [vmem:[#allocation2 + $0x10] sm:$0xff] (!%p2281_p12) }
 0x396   : > { %v2077_v16 = vld [vmem:[#allocation2 + $0x8] sm:$0xff] (!%p2281_p12)  ;;  %v2079_v28 = vld [vmem:[#allocation2 + $0x18] sm:$0xff] (!%p2281_p12)  ;;  %v2114_v35 = vadd.f32 (!%p2281_p12), %v2087_v23, %v2076_v15  ;;  %v2116_v36 = vadd.f32 (!%p2281_p12), %v2095_v27, %v2078_v25 }
 0x397   : > { %v2115_v18 = vadd.f32 (!%p2281_p12), %v2091_v24, %v2077_v16  ;;  %v2117_v41 = vadd.f32 (!%p2281_p12), %v2099_v29, %v2079_v28 }
 0x398   : > { %2120 = vst [vmem:[#allocation12] sm:$0xff] (!%p2281_p12), %v2114_v35  ;;  %2122 = vst [vmem:[#allocation12 + $0x10] sm:$0xff] (!%p2281_p12), %v2116_v36 }
 0x399   : > { %2121 = vst [vmem:[#allocation12 + $0x8] sm:$0xff] (!%p2281_p12), %v2115_v18  ;;  %2123 = vst [vmem:[#allocation12 + $0x18] sm:$0xff] (!%p2281_p12), %v2117_v41 }
 0x409   : > { %2075 = sbr.rel (%p2281_p12) target bundleno = 1050 (0x41a), region = 68 }
 0x40b   : > { %v2055_v10 = vpop.f32.mrb[4].mxu0 }
 0x40c   : > { %v2064_v51 = vadd.f32 %v2055_v10, %v1248_v7  ;;  %v2057_v11 = vpop.f32.mrb[5].mxu0 }
 0x40d   : > { %v2065_v12 = vadd.f32 %v2057_v11, %v1249_v8 }
 0x40e   : > { %2070 = vst [vmem:[#allocation2 + $0x20] sm:$0xff] %v2064_v51 }
 0x40f   : > { %2071 = vst [vmem:[#allocation2 + $0x28] sm:$0xff] %v2065_v12 }
 0x415   : > { %v2080_v31 = vld [vmem:[#allocation2 + $0x20] sm:$0xff] }
 0x416   : > { %v2081_v33 = vld [vmem:[#allocation2 + $0x28] sm:$0xff]  ;;  %v2118_v38 = vadd.f32 %v2103_v32, %v2080_v31 }
 0x417   : > { %v2119_v43 = vadd.f32 %v2107_v34, %v2081_v33 }
 0x418   : > { %2124 = vst [vmem:[#allocation12 + $0x20] sm:$0xff] %v2118_v38 }
 0x419   : > { %2125 = vst [vmem:[#allocation12 + $0x28] sm:$0xff] %v2119_v43 }
 0x41a PF: > { %p3118_p11 = scmp.eq.s32.totalorder %s3496_s24, 5  ;;  %s3436_s13 = smov [#allocation12]  }
 0x41b   : > { %s2136_s8 = sshll.u32 %s3436_s13, 4  ;;  %s2137_s8 = int_to_ptr.vmem [resolvable:$true] %s2136_s8 }
 0x41c   : > { %s3331_s16 = scalar_lea.vmem %s2137_s8, 768  ;;  %p3338_p6 = scmp.lt.s32.totalorder %s2137_s8, %s2137_s8 }
 0x41d   : > { %p3332_p0 = scmp.ne.s32.totalorder %s2137_s8, %s3331_s16  ;;  %p3339_p8 = scmp.lt.s32.totalorder %s3331_s16, %s3331_s16 }
 0x41f   : > { %p3333_p7 = pnand %p3332_p0, %p3118_p11  ;;  %p3340_p13 = por %p3339_p8, %p3338_p6 }
 0x421   : > { %p3334_p10 = pneg %p3333_p7 }
 0x423   : > { %p3341_p3 = pnand %p3340_p13, %p3334_p10 }
 0x425   : > { %3344 = shalt.err (!%p3341_p3)
}
 0x426   : > { %s4658_s10 = sld [smem:[#allocation23_spill]] }
 0x42c   : > { %s3345_s30 = scalar_lea.hbm %s4658_s10, 768 }
 0x42d   : > { %p3346_p1 = scmp.ne.s32.totalorder %s4658_s10, %s3345_s30  ;;  %p3351_p5 = scmp.lt.u32.totalorder %s3345_s30, %s4658_s10 }
 0x42f   : > { %p3347_p4 = pnand %p3346_p1, %p3118_p11 }
 0x431   : > { %p3348_p9 = pneg %p3347_p4 }
 0x433   : > { %p3353_p2 = pnand %p3351_p5, %p3348_p9 }
 0x435   : > { %3356 = shalt.err (!%p3353_p2)
}
 0x436   : > { %3093 = dma.vmem_to_hbm [thread:$0]  (%p3118_p11), %s2137_s8, 768, %s4658_s10, [#allocation5]  }
 0x437   : > { %3398 = dma.done.wait (%p3118_p11), [#allocation5], 768  }
 0x438   : > { %3400 = vsyncadd (%p3118_p11), [#allocation5], 4294966528 }
 0x439 PF: > { %s23_s23 = sadd.s32 1, %s3423_s23   ;;  %s4659_s4 = sld [smem:[#allocation20_spill]] }
 0x43a   : > { %p20_p12 = scmp.ge.s32.totalorder %s23_s23, 8   ;;  %s4660_s14 = sld [smem:[#allocation19_spill]] }
 0x43b   : > { %s4661_s18 = smov %s3407_s19  ;;  %s4662_s19 = smov %s3411_s20 }
 0x43c   : > { %s4664_s21 = smov %s3419_s22  ;;  %22 = sbr.rel (!%p20_p12) target bundleno = 12 (0xc), region = 120 }
 0x43f   : > { %s4663_s20 = smov %s4659_s4 }
 0x440   : > { %s4665_s22 = smov %s4660_s14 }
 0x443   :  { %2149 = vsyncpa [#allocation4], 1 }
 0x444   :  { %2151 = vsyncpa [#allocation4 + $0x1], 1 }
 0x445   :  { %2152 = vsyncpa [#allocation7], 1 }
 0x446   :  { %2154 = vsyncpa [#allocation7 + $0x1], 1 }
 0x447   :  { %2155 = vsyncpa [#allocation10], 1 }
 0x448   :  { %2157 = vsyncpa [#allocation10 + $0x1], 1 }
 0x449   :  { %2158 = vsyncpa [#allocation5], 1 }
 0x44a   :  { %2160 = vsyncpa [#allocation5 + $0x1], 1 }

</bundles_post_ra>
